<compile_context>
chip_gen: v7x
topology: tpu7x:2x2x1
jax: 0.10.0
libtpu: 0.0.40
codegen_flags: <defaults>
</compile_context>

<pallas_src>
import functools

import jax
import jax.numpy as jnp
from jax import lax
from jax.experimental import pallas as pl
from jax.experimental.pallas import tpu as pltpu

POOL_SIZES = (5, 9, 13)          # as in the torch module's __init__
MAX_PAD = max(POOL_SIZES) // 2   # 6
EXT = 8                          # extended (+/-4) window for the shared 5x5 max


def _spp_kernel(x_ref, out_ref, xp_ref, m5_ref, *, branch_offsets):
    """One (batch, channel-block, branch) grid step, channels on the lane axis.

    x_ref  : (1, H, W, Cb)            NHWC input tile (resident across k=0..3)
    out_ref: (1, H, W, out_c)         output tile; branch k stored at lane
                                      offset branch_offsets[k] (width Cb)
    xp_ref : (H+2P, W+2P, Cb)         VMEM scratch: -inf-haloed copy of the tile
    m5_ref : (H+8, W+8, Cb)           VMEM scratch: shared 5x5 max, persists
                                      across the 4 branch steps
    """
    _, H, W, Cb = x_ref.shape
    P = MAX_PAD
    k = pl.program_id(2)             # 0: pool13, 1: pool9, 2: pool5, 3: identity
    o13, o9, o5, oid = branch_offsets

    @pl.when(k == 0)
    def _():
        # (a) -inf halo: bands only; interior overwritten with x (no full refill).
        neg_rows = jnp.full((P, W + 2 * P, Cb), -jnp.inf, dtype=xp_ref.dtype)
        xp_ref[0:P, :, :] = neg_rows
        xp_ref[P + H:2 * P + H, :, :] = neg_rows
        neg_cols = jnp.full((H, P, Cb), -jnp.inf, dtype=xp_ref.dtype)
        xp_ref[P:P + H, 0:P, :] = neg_cols
        xp_ref[P:P + H, P + W:2 * P + W, :] = neg_cols
        xp_ref[P:P + H, P:P + W, :] = x_ref[0]

        # (b) separable 5x5 running max over the extended (+/-4) output window.
        #     W direction: shifted operands read straight off the ref (vld offsets).
        r5 = xp_ref[:, 0:W + EXT, :]
        for t in range(1, 5):
            r5 = jnp.maximum(r5, xp_ref[:, t:t + W + EXT, :])
        #     H direction: major-dim slices of the value are plain address offsets.
        m5 = r5[0:H + EXT]
        for s in range(1, 5):
            m5 = jnp.maximum(m5, r5[s:s + H + EXT])
        m5_ref[...] = m5
        # m5_ref[v, u] = 5x5 max centred on output pixel (v-4, u-4).

        # (c) pool13 = 5x5 maxes shifted by {-4, 0, +4} in each direction.
        t13 = m5_ref[:, 0:W, :]
        for c in (4, 8):
            t13 = jnp.maximum(t13, m5_ref[:, c:c + W, :])
        p13 = t13[0:H]
        for r in (4, 8):
            p13 = jnp.maximum(p13, t13[r:r + H])
        out_ref[0, :, :, o13:o13 + Cb] = p13

    @pl.when(k == 1)
    def _():
        # pool9 = 5x5 maxes shifted by {-2, +2} in each direction.
        t9 = jnp.maximum(m5_ref[:, 2:2 + W, :], m5_ref[:, 6:6 + W, :])
        out_ref[0, :, :, o9:o9 + Cb] = jnp.maximum(t9[2:2 + H], t9[6:6 + H])

    @pl.when(k == 2)
    def _():
        # pool5 = centre crop of the shared 5x5 max.
        out_ref[0, :, :, o5:o5 + Cb] = m5_ref[4:4 + H, 4:4 + W, :]

    @pl.when(k == 3)
    def _():
        # identity branch; input block is still VMEM-resident (no re-DMA).
        out_ref[0, :, :, oid:oid + Cb] = x_ref[0]


def _tile_vmem_bytes(H, W, cb, out_c, itemsize):
    """Generous per-step VMEM footprint estimate (double-buffered I/O + scratch)."""
    P = MAX_PAD
    n_in = 2 * H * W * cb                        # input block, double-buffered
    n_out = 2 * H * W * out_c                    # output block, double-buffered
    n_xp = (H + 2 * P) * (W + 2 * P) * cb        # -inf-haloed scratch
    n_m5 = (H + EXT) * (W + EXT) * cb            # shared 5x5-max scratch
    n_tmp = ((H + 2 * P) * (W + EXT)             # r5 value
             + (H + EXT) * (W + EXT)             # m5 value
             + 2 * (H + EXT) * W) * cb           # branch-extraction temporaries
    return (n_in + n_out + n_xp + n_m5 + n_tmp) * itemsize


def _pick_channel_block(N, C, H, W, itemsize, budget_bytes=20 << 20):
    """Channel block: multiple-of-128 divisor of C under the VMEM budget,
    preferring >= 2 parallel grid steps (v7x megacore)."""
    cands = [cb for cb in (512, 384, 256, 128) if cb <= C and C % cb == 0]
    if not cands:
        return C                       # small / odd C: whole-C fallback path

    def fits(cb):
        out_c = 4 * C if C // cb == 1 else cb
        return _tile_vmem_bytes(H, W, cb, out_c, itemsize) <= budget_bytes

    fitting = [cb for cb in cands if fits(cb)]
    if not fitting:
        # TODO(synk): add spatial (H) tiling with a +/-6-row halo for very large
        # feature maps; for now take the smallest channel block as best effort.
        return cands[-1]
    for cb in fitting:                 # descending; prefer >= 2 parallel steps
        if N * (C // cb) >= 2:
            return cb
    return fitting[0]


def spatial_pyramid_pooling_nhwc(x):
    """Production path. x: (N, H, W, C) -> (N, H, W, 4*C), NHWC end-to-end.

    Output channel layout matches torch.cat([pool13, pool9, pool5, x], dim=1):
    [..., 0:C]=pool13, [C:2C]=pool9, [2C:3C]=pool5, [3C:4C]=x.
    """
    N, H, W, C = x.shape
    P = MAX_PAD
    itemsize = jnp.dtype(x.dtype).itemsize

    Cb = _pick_channel_block(N, C, H, W, itemsize)
    n_cb = C // Cb

    if n_cb > 1:
        # Aligned path: one lane-dense Cb-wide output block per (n, cb, branch).
        out_block_c = Cb
        out_index = lambda n, cb, k: (n, 0, 0, k * n_cb + cb)
        branch_offsets = (0, 0, 0, 0)
    else:
        # Whole-C path: full 4*C-wide output block, revisited across the 4 branch
        # steps and written back to HBM once per batch element.
        out_block_c = 4 * C
        out_index = lambda n, cb, k: (n, 0, 0, 0)
        branch_offsets = (0, C, 2 * C, 3 * C)

    kernel = functools.partial(_spp_kernel, branch_offsets=branch_offsets)

    return pl.pallas_call(
        kernel,
        out_shape=jax.ShapeDtypeStruct((N, H, W, 4 * C), x.dtype),
        grid=(N, n_cb, 4),
        in_specs=[pl.BlockSpec((1, H, W, Cb), lambda n, cb, k: (n, 0, 0, cb))],
        out_specs=pl.BlockSpec((1, H, W, out_block_c), out_index),
        scratch_shapes=[
            pltpu.VMEM((H + 2 * P, W + 2 * P, Cb), x.dtype),
            pltpu.VMEM((H + EXT, W + EXT, Cb), x.dtype),
        ],
        compiler_params=pltpu.CompilerParams(
            dimension_semantics=("parallel", "parallel", "arbitrary"),
            vmem_limit_bytes=32 * 1024 * 1024),
        cost_estimate=pl.CostEstimate(
            flops=14 * N * H * W * C,
            bytes_accessed=5 * N * H * W * C * itemsize,
            transcendentals=0),
    )(x)


def spatial_pyramid_pooling_nchw(x):
    """Torch-layout compatibility wrapper. x: (N, C, H, W) -> (N, 4*C, H, W).

    Pays two HBM transposes purely for NCHW parity; keep the surrounding net in
    NHWC and call spatial_pyramid_pooling_nhwc to avoid them.
    """
    out = spatial_pyramid_pooling_nhwc(jnp.transpose(x, (0, 2, 3, 1)))
    return jnp.transpose(out, (0, 3, 1, 2))


# Drop-in name matching the torch module's NCHW contract.
spatial_pyramid_pooling = spatial_pyramid_pooling_nchw


def _reference_nhwc(x):
    feats = []
    for k in (13, 9, 5):
        p = k // 2
        feats.append(lax.reduce_window(
            x, jnp.array(-jnp.inf, x.dtype), lax.max,
            window_dimensions=(1, k, k, 1), window_strides=(1, 1, 1, 1),
            padding=((0, 0), (p, p), (p, p), (0, 0))))
    feats.append(x)
    return jnp.concatenate(feats, axis=-1)


def _reference_nchw(x):
    feats = []
    for k in (13, 9, 5):
        p = k // 2
        feats.append(lax.reduce_window(
            x, jnp.array(-jnp.inf, x.dtype), lax.max,
            window_dimensions=(1, 1, k, k), window_strides=(1, 1, 1, 1),
            padding=((0, 0), (0, 0), (p, p), (p, p))))
    feats.append(x)
    return jnp.concatenate(feats, axis=1)


if __name__ == "__main__":
    key = jax.random.PRNGKey(0)
    N, C, H, W = 2, 4, 16, 16
    x_nchw = jax.random.normal(key, (N, C, H, W), dtype=jnp.float32)

    # Production path: NHWC in / NHWC out, no wrapper HBM transposes.
    x_nhwc = jnp.transpose(x_nchw, (0, 2, 3, 1))
    out_nhwc = jax.block_until_ready(spatial_pyramid_pooling_nhwc(x_nhwc))
    ref_nhwc = jax.block_until_ready(_reference_nhwc(x_nhwc))
    assert out_nhwc.shape == (N, H, W, 4 * C), out_nhwc.shape
    assert jnp.allclose(out_nhwc, ref_nhwc), "NHWC SPP mismatch vs reference"

    # Torch-layout compatibility: matches cat([p13, p9, p5, x], dim=1) in NCHW.
    out_nchw = jax.block_until_ready(spatial_pyramid_pooling(x_nchw))
    ref_nchw = jax.block_until_ready(_reference_nchw(x_nchw))
    assert out_nchw.shape == (N, 4 * C, H, W), out_nchw.shape
    assert jnp.allclose(out_nchw, ref_nchw), "NCHW SPP mismatch vs reference"

    # bf16 passthrough (no upcast in the wrapper; max is exact in bf16).
    xb = x_nhwc.astype(jnp.bfloat16)
    out_b = jax.block_until_ready(spatial_pyramid_pooling_nhwc(xb))
    assert out_b.dtype == jnp.bfloat16
    assert jnp.allclose(out_b, _reference_nhwc(xb)), "bf16 SPP mismatch"

    print("KERNEL_OK")
</pallas_src>

<mosaic_0001>
module attributes {stable_mosaic.version = 11 : i64} {
  func.func @_spp_kernel(%arg0: i32, %arg1: i32, %arg2: i32, %arg3: memref<1x16x16x4xf32, #tpu.memory_space<vmem>>, %arg4: memref<1x16x16x16xf32, #tpu.memory_space<vmem>>, %arg5: memref<28x28x4xf32, #tpu.memory_space<vmem>>, %arg6: memref<24x24x4xf32, #tpu.memory_space<vmem>>) attributes {dimension_semantics = [#tpu.dimension_semantics<parallel>, #tpu.dimension_semantics<parallel>, #tpu.dimension_semantics<arbitrary>], iteration_bounds = array<i64: 2, 1, 4>, scalar_prefetch = 0 : i64, scratch_operands = 2 : i64, tpu.core_type = #tpu.core_type<tc>, window_params = [{transform_indices = @transform_0, window_bounds = array<i64: 1, 16, 16, 4>}, {transform_indices = @transform_1, window_bounds = array<i64: 1, 16, 16, 16>}]} {
    %c0_i32 = arith.constant 0 : i32
    %0 = arith.cmpi eq, %arg2, %c0_i32 : i32
    %1 = arith.extui %0 : i1 to i32
    %c0_i32_0 = arith.constant 0 : i32
    %2 = arith.cmpi ne, %1, %c0_i32_0 : i32
    scf.if %2 {
      %cst = arith.constant 0xFF800000 : f32
      %12 = vector.broadcast %cst : f32 to vector<6x28x4xf32>
      %c0 = arith.constant 0 : index
      %c0_4 = arith.constant 0 : index
      %c0_5 = arith.constant 0 : index
      %13 = vector.load %arg5[%c0, %c0_4, %c0_5] : memref<28x28x4xf32, #tpu.memory_space<vmem>>, vector<6x28x4xf32>
      tpu.vector_store %arg5[%c0, %c0_4, %c0_5], %12 {strides = array<i32>} : memref<28x28x4xf32, #tpu.memory_space<vmem>>, vector<6x28x4xf32>,
      %c22 = arith.constant 22 : index
      %c0_6 = arith.constant 0 : index
      %c0_7 = arith.constant 0 : index
      %14 = vector.load %arg5[%c22, %c0_6, %c0_7] : memref<28x28x4xf32, #tpu.memory_space<vmem>>, vector<6x28x4xf32>
      tpu.vector_store %arg5[%c22, %c0_6, %c0_7], %12 {strides = array<i32>} : memref<28x28x4xf32, #tpu.memory_space<vmem>>, vector<6x28x4xf32>,
      %cst_8 = arith.constant 0xFF800000 : f32
      %15 = vector.broadcast %cst_8 : f32 to vector<16x6x4xf32>
      %c6 = arith.constant 6 : index
      %c0_9 = arith.constant 0 : index
      %c0_10 = arith.constant 0 : index
      %16 = vector.load %arg5[%c6, %c0_9, %c0_10] : memref<28x28x4xf32, #tpu.memory_space<vmem>>, vector<16x6x4xf32>
      tpu.vector_store %arg5[%c6, %c0_9, %c0_10], %15 {strides = array<i32>} : memref<28x28x4xf32, #tpu.memory_space<vmem>>, vector<16x6x4xf32>,
      %c6_11 = arith.constant 6 : index
      %c22_12 = arith.constant 22 : index
      %c0_13 = arith.constant 0 : index
      %17 = vector.load %arg5[%c6_11, %c22_12, %c0_13] : memref<28x28x4xf32, #tpu.memory_space<vmem>>, vector<16x6x4xf32>
      tpu.vector_store %arg5[%c6_11, %c22_12, %c0_13], %15 {strides = array<i32>} : memref<28x28x4xf32, #tpu.memory_space<vmem>>, vector<16x6x4xf32>,
      %c0_14 = arith.constant 0 : index
      %c0_15 = arith.constant 0 : index
      %c0_16 = arith.constant 0 : index
      %c0_17 = arith.constant 0 : index
      %18 = vector.load %arg3[%c0_14, %c0_15, %c0_16, %c0_17] : memref<1x16x16x4xf32, #tpu.memory_space<vmem>>, vector<1x16x16x4xf32>
      %19 = vector.shape_cast %18 : vector<1x16x16x4xf32> to vector<16x16x4xf32>
      %c6_18 = arith.constant 6 : index
      %c6_19 = arith.constant 6 : index
      %c0_20 = arith.constant 0 : index
      %20 = vector.load %arg5[%c6_18, %c6_19, %c0_20] : memref<28x28x4xf32, #tpu.memory_space<vmem>>, vector<16x16x4xf32>
      tpu.vector_store %arg5[%c6_18, %c6_19, %c0_20], %19 {strides = array<i32>} : memref<28x28x4xf32, #tpu.memory_space<vmem>>, vector<16x16x4xf32>,
      %c0_21 = arith.constant 0 : index
      %c0_22 = arith.constant 0 : index
      %c0_23 = arith.constant 0 : index
      %21 = vector.load %arg5[%c0_21, %c0_22, %c0_23] : memref<28x28x4xf32, #tpu.memory_space<vmem>>, vector<28x24x4xf32>
      %c0_24 = arith.constant 0 : index
      %c1 = arith.constant 1 : index
      %c0_25 = arith.constant 0 : index
      %22 = vector.load %arg5[%c0_24, %c1, %c0_25] : memref<28x28x4xf32, #tpu.memory_space<vmem>>, vector<28x24x4xf32>
      %23 = arith.maximumf %21, %22 : vector<28x24x4xf32>
      %c0_26 = arith.constant 0 : index
      %c2 = arith.constant 2 : index
      %c0_27 = arith.constant 0 : index
      %24 = vector.load %arg5[%c0_26, %c2, %c0_27] : memref<28x28x4xf32, #tpu.memory_space<vmem>>, vector<28x24x4xf32>
      %25 = arith.maximumf %23, %24 : vector<28x24x4xf32>
      %c0_28 = arith.constant 0 : index
      %c3 = arith.constant 3 : index
      %c0_29 = arith.constant 0 : index
      %26 = vector.load %arg5[%c0_28, %c3, %c0_29] : memref<28x28x4xf32, #tpu.memory_space<vmem>>, vector<28x24x4xf32>
      %27 = arith.maximumf %25, %26 : vector<28x24x4xf32>
      %c0_30 = arith.constant 0 : index
      %c4 = arith.constant 4 : index
      %c0_31 = arith.constant 0 : index
      %28 = vector.load %arg5[%c0_30, %c4, %c0_31] : memref<28x28x4xf32, #tpu.memory_space<vmem>>, vector<28x24x4xf32>
      %29 = arith.maximumf %27, %28 : vector<28x24x4xf32>
      %30 = vector.extract_strided_slice %29 {offsets = [0, 0, 0], sizes = [24, 24, 4], strides = [1, 1, 1]} : vector<28x24x4xf32> to vector<24x24x4xf32>
      %31 = vector.extract_strided_slice %29 {offsets = [1, 0, 0], sizes = [24, 24, 4], strides = [1, 1, 1]} : vector<28x24x4xf32> to vector<24x24x4xf32>
      %32 = arith.maximumf %30, %31 : vector<24x24x4xf32>
      %33 = vector.extract_strided_slice %29 {offsets = [2, 0, 0], sizes = [24, 24, 4], strides = [1, 1, 1]} : vector<28x24x4xf32> to vector<24x24x4xf32>
      %34 = arith.maximumf %32, %33 : vector<24x24x4xf32>
      %35 = vector.extract_strided_slice %29 {offsets = [3, 0, 0], sizes = [24, 24, 4], strides = [1, 1, 1]} : vector<28x24x4xf32> to vector<24x24x4xf32>
      %36 = arith.maximumf %34, %35 : vector<24x24x4xf32>
      %37 = vector.extract_strided_slice %29 {offsets = [4, 0, 0], sizes = [24, 24, 4], strides = [1, 1, 1]} : vector<28x24x4xf32> to vector<24x24x4xf32>
      %38 = arith.maximumf %36, %37 : vector<24x24x4xf32>
      %c0_32 = arith.constant 0 : index
      %c0_33 = arith.constant 0 : index
      %c0_34 = arith.constant 0 : index
      %39 = vector.load %arg6[%c0_32, %c0_33, %c0_34] : memref<24x24x4xf32, #tpu.memory_space<vmem>>, vector<24x24x4xf32>
      tpu.vector_store %arg6[%c0_32, %c0_33, %c0_34], %38 {strides = array<i32>} : memref<24x24x4xf32, #tpu.memory_space<vmem>>, vector<24x24x4xf32>,
      %c0_35 = arith.constant 0 : index
      %c0_36 = arith.constant 0 : index
      %c0_37 = arith.constant 0 : index
      %40 = vector.load %arg6[%c0_35, %c0_36, %c0_37] : memref<24x24x4xf32, #tpu.memory_space<vmem>>, vector<24x16x4xf32>
      %c0_38 = arith.constant 0 : index
      %c4_39 = arith.constant 4 : index
      %c0_40 = arith.constant 0 : index
      %41 = vector.load %arg6[%c0_38, %c4_39, %c0_40] : memref<24x24x4xf32, #tpu.memory_space<vmem>>, vector<24x16x4xf32>
      %42 = arith.maximumf %40, %41 : vector<24x16x4xf32>
      %c0_41 = arith.constant 0 : index
      %c8 = arith.constant 8 : index
      %c0_42 = arith.constant 0 : index
      %43 = vector.load %arg6[%c0_41, %c8, %c0_42] : memref<24x24x4xf32, #tpu.memory_space<vmem>>, vector<24x16x4xf32>
      %44 = arith.maximumf %42, %43 : vector<24x16x4xf32>
      %45 = vector.extract_strided_slice %44 {offsets = [0, 0, 0], sizes = [16, 16, 4], strides = [1, 1, 1]} : vector<24x16x4xf32> to vector<16x16x4xf32>
      %46 = vector.extract_strided_slice %44 {offsets = [4, 0, 0], sizes = [16, 16, 4], strides = [1, 1, 1]} : vector<24x16x4xf32> to vector<16x16x4xf32>
      %47 = arith.maximumf %45, %46 : vector<16x16x4xf32>
      %48 = vector.extract_strided_slice %44 {offsets = [8, 0, 0], sizes = [16, 16, 4], strides = [1, 1, 1]} : vector<24x16x4xf32> to vector<16x16x4xf32>
      %49 = arith.maximumf %47, %48 : vector<16x16x4xf32>
      %c0_43 = arith.constant 0 : index
      %c0_44 = arith.constant 0 : index
      %c0_45 = arith.constant 0 : index
      %c0_46 = arith.constant 0 : index
      %50 = vector.load %arg4[%c0_43, %c0_44, %c0_45, %c0_46] : memref<1x16x16x16xf32, #tpu.memory_space<vmem>>, vector<1x16x16x4xf32>
      %51 = vector.shape_cast %50 : vector<1x16x16x4xf32> to vector<16x16x4xf32>
      %52 = vector.shape_cast %49 : vector<16x16x4xf32> to vector<1x16x16x4xf32>
      tpu.vector_store %arg4[%c0_43, %c0_44, %c0_45, %c0_46], %52 {strides = array<i32>} : memref<1x16x16x16xf32, #tpu.memory_space<vmem>>, vector<1x16x16x4xf32>,
    } else {
    }
    %c1_i32 = arith.constant 1 : i32
    %3 = arith.cmpi eq, %arg2, %c1_i32 : i32
    %4 = arith.extui %3 : i1 to i32
    %c0_i32_1 = arith.constant 0 : i32
    %5 = arith.cmpi ne, %4, %c0_i32_1 : i32
    scf.if %5 {
      %c0 = arith.constant 0 : index
      %c2 = arith.constant 2 : index
      %c0_4 = arith.constant 0 : index
      %12 = vector.load %arg6[%c0, %c2, %c0_4] : memref<24x24x4xf32, #tpu.memory_space<vmem>>, vector<24x16x4xf32>
      %c0_5 = arith.constant 0 : index
      %c6 = arith.constant 6 : index
      %c0_6 = arith.constant 0 : index
      %13 = vector.load %arg6[%c0_5, %c6, %c0_6] : memref<24x24x4xf32, #tpu.memory_space<vmem>>, vector<24x16x4xf32>
      %14 = arith.maximumf %12, %13 : vector<24x16x4xf32>
      %15 = vector.extract_strided_slice %14 {offsets = [2, 0, 0], sizes = [16, 16, 4], strides = [1, 1, 1]} : vector<24x16x4xf32> to vector<16x16x4xf32>
      %16 = vector.extract_strided_slice %14 {offsets = [6, 0, 0], sizes = [16, 16, 4], strides = [1, 1, 1]} : vector<24x16x4xf32> to vector<16x16x4xf32>
      %17 = arith.maximumf %15, %16 : vector<16x16x4xf32>
      %c0_7 = arith.constant 0 : index
      %c0_8 = arith.constant 0 : index
      %c0_9 = arith.constant 0 : index
      %c4 = arith.constant 4 : index
      %18 = vector.load %arg4[%c0_7, %c0_8, %c0_9, %c4] : memref<1x16x16x16xf32, #tpu.memory_space<vmem>>, vector<1x16x16x4xf32>
      %19 = vector.shape_cast %18 : vector<1x16x16x4xf32> to vector<16x16x4xf32>
      %20 = vector.shape_cast %17 : vector<16x16x4xf32> to vector<1x16x16x4xf32>
      tpu.vector_store %arg4[%c0_7, %c0_8, %c0_9, %c4], %20 {strides = array<i32>} : memref<1x16x16x16xf32, #tpu.memory_space<vmem>>, vector<1x16x16x4xf32>,
    } else {
    }
    %c2_i32 = arith.constant 2 : i32
    %6 = arith.cmpi eq, %arg2, %c2_i32 : i32
    %7 = arith.extui %6 : i1 to i32
    %c0_i32_2 = arith.constant 0 : i32
    %8 = arith.cmpi ne, %7, %c0_i32_2 : i32
    scf.if %8 {
      %c4 = arith.constant 4 : index
      %c4_4 = arith.constant 4 : index
      %c0 = arith.constant 0 : index
      %12 = vector.load %arg6[%c4, %c4_4, %c0] : memref<24x24x4xf32, #tpu.memory_space<vmem>>, vector<16x16x4xf32>
      %c0_5 = arith.constant 0 : index
      %c0_6 = arith.constant 0 : index
      %c0_7 = arith.constant 0 : index
      %c8 = arith.constant 8 : index
      %13 = vector.load %arg4[%c0_5, %c0_6, %c0_7, %c8] : memref<1x16x16x16xf32, #tpu.memory_space<vmem>>, vector<1x16x16x4xf32>
      %14 = vector.shape_cast %13 : vector<1x16x16x4xf32> to vector<16x16x4xf32>
      %15 = vector.shape_cast %12 : vector<16x16x4xf32> to vector<1x16x16x4xf32>
      tpu.vector_store %arg4[%c0_5, %c0_6, %c0_7, %c8], %15 {strides = array<i32>} : memref<1x16x16x16xf32, #tpu.memory_space<vmem>>, vector<1x16x16x4xf32>,
    } else {
    }
    %c3_i32 = arith.constant 3 : i32
    %9 = arith.cmpi eq, %arg2, %c3_i32 : i32
    %10 = arith.extui %9 : i1 to i32
    %c0_i32_3 = arith.constant 0 : i32
    %11 = arith.cmpi ne, %10, %c0_i32_3 : i32
    scf.if %11 {
      %c0 = arith.constant 0 : index
      %c0_4 = arith.constant 0 : index
      %c0_5 = arith.constant 0 : index
      %c0_6 = arith.constant 0 : index
      %12 = vector.load %arg3[%c0, %c0_4, %c0_5, %c0_6] : memref<1x16x16x4xf32, #tpu.memory_space<vmem>>, vector<1x16x16x4xf32>
      %13 = vector.shape_cast %12 : vector<1x16x16x4xf32> to vector<16x16x4xf32>
      %c0_7 = arith.constant 0 : index
      %c0_8 = arith.constant 0 : index
      %c0_9 = arith.constant 0 : index
      %c12 = arith.constant 12 : index
      %14 = vector.load %arg4[%c0_7, %c0_8, %c0_9, %c12] : memref<1x16x16x16xf32, #tpu.memory_space<vmem>>, vector<1x16x16x4xf32>
      %15 = vector.shape_cast %14 : vector<1x16x16x4xf32> to vector<16x16x4xf32>
      %16 = vector.shape_cast %13 : vector<16x16x4xf32> to vector<1x16x16x4xf32>
      tpu.vector_store %arg4[%c0_7, %c0_8, %c0_9, %c12], %16 {strides = array<i32>} : memref<1x16x16x16xf32, #tpu.memory_space<vmem>>, vector<1x16x16x4xf32>,
    } else {
    }
    return
  }
  func.func @transform_0(%arg0: i32, %arg1: i32, %arg2: i32) -> (i32, i32, i32, i32) {
    %c0_i32 = arith.constant 0 : i32
    %c0_i32_0 = arith.constant 0 : i32
    %c0_i32_1 = arith.constant 0 : i32
    return %arg0, %c0_i32, %c0_i32_0, %arg1 : i32, i32, i32, i32
  }
  func.func @transform_1(%arg0: i32, %arg1: i32, %arg2: i32) -> (i32, i32, i32, i32) {
    %c0_i32 = arith.constant 0 : i32
    %c0_i32_0 = arith.constant 0 : i32
    %c0_i32_1 = arith.constant 0 : i32
    %c0_i32_2 = arith.constant 0 : i32
    return %arg0, %c0_i32, %c0_i32_0, %c0_i32_1 : i32, i32, i32, i32
  }
}

</mosaic_0001>

<bundles_post_ra>
// kernel: tpu_custom_call.1
= control target key start
LH: loop header
LB: loop body
LE: loop exit
PB: predicated region body
PF: predicated region fallthrough
CT: control target
= control target key end

     0   :  { %6 = vsyncpa [#allocation5], 0  ;;  %s4251_s0 = inlined_call_operand.vmem [shape: f32[2,16,16,4], index: 0, kind: input, shape index: {}]   ;;  %s4252_s1 = inlined_call_operand.hbm [shape: f32[2,16,16,16], index: 1, kind: output, shape index: {}]  }
   0x1   :  { %8 = vsyncpa [#allocation5 + $0x1], 0  ;;  %s2743_s6 = smov 0   ;;  %s2745_s7 = smov 0  }
   0x2   :  { %s2747_s8 = smov 0   ;;  %s2749_s9 = smov 0  }
   0x3   :  { %s2751_s10 = smov 0   ;;  %s2753_s11 = smov 0  }
   0x4   :  { %s2755_s12 = smov 0   ;;  %s2757_s13 = smov 0  }
   0x5 LB: > { %s2534_s14 = sadd.s32 4294967295, %s2724_s13   ;;  %s2535_s15 = sadd.s32 4294967294, %s2724_s13   ;;  %s2724_s13 = sphi %s2757_s13, %s14_s13   ;;  %s2720_s12 = sphi %s2755_s12, %s4261_s12   ;;  %s2716_s11 = sphi %s2753_s11, %s4260_s11   ;;  %s2712_s10 = sphi %s2751_s10, %s4259_s10   ;;  %s2708_s9 = sphi %s2749_s9, %s4258_s9   ;;  %s2704_s8 = sphi %s2747_s8, %s4257_s8   ;;  %s2700_s7 = sphi %s2745_s7, %s4256_s7   ;;  %s2696_s6 = sphi %s2743_s6, %s4255_s6  }
   0x6   : > { %s26_s16 = sadd.s32 1, %s2716_s11  ;;  %s33_s17 = sadd.s32 1, %s2720_s12 }
   0x7   : > { %p27_p0 = scmp.ge.s32.totalorder %s26_s16, 4  ;;  %p78_p1 = scmp.ne.s32.totalorder %s2704_s8, %s2700_s7 }
   0x8   : > { %p79_p2 = scmp.eq.s32.totalorder %s2534_s14, 7  ;;  %p84_p4 = scmp.ne.s32.totalorder %s2700_s7, %s2696_s6 }
   0x9   : > { %s4263_s16 = smov (%p27_p0, %s26_s16), 0  ;;  %s4265_s17 = smov (!%p27_p0, %s33_s17), %s2720_s12 }
   0xa   : > { %p2792_p3 = por %p79_p2, %p78_p1  ;;  %p35_p5 = scmp.ge.s32.totalorder %s4265_s17, 2 }
   0xb   : > { %p85_p6 = scmp.eq.s32.totalorder %s2535_s15, 7  ;;  %p2538_p7 = scmp.ge.s32.totalorder %s2724_s13, 1 }
   0xc   : > { %p114_p8 = scmp.lt.s32.totalorder %s2724_s13, 9  ;;  %s4267_s17 = smov (%p35_p5, %s4265_s17), 0 }
   0xd   : > { %p2802_p9 = por %p85_p6, %p84_p4  ;;  %s65_s20 = ssub.s32 %s2720_s12, %s4267_s17 }
   0xe   : > { %p115_p10 = pnand %p2538_p7, %p114_p8  ;;  %s68_s21 = sadd.s32 1, %s2704_s8 }
   0xf   : > { %p66_p11 = scmp.eq.s32.totalorder %s65_s20, 0  ;;  %s134_s23 = sand.u32 (!%p115_p10), 1, %s2700_s7  }
  0x10   : > { %118 = sbr.rel (%p115_p10) target bundleno = 839 (0x347), region = 24  ;;  %p137_p12 = scmp.lt.s32.totalorder (!%p115_p10), %s2712_s10, 1 }
  0x11   : > { %s2810_s22 = scalar_select %p66_p11, %s2704_s8, %s68_s21  }
  0x12   : > { %s2539_s24 = sshll.u32 (!%p115_p10), %s134_s23, 8  ;;  %p2542_p13 = scmp.ne.s32.totalorder (!%p115_p10), %s2708_s9, 0 }
  0x13   : > { %s2822_s30 = scalar_lea.vmem (!%p115_p10), [#allocation4], %s2539_s24 }
  0x17   : > { %s138_s25 = scalar_select %p137_p12, %s2712_s10, 1 }
  0x18   : > { %148 = sbr.rel (%p2542_p13) target bundleno = 273 (0x111), region = 28  ;;  %vm149_vm0 = vcmask (!%p2542_p13), 31744   ;;  %vm153_vm1 = vcmask (!%p2542_p13), 27648   ;;  %vm201_vm2 = vcmask (!%p2542_p13), 29696   ;;  %v2726_v2 = vmov (!%p2542_p13), -inf  }
  0x19   : > { %s2551_s26 = sshll.u32 %s138_s25, 8  ;;  %150 = vst.msk [vmem:[#allocation2] sm:$0xff] (!%p2542_p13), %vm149_vm0, %v2726_v2  ;;  %151 = vst.msk [vmem:[#allocation2 + $0x8] sm:$0xff] (!%p2542_p13), %vm149_vm0, %v2726_v2 }
  0x1a   : > { %s2820_s29 = scalar_lea.vmem %s4251_s0, %s2551_s26  ;;  %152 = vst.msk [vmem:[#allocation2 + $0x10] sm:$0xff] (!%p2542_p13), %vm149_vm0, %v2726_v2  ;;  %155 = vst.msk [vmem:[#allocation2 + $0x20] sm:$0xff] (!%p2542_p13), %vm149_vm0, %v2726_v2 }
  0x1b   : > { %v2826_v0 = vld [vmem:[%s2820_s29] sm:$0xff] (!%p2542_p13)  ;;  %v2829_v1 = vld [vmem:[%s2820_s29 + $0x8] sm:$0xff] (!%p2542_p13)  ;;  %156 = vst.msk [vmem:[#allocation2 + $0x28] sm:$0xff] (!%p2542_p13), %vm149_vm0, %v2726_v2  ;;  %157 = vst.msk [vmem:[#allocation2 + $0x30] sm:$0xff] (!%p2542_p13), %vm149_vm0, %v2726_v2 }
  0x1c   : > { %159 = vst.msk [vmem:[#allocation2 + $0x40] sm:$0xff] (!%p2542_p13), %vm149_vm0, %v2726_v2  ;;  %160 = vst.msk [vmem:[#allocation2 + $0x48] sm:$0xff] (!%p2542_p13), %vm149_vm0, %v2726_v2  ;;  %v236_v3 = vld [vmem:[%s2820_s29 + $0x10] sm:$0xff] (!%p2542_p13)  ;;  %v237_v4 = vld [vmem:[%s2820_s29 + $0x18] sm:$0xff] (!%p2542_p13) }
  0x1d   : > { %161 = vst.msk [vmem:[#allocation2 + $0x50] sm:$0xff] (!%p2542_p13), %vm149_vm0, %v2726_v2  ;;  %163 = vst.msk [vmem:[#allocation2 + $0x60] sm:$0xff] (!%p2542_p13), %vm149_vm0, %v2726_v2  ;;  %v238_v5 = vld [vmem:[%s2820_s29 + $0x20] sm:$0xff] (!%p2542_p13)  ;;  %v239_v6 = vld [vmem:[%s2820_s29 + $0x28] sm:$0xff] (!%p2542_p13) }
  0x1e   : > { %164 = vst.msk [vmem:[#allocation2 + $0x68] sm:$0xff] (!%p2542_p13), %vm149_vm0, %v2726_v2  ;;  %165 = vst.msk [vmem:[#allocation2 + $0x70] sm:$0xff] (!%p2542_p13), %vm149_vm0, %v2726_v2  ;;  %v240_v7 = vld [vmem:[%s2820_s29 + $0x30] sm:$0xff] (!%p2542_p13)  ;;  %v241_v8 = vld [vmem:[%s2820_s29 + $0x38] sm:$0xff] (!%p2542_p13) }
  0x1f   : > { %167 = vst.msk [vmem:[#allocation2 + $0x80] sm:$0xff] %vm149_vm0, %v2726_v2  ;;  %168 = vst.msk [vmem:[#allocation2 + $0x88] sm:$0xff] %vm149_vm0, %v2726_v2  ;;  %v242_v9 = vld [vmem:[%s2820_s29 + $0x40] sm:$0xff]  ;;  %v243_v10 = vld [vmem:[%s2820_s29 + $0x48] sm:$0xff] }
  0x20   : > { %169 = vst.msk [vmem:[#allocation2 + $0x90] sm:$0xff] %vm149_vm0, %v2726_v2  ;;  %171 = vst.msk [vmem:[#allocation2 + $0xa0] sm:$0xff] %vm149_vm0, %v2726_v2  ;;  %v244_v11 = vld [vmem:[%s2820_s29 + $0x50] sm:$0xff]  ;;  %v245_v12 = vld [vmem:[%s2820_s29 + $0x58] sm:$0xff] }
  0x21   : > { %172 = vst.msk [vmem:[#allocation2 + $0xa8] sm:$0xff] %vm149_vm0, %v2726_v2  ;;  %173 = vst.msk [vmem:[#allocation2 + $0xb0] sm:$0xff] %vm149_vm0, %v2726_v2  ;;  %v246_v13 = vld [vmem:[%s2820_s29 + $0x60] sm:$0xff]  ;;  %v247_v14 = vld [vmem:[%s2820_s29 + $0x68] sm:$0xff] }
  0x22   : > { %176 = vst.msk [vmem:[#allocation2 + $0x2c0] sm:$0xff] %vm149_vm0, %v2726_v2  ;;  %177 = vst.msk [vmem:[#allocation2 + $0x2c8] sm:$0xff] %vm149_vm0, %v2726_v2  ;;  %v248_v15 = vld [vmem:[%s2820_s29 + $0x70] sm:$0xff]  ;;  %v249_v16 = vld [vmem:[%s2820_s29 + $0x78] sm:$0xff] }
  0x23   : > { %178 = vst.msk [vmem:[#allocation2 + $0x2d0] sm:$0xff] %vm149_vm0, %v2726_v2  ;;  %180 = vst.msk [vmem:[#allocation2 + $0x2e0] sm:$0xff] %vm149_vm0, %v2726_v2  ;;  %v250_v17 = vld [vmem:[%s2820_s29 + $0x80] sm:$0xff]  ;;  %v251_v18 = vld [vmem:[%s2820_s29 + $0x88] sm:$0xff] }
  0x24   : > { %181 = vst.msk [vmem:[#allocation2 + $0x2e8] sm:$0xff] %vm149_vm0, %v2726_v2  ;;  %182 = vst.msk [vmem:[#allocation2 + $0x2f0] sm:$0xff] %vm149_vm0, %v2726_v2  ;;  %v252_v19 = vld [vmem:[%s2820_s29 + $0x90] sm:$0xff]  ;;  %v253_v20 = vld [vmem:[%s2820_s29 + $0x98] sm:$0xff] }
  0x25   : > { %184 = vst.msk [vmem:[#allocation2 + $0x300] sm:$0xff] %vm149_vm0, %v2726_v2  ;;  %185 = vst.msk [vmem:[#allocation2 + $0x308] sm:$0xff] %vm149_vm0, %v2726_v2  ;;  %v254_v21 = vld [vmem:[%s2820_s29 + $0xa0] sm:$0xff]  ;;  %v255_v22 = vld [vmem:[%s2820_s29 + $0xa8] sm:$0xff] }
  0x26   : > { %186 = vst.msk [vmem:[#allocation2 + $0x310] sm:$0xff] %vm149_vm0, %v2726_v2  ;;  %188 = vst.msk [vmem:[#allocation2 + $0x320] sm:$0xff] %vm149_vm0, %v2726_v2  ;;  %v256_v23 = vld [vmem:[%s2820_s29 + $0xb0] sm:$0xff]  ;;  %v257_v24 = vld [vmem:[%s2820_s29 + $0xb8] sm:$0xff] }
  0x27   : > { %189 = vst.msk [vmem:[#allocation2 + $0x328] sm:$0xff] %vm149_vm0, %v2726_v2  ;;  %190 = vst.msk [vmem:[#allocation2 + $0x330] sm:$0xff] %vm149_vm0, %v2726_v2  ;;  %v258_v25 = vld [vmem:[%s2820_s29 + $0xc0] sm:$0xff]  ;;  %v259_v26 = vld [vmem:[%s2820_s29 + $0xc8] sm:$0xff] }
  0x28   : > { %192 = vst.msk [vmem:[#allocation2 + $0x340] sm:$0xff] %vm149_vm0, %v2726_v2  ;;  %193 = vst.msk [vmem:[#allocation2 + $0x348] sm:$0xff] %vm149_vm0, %v2726_v2  ;;  %v260_v27 = vld [vmem:[%s2820_s29 + $0xd0] sm:$0xff]  ;;  %v261_v28 = vld [vmem:[%s2820_s29 + $0xd8] sm:$0xff] }
  0x29   : > { %194 = vst.msk [vmem:[#allocation2 + $0x350] sm:$0xff] %vm149_vm0, %v2726_v2  ;;  %196 = vst.msk [vmem:[#allocation2 + $0x360] sm:$0xff] %vm149_vm0, %v2726_v2  ;;  %v262_v29 = vld [vmem:[%s2820_s29 + $0xe0] sm:$0xff]  ;;  %v263_v30 = vld [vmem:[%s2820_s29 + $0xe8] sm:$0xff] }
  0x2a   : > { %197 = vst.msk [vmem:[#allocation2 + $0x368] sm:$0xff] %vm149_vm0, %v2726_v2  ;;  %198 = vst.msk [vmem:[#allocation2 + $0x370] sm:$0xff] %vm149_vm0, %v2726_v2  ;;  %v264_v31 = vld [vmem:[%s2820_s29 + $0xf0] sm:$0xff]  ;;  %v265_v32 = vld [vmem:[%s2820_s29 + $0xf8] sm:$0xff] }
  0x2b   : > { %154 = vst.msk [vmem:[#allocation2 + $0x18] sm:$0xf] %vm153_vm1, %v2726_v2  ;;  %158 = vst.msk [vmem:[#allocation2 + $0x38] sm:$0xf] %vm153_vm1, %v2726_v2  ;;  %v298_v33 = vld [vmem:[#allocation2] sm:$0xff] }
  0x2c   : > { %162 = vst.msk [vmem:[#allocation2 + $0x58] sm:$0xf] %vm153_vm1, %v2726_v2  ;;  %166 = vst.msk [vmem:[#allocation2 + $0x78] sm:$0xf] %vm153_vm1, %v2726_v2  ;;  %v301_v34 = vld [vmem:[#allocation2 + $0x20] sm:$0xff] }
  0x2d   : > { %170 = vst.msk [vmem:[#allocation2 + $0x98] sm:$0xf] %vm153_vm1, %v2726_v2  ;;  %174 = vst.msk [vmem:[#allocation2 + $0xb8] sm:$0xf] %vm153_vm1, %v2726_v2  ;;  %v304_v35 = vld [vmem:[#allocation2 + $0x40] sm:$0xff] }
  0x2e   : > { %179 = vst.msk [vmem:[#allocation2 + $0x2d8] sm:$0xf] %vm153_vm1, %v2726_v2  ;;  %183 = vst.msk [vmem:[#allocation2 + $0x2f8] sm:$0xf] %vm153_vm1, %v2726_v2  ;;  %v307_v36 = vld [vmem:[#allocation2 + $0x60] sm:$0xff] }
  0x2f   : > { %187 = vst.msk [vmem:[#allocation2 + $0x318] sm:$0xf] %vm153_vm1, %v2726_v2  ;;  %191 = vst.msk [vmem:[#allocation2 + $0x338] sm:$0xf] %vm153_vm1, %v2726_v2  ;;  %v310_v37 = vld [vmem:[#allocation2 + $0x80] sm:$0xff] }
  0x30   : > { %195 = vst.msk [vmem:[#allocation2 + $0x358] sm:$0xf] %vm153_vm1, %v2726_v2  ;;  %199 = vst.msk [vmem:[#allocation2 + $0x378] sm:$0xf] %vm153_vm1, %v2726_v2  ;;  %v382_v38 = vld [vmem:[#allocation2 + $0x1] sm:$0xff] }
  0x31   : > { %202 = vst.msk [vmem:[#allocation2 + $0xc0] sm:$0x3f] %vm201_vm2, %v2726_v2  ;;  %203 = vst.msk [vmem:[#allocation2 + $0xe0] sm:$0x3f] %vm201_vm2, %v2726_v2  ;;  %v385_v39 = vld [vmem:[#allocation2 + $0x21] sm:$0xff]  ;;  %v466_v42 = vmax.f32 %v298_v33, %v382_v38  ;;  %v560_v33 = vld [vmem:[#allocation2 + $0x6a] sm:$0xff] }
  0x32   : > { %204 = vst.msk [vmem:[#allocation2 + $0x100] sm:$0x3f] %vm201_vm2, %v2726_v2  ;;  %205 = vst.msk [vmem:[#allocation2 + $0x120] sm:$0x3f] %vm201_vm2, %v2726_v2  ;;  %v388_v40 = vld [vmem:[#allocation2 + $0x41] sm:$0xff]  ;;  %v469_v44 = vmax.f32 %v301_v34, %v385_v39  ;;  %v563_v34 = vld [vmem:[#allocation2 + $0x8a] sm:$0xff] }
  0x33   : > { %206 = vst.msk [vmem:[#allocation2 + $0x140] sm:$0x3f] %vm201_vm2, %v2726_v2  ;;  %207 = vst.msk [vmem:[#allocation2 + $0x160] sm:$0x3f] %vm201_vm2, %v2726_v2  ;;  %v391_v41 = vld [vmem:[#allocation2 + $0x61] sm:$0xff]  ;;  %v472_v45 = vmax.f32 %v304_v35, %v388_v40 }
  0x34   : > { %208 = vst.msk [vmem:[#allocation2 + $0x180] sm:$0x3f] %vm201_vm2, %v2726_v2  ;;  %209 = vst.msk [vmem:[#allocation2 + $0x1a0] sm:$0x3f] %vm201_vm2, %v2726_v2  ;;  %v394_v43 = vld [vmem:[#allocation2 + $0x81] sm:$0xff]  ;;  %v475_v46 = vmax.f32 %v307_v36, %v391_v41  ;;  %v719_v41 = vld [vmem:[#allocation2 + $0xb] sm:$0xff] }
  0x35   : > { %210 = vst.msk [vmem:[#allocation2 + $0x1c0] sm:$0x3f] %vm201_vm2, %v2726_v2  ;;  %211 = vst.msk [vmem:[#allocation2 + $0x1e0] sm:$0x3f] %vm201_vm2, %v2726_v2  ;;  %v550_v47 = vld [vmem:[#allocation2 + $0x2] sm:$0xff]  ;;  %v478_v48 = vmax.f32 %v310_v37, %v394_v43  ;;  %v725_v43 = vld [vmem:[#allocation2 + $0x4b] sm:$0xff] }
  0x36   : > { %212 = vst.msk [vmem:[#allocation2 + $0x200] sm:$0x3f] %vm201_vm2, %v2726_v2  ;;  %213 = vst.msk [vmem:[#allocation2 + $0x220] sm:$0x3f] %vm201_vm2, %v2726_v2  ;;  %v553_v49 = vld [vmem:[#allocation2 + $0x22] sm:$0xff]  ;;  %v634_v52 = vmax.f32 %v466_v42, %v550_v47  ;;  %v722_v42 = vld [vmem:[#allocation2 + $0x2b] sm:$0xff] }
  0x37   : > { %214 = vst.msk [vmem:[#allocation2 + $0x240] sm:$0x3f] %vm201_vm2, %v2726_v2  ;;  %215 = vst.msk [vmem:[#allocation2 + $0x260] sm:$0x3f] %vm201_vm2, %v2726_v2  ;;  %v556_v50 = vld [vmem:[#allocation2 + $0x42] sm:$0xff]  ;;  %v637_v54 = vmax.f32 %v469_v44, %v553_v49  ;;  %v887_v49 = vld [vmem:[#allocation2 + $0xc] sm:$0xff] }
  0x38   : > { %216 = vst.msk [vmem:[#allocation2 + $0x280] sm:$0x3f] %vm201_vm2, %v2726_v2  ;;  %217 = vst.msk [vmem:[#allocation2 + $0x2a0] sm:$0x3f] %vm201_vm2, %v2726_v2  ;;  %v559_v51 = vld [vmem:[#allocation2 + $0x62] sm:$0xff]  ;;  %v640_v55 = vmax.f32 %v472_v45, %v556_v50  ;;  %v728_v45 = vld [vmem:[#allocation2 + $0x6b] sm:$0xff] }
  0x39   : > { %218 = vst.msk [vmem:[#allocation2 + $0xd6] sm:$0x3f] %vm201_vm2, %v2726_v2  ;;  %219 = vst.msk [vmem:[#allocation2 + $0xf6] sm:$0x3f] %vm201_vm2, %v2726_v2  ;;  %v562_v53 = vld [vmem:[#allocation2 + $0x82] sm:$0xff]  ;;  %v643_v56 = vmax.f32 %v475_v46, %v559_v51  ;;  %v731_v50 = vld [vmem:[#allocation2 + $0x8b] sm:$0xff] }
  0x3a   : > { %220 = vst.msk [vmem:[#allocation2 + $0x116] sm:$0x3f] %vm201_vm2, %v2726_v2  ;;  %221 = vst.msk [vmem:[#allocation2 + $0x136] sm:$0x3f] %vm201_vm2, %v2726_v2  ;;  %v718_v57 = vld [vmem:[#allocation2 + $0x3] sm:$0xff]  ;;  %v646_v58 = vmax.f32 %v478_v48, %v562_v53  ;;  %v893_v53 = vld [vmem:[#allocation2 + $0x4c] sm:$0xff] }
  0x3b   : > { %222 = vst.msk [vmem:[#allocation2 + $0x156] sm:$0x3f] %vm201_vm2, %v2726_v2  ;;  %223 = vst.msk [vmem:[#allocation2 + $0x176] sm:$0x3f] %vm201_vm2, %v2726_v2  ;;  %v721_v59 = vld [vmem:[#allocation2 + $0x23] sm:$0xff]  ;;  %v802_v62 = vmax.f32 %v634_v52, %v718_v57  ;;  %v890_v52 = vld [vmem:[#allocation2 + $0x2c] sm:$0xff] }
  0x3c   : > { %224 = vst.msk [vmem:[#allocation2 + $0x196] sm:$0x3f] %vm201_vm2, %v2726_v2  ;;  %225 = vst.msk [vmem:[#allocation2 + $0x1b6] sm:$0x3f] %vm201_vm2, %v2726_v2  ;;  %v724_v60 = vld [vmem:[#allocation2 + $0x43] sm:$0xff] }
  0x3d   : > { %226 = vst.msk [vmem:[#allocation2 + $0x1d6] sm:$0x3f] %vm201_vm2, %v2726_v2  ;;  %227 = vst.msk [vmem:[#allocation2 + $0x1f6] sm:$0x3f] %vm201_vm2, %v2726_v2  ;;  %v727_v61 = vld [vmem:[#allocation2 + $0x63] sm:$0xff] }
  0x3e   : > { %228 = vst.msk [vmem:[#allocation2 + $0x216] sm:$0x3f] %vm201_vm2, %v2726_v2  ;;  %229 = vst.msk [vmem:[#allocation2 + $0x236] sm:$0x3f] %vm201_vm2, %v2726_v2  ;;  %v730_v63 = vld [vmem:[#allocation2 + $0x83] sm:$0xff] }
  0x3f   : > { %230 = vst.msk [vmem:[#allocation2 + $0x256] sm:$0x3f] %vm201_vm2, %v2726_v2  ;;  %231 = vst.msk [vmem:[#allocation2 + $0x276] sm:$0x3f] %vm201_vm2, %v2726_v2 }
  0x40   : > { %232 = vst.msk [vmem:[#allocation2 + $0x296] sm:$0x3f] %vm201_vm2, %v2726_v2  ;;  %233 = vst.msk [vmem:[#allocation2 + $0x2b6] sm:$0x3f] %vm201_vm2, %v2726_v2  ;;  %v886_v2 = vld [vmem:[#allocation2 + $0x4] sm:$0xff] }
  0x41   : > { %266 = vst.msk [vmem:[#allocation2 + $0xc6] sm:$0xff] %vm149_vm0, %v2826_v0  ;;  %267 = vst.msk [vmem:[#allocation2 + $0xce] sm:$0xff] %vm149_vm0, %v2829_v1  ;;  %v805_v0 = vmax.f32 %v637_v54, %v721_v59  ;;  %v808_v1 = vmax.f32 %v640_v55, %v724_v60  ;;  %v300_v54 = vld [vmem:[#allocation2 + $0x10] sm:$0xff] }
  0x42   : > { %268 = vst.msk [vmem:[#allocation2 + $0xe6] sm:$0xff] %vm149_vm0, %v236_v3  ;;  %269 = vst.msk [vmem:[#allocation2 + $0xee] sm:$0xff] %vm149_vm0, %v237_v4  ;;  %v889_v3 = vld [vmem:[#allocation2 + $0x24] sm:$0xff]  ;;  %v811_v4 = vmax.f32 %v643_v56, %v727_v61  ;;  %v896_v56 = vld [vmem:[#allocation2 + $0x6c] sm:$0xff] }
  0x43   : > { %270 = vst.msk [vmem:[#allocation2 + $0x106] sm:$0xff] %vm149_vm0, %v238_v5  ;;  %271 = vst.msk [vmem:[#allocation2 + $0x10e] sm:$0xff] %vm149_vm0, %v239_v6  ;;  %v892_v5 = vld [vmem:[#allocation2 + $0x44] sm:$0xff]  ;;  %v970_v6 = vmax.f32 %v802_v62, %v886_v2  ;;  %v303_v60 = vld [vmem:[#allocation2 + $0x30] sm:$0xff] }
  0x44   : > { %272 = vst.msk [vmem:[#allocation2 + $0x126] sm:$0xff] %vm149_vm0, %v240_v7  ;;  %273 = vst.msk [vmem:[#allocation2 + $0x12e] sm:$0xff] %vm149_vm0, %v241_v8  ;;  %v299_v7 = vld [vmem:[#allocation2 + $0x8] sm:$0xff]  ;;  %v306_v61 = vld [vmem:[#allocation2 + $0x50] sm:$0xff] }
  0x45   : > { %274 = vst.msk [vmem:[#allocation2 + $0x146] sm:$0xff] %vm149_vm0, %v242_v9  ;;  %275 = vst.msk [vmem:[#allocation2 + $0x14e] sm:$0xff] %vm149_vm0, %v243_v10  ;;  %v302_v8 = vld [vmem:[#allocation2 + $0x28] sm:$0xff]  ;;  %v3055_v9 = vmax.f32 %v805_v0, %v889_v3  ;;  %v309_v62 = vld [vmem:[#allocation2 + $0x70] sm:$0xff] }
  0x46   : > { %276 = vst.msk [vmem:[#allocation2 + $0x166] sm:$0xff] %vm149_vm0, %v244_v11  ;;  %277 = vst.msk [vmem:[#allocation2 + $0x16e] sm:$0xff] %vm149_vm0, %v245_v12  ;;  %v305_v10 = vld [vmem:[#allocation2 + $0x48] sm:$0xff]  ;;  %v384_v0 = vld [vmem:[#allocation2 + $0x11] sm:$0xff] }
  0x47   : > { %278 = vst.msk [vmem:[#allocation2 + $0x186] sm:$0xff] %vm149_vm0, %v246_v13  ;;  %279 = vst.msk [vmem:[#allocation2 + $0x18e] sm:$0xff] %vm149_vm0, %v247_v14  ;;  %v308_v11 = vld [vmem:[#allocation2 + $0x68] sm:$0xff]  ;;  %v814_v13 = vmax.f32 %v646_v58, %v730_v63  ;;  %v3057_v14 = vmax.f32 %v808_v1, %v892_v5  ;;  %v312_v63 = vld [vmem:[#allocation2 + $0x90] sm:$0xff] }
  0x48   : > { %280 = vst.msk [vmem:[#allocation2 + $0x1a6] sm:$0xff] %vm149_vm0, %v248_v15  ;;  %281 = vst.msk [vmem:[#allocation2 + $0x1ae] sm:$0xff] %vm149_vm0, %v249_v16  ;;  %v311_v12 = vld [vmem:[#allocation2 + $0x88] sm:$0xff]  ;;  %v387_v1 = vld [vmem:[#allocation2 + $0x31] sm:$0xff] }
  0x49   : > { %282 = vst.msk [vmem:[#allocation2 + $0x1c6] sm:$0xff] %vm149_vm0, %v250_v17  ;;  %283 = vst.msk [vmem:[#allocation2 + $0x1ce] sm:$0xff] %vm149_vm0, %v251_v18  ;;  %v383_v15 = vld [vmem:[#allocation2 + $0x9] sm:$0xff]  ;;  %v1057_v2 = vmax.f32 %v3055_v9, %v3057_v14 }
  0x4a   : > { %284 = vst.msk [vmem:[#allocation2 + $0x1e6] sm:$0xff] %vm149_vm0, %v252_v19  ;;  %285 = vst.msk [vmem:[#allocation2 + $0x1ee] sm:$0xff] %vm149_vm0, %v253_v20  ;;  %v386_v16 = vld [vmem:[#allocation2 + $0x29] sm:$0xff]  ;;  %v1054_v19 = vmax.f32 %v970_v6, %v3055_v9  ;;  %v390_v6 = vld [vmem:[#allocation2 + $0x51] sm:$0xff] }
  0x4b   : > { %286 = vst.msk [vmem:[#allocation2 + $0x206] sm:$0xff] %vm149_vm0, %v254_v21  ;;  %287 = vst.msk [vmem:[#allocation2 + $0x20e] sm:$0xff] %vm149_vm0, %v255_v22  ;;  %v389_v17 = vld [vmem:[#allocation2 + $0x49] sm:$0xff]  ;;  %v467_v22 = vmax.f32 %v299_v7, %v383_v15  ;;  %v393_v7 = vld [vmem:[#allocation2 + $0x71] sm:$0xff] }
  0x4c   : > { %288 = vst.msk [vmem:[#allocation2 + $0x226] sm:$0xff] %vm149_vm0, %v256_v23  ;;  %289 = vst.msk [vmem:[#allocation2 + $0x22e] sm:$0xff] %vm149_vm0, %v257_v24  ;;  %v895_v18 = vld [vmem:[#allocation2 + $0x64] sm:$0xff]  ;;  %v470_v23 = vmax.f32 %v302_v8, %v386_v16  ;;  %v473_v24 = vmax.f32 %v305_v10, %v389_v17  ;;  %v396_v8 = vld [vmem:[#allocation2 + $0x91] sm:$0xff]  ;;  %v468_v10 = vmax.f32 %v300_v54, %v384_v0 }
  0x4d   : > { %290 = vst.msk [vmem:[#allocation2 + $0x246] sm:$0xff] %vm149_vm0, %v258_v25  ;;  %291 = vst.msk [vmem:[#allocation2 + $0x24e] sm:$0xff] %vm149_vm0, %v259_v26  ;;  %v392_v20 = vld [vmem:[#allocation2 + $0x69] sm:$0xff]  ;;  %v3060_v25 = vmax.f32 %v811_v4, %v895_v18  ;;  %v477_v15 = vmax.f32 %v309_v62, %v393_v7  ;;  %v480_v16 = vmax.f32 %v312_v63, %v396_v8  ;;  %v552_v17 = vld [vmem:[#allocation2 + $0x12] sm:$0xff] }
  0x4e   : > { %292 = vst.msk [vmem:[#allocation2 + $0x266] sm:$0xff] %vm149_vm0, %v260_v27  ;;  %293 = vst.msk [vmem:[#allocation2 + $0x26e] sm:$0xff] %vm149_vm0, %v261_v28  ;;  %v395_v21 = vld [vmem:[#allocation2 + $0x89] sm:$0xff]  ;;  %v476_v26 = vmax.f32 %v308_v11, %v392_v20  ;;  %v471_v11 = vmax.f32 %v303_v60, %v387_v1  ;;  %v555_v18 = vld [vmem:[#allocation2 + $0x32] sm:$0xff] }
  0x4f   : > { %294 = vst.msk [vmem:[#allocation2 + $0x286] sm:$0xff] %vm149_vm0, %v262_v29  ;;  %295 = vst.msk [vmem:[#allocation2 + $0x28e] sm:$0xff] %vm149_vm0, %v263_v30  ;;  %v479_v27 = vmax.f32 %v311_v12, %v395_v21  ;;  %v551_v28 = vld [vmem:[#allocation2 + $0xa] sm:$0xff]  ;;  %v1060_v3 = vmax.f32 %v3057_v14, %v3060_v25  ;;  %v564_v20 = vld [vmem:[#allocation2 + $0x92] sm:$0xff]  ;;  %v636_v21 = vmax.f32 %v468_v10, %v552_v17 }
  0x50   : > { %296 = vst.msk [vmem:[#allocation2 + $0x2a6] sm:$0xff] %vm149_vm0, %v264_v31  ;;  %297 = vst.msk [vmem:[#allocation2 + $0x2ae] sm:$0xff] %vm149_vm0, %v265_v32  ;;  %v554_v29 = vld [vmem:[#allocation2 + $0x2a] sm:$0xff]  ;;  %v1126_v32 = vmax.f32 %v1054_v19, %v3057_v14  ;;  %v635_v35 = vmax.f32 %v467_v22, %v551_v28  ;;  %v644_v39 = vmax.f32 %v476_v26, %v560_v33  ;;  %v558_v19 = vld [vmem:[#allocation2 + $0x52] sm:$0xff] }
  0x51   : > { %v557_v30 = vld [vmem:[#allocation2 + $0x4a] sm:$0xff]  ;;  %v638_v36 = vmax.f32 %v470_v23, %v554_v29  ;;  %v647_v40 = vmax.f32 %v479_v27, %v563_v34  ;;  %v561_v14 = vld [vmem:[#allocation2 + $0x72] sm:$0xff]  ;;  %v639_v22 = vmax.f32 %v471_v11, %v555_v18  ;;  %v648_v28 = vmax.f32 %v480_v16, %v564_v20  ;;  %v565_v62 = vld [vmem:[#allocation2 + $0xa2] sm:$0xff] }
  0x52   : > { %v898_v31 = vld [vmem:[#allocation2 + $0x84] sm:$0xff]  ;;  %v641_v37 = vmax.f32 %v473_v24, %v557_v30  ;;  %v1198_v44 = vmax.f32 %v1126_v32, %v3060_v25  ;;  %v803_v46 = vmax.f32 %v635_v35, %v719_v41  ;;  %v812_v51 = vmax.f32 %v644_v39, %v728_v45  ;;  %v899_v24 = vld [vmem:[#allocation2 + $0x8c] sm:$0xff]  ;;  %v894_v45 = vld [vmem:[#allocation2 + $0x54] sm:$0xff] }
  0x53   : > { %v3063_v38 = vmax.f32 %v814_v13, %v898_v31  ;;  %v806_v47 = vmax.f32 %v638_v36, %v722_v42  ;;  %v815_v4 = vmax.f32 %v647_v40, %v731_v50  ;;  %v474_v13 = vmax.f32 %v306_v61, %v390_v6  ;;  %v720_v29 = vld [vmem:[#allocation2 + $0x13] sm:$0xff]  ;;  %v398_v0 = vld [vmem:[#allocation2 + $0xa9] sm:$0xff] }
  0x54   : > { %v809_v48 = vmax.f32 %v641_v37, %v725_v43  ;;  %v971_v57 = vmax.f32 %v803_v46, %v887_v49  ;;  %v3074_v12 = vmax.f32 %v812_v51, %v896_v56  ;;  %v645_v27 = vmax.f32 %v477_v15, %v561_v14  ;;  %v723_v30 = vld [vmem:[#allocation2 + $0x33] sm:$0xff]  ;;  %v313_v51 = vld [vmem:[#allocation2 + $0xa0] sm:$0xff]  ;;  %v566_v11 = vld [vmem:[#allocation2 + $0xaa] sm:$0xff] }
  0x55   : > { %v1270_v55 = vmax.f32 %v1198_v44, %v3063_v38  ;;  %v974_v58 = vmax.f32 %v806_v47, %v890_v52  ;;  %v642_v26 = vmax.f32 %v474_v13, %v558_v19  ;;  %v3079_v31 = vmax.f32 %v1057_v2, %v3060_v25  ;;  %v726_v34 = vld [vmem:[#allocation2 + $0x53] sm:$0xff]  ;;  %v397_v52 = vld [vmem:[#allocation2 + $0xa1] sm:$0xff] }
  0x56   : > { %v3067_v59 = vmax.f32 %v809_v48, %v893_v53  ;;  %v3081_v32 = vmax.f32 %v815_v4, %v899_v24  ;;  %v729_v35 = vld [vmem:[#allocation2 + $0x73] sm:$0xff]  ;;  %v804_v37 = vmax.f32 %v636_v21, %v720_v29  ;;  %v807_v39 = vmax.f32 %v639_v22, %v723_v30  ;;  %v733_v10 = vld [vmem:[#allocation2 + $0xa3] sm:$0xff] }
  0x57   : > { %1342 = vst.msk [vmem:[#allocation3] sm:$0xff] %vm149_vm0, %v1270_v55  ;;  %v1055_v5 = vmax.f32 %v971_v57, %v974_v58  ;;  %v732_v36 = vld [vmem:[#allocation2 + $0x93] sm:$0xff]  ;;  %v810_v40 = vmax.f32 %v642_v26, %v726_v34  ;;  %v813_v41 = vmax.f32 %v645_v27, %v729_v35  ;;  %v481_v57 = vmax.f32 %v313_v51, %v397_v52  ;;  %v316_v19 = vld [vmem:[#allocation2 + $0xc0] sm:$0xff]  ;;  %v317_v27 = vld [vmem:[#allocation2 + $0xc8] sm:$0xff] }
  0x58   : > { %v1058_v23 = vmax.f32 %v974_v58, %v3067_v59  ;;  %v816_v42 = vmax.f32 %v648_v28, %v732_v36  ;;  %v888_v43 = vld [vmem:[#allocation2 + $0x14] sm:$0xff]  ;;  %v1061_v46 = vmax.f32 %v3067_v59, %v3074_v12  ;;  %v314_v58 = vld [vmem:[#allocation2 + $0xa8] sm:$0xff]  ;;  %v3093_v60 = vmax.f32 %v1060_v3, %v3063_v38 }
  0x59   : > { %v1127_v9 = vmax.f32 %v1055_v5, %v3067_v59  ;;  %v891_v44 = vld [vmem:[#allocation2 + $0x34] sm:$0xff]  ;;  %v972_v49 = vmax.f32 %v804_v37, %v888_v43  ;;  %v978_v55 = vmax.f32 %v810_v40, %v894_v45  ;;  %v1201_v63 = vmax.f32 %v3079_v31, %v3063_v38  ;;  %v400_v14 = vld [vmem:[#allocation2 + $0xc1] sm:$0xff]  ;;  %v401_v35 = vld [vmem:[#allocation2 + $0xc9] sm:$0xff] }
  0x5a   : > { %v897_v48 = vld [vmem:[#allocation2 + $0x74] sm:$0xff]  ;;  %v975_v50 = vmax.f32 %v807_v39, %v891_v44  ;;  %v3088_v53 = vmax.f32 %v1058_v23, %v3074_v12  ;;  %v1063_v1 = vmax.f32 %v3060_v25, %v3063_v38  ;;  %v649_v2 = vmax.f32 %v481_v57, %v565_v62  ;;  %v901_v22 = vld [vmem:[#allocation2 + $0xa4] sm:$0xff]  ;;  %v902_v37 = vld [vmem:[#allocation2 + $0xac] sm:$0xff] }
  0x5b   : > { %v1199_v33 = vmax.f32 %v1127_v9, %v3074_v12  ;;  %v900_v54 = vld [vmem:[#allocation2 + $0x94] sm:$0xff]  ;;  %v3090_v56 = vmax.f32 %v813_v41, %v897_v48  ;;  %v482_v4 = vmax.f32 %v314_v58, %v398_v0  ;;  %v3106_v16 = vmax.f32 %v1061_v46, %v3081_v32  ;;  %v734_v23 = vld [vmem:[#allocation2 + $0xab] sm:$0xff]  ;;  %v568_v34 = vld [vmem:[#allocation2 + $0xc2] sm:$0xff] }
  0x5c   : > { %v3096_v59 = vmax.f32 %v816_v42, %v900_v54  ;;  %v1056_v61 = vmax.f32 %v972_v49, %v975_v50  ;;  %v315_v5 = vld [vmem:[#allocation2 + $0xb0] sm:$0xff]  ;;  %v1059_v7 = vmax.f32 %v975_v50, %v978_v55  ;;  %v1202_v13 = vmax.f32 %v3088_v53, %v3081_v32  ;;  %v403_v57 = vld [vmem:[#allocation2 + $0xe1] sm:$0xff] }
  0x5d   : > { %v1271_v47 = vmax.f32 %v1199_v33, %v3081_v32  ;;  %v399_v6 = vld [vmem:[#allocation2 + $0xb1] sm:$0xff]  ;;  %v1062_v3 = vmax.f32 %v978_v55, %v3090_v56  ;;  %v817_v17 = vmax.f32 %v649_v2, %v733_v10  ;;  %v650_v18 = vmax.f32 %v482_v4, %v566_v11  ;;  %v904_v62 = vld [vmem:[#allocation2 + $0xc4] sm:$0xff] }
  0x5e   : > { %v1128_v8 = vmax.f32 %v1056_v61, %v978_v55  ;;  %v483_v15 = vmax.f32 %v315_v5, %v399_v6  ;;  %v567_v25 = vld [vmem:[#allocation2 + $0xb2] sm:$0xff]  ;;  %v1131_v9 = vmax.f32 %v1059_v7, %v3090_v56  ;;  %v1064_v20 = vmax.f32 %v3074_v12, %v3081_v32  ;;  %v569_v49 = vld [vmem:[#allocation2 + $0xca] sm:$0xff]  ;;  %v319_v55 = vld [vmem:[#allocation2 + $0xe0] sm:$0xff] }
  0x5f   : > { %1343 = vst.msk [vmem:[#allocation3 + $0x8] sm:$0xff] %vm149_vm0, %v1271_v47  ;;  %v484_v26 = vmax.f32 %v316_v19, %v400_v14  ;;  %v1065_v28 = vmax.f32 %v3090_v56, %v3096_v59  ;;  %v3114_v29 = vmax.f32 %v817_v17, %v901_v22  ;;  %v818_v30 = vmax.f32 %v650_v18, %v734_v23  ;;  %v735_v31 = vld [vmem:[#allocation2 + $0xb3] sm:$0xff]  ;;  %v736_v47 = vld [vmem:[#allocation2 + $0xc3] sm:$0xff] }
  0x60   : > { %v1200_v21 = vmax.f32 %v1128_v8, %v3090_v56  ;;  %v651_v24 = vmax.f32 %v483_v15, %v567_v25  ;;  %v1203_v33 = vmax.f32 %v1131_v9, %v3096_v59  ;;  %v3118_v12 = vmax.f32 %v1062_v3, %v3096_v59  ;;  %v318_v42 = vld [vmem:[#allocation2 + $0xd0] sm:$0xff]  ;;  %v320_v4 = vld [vmem:[#allocation2 + $0xe8] sm:$0xff] }
  0x61   : > { %v652_v40 = vmax.f32 %v484_v26, %v568_v34  ;;  %v485_v41 = vmax.f32 %v317_v27, %v401_v35  ;;  %v402_v43 = vld [vmem:[#allocation2 + $0xd1] sm:$0xff]  ;;  %v1273_v44 = vmax.f32 %v1201_v63, %v3114_v29  ;;  %v3122_v45 = vmax.f32 %v818_v30, %v902_v37  ;;  %v571_v8 = vld [vmem:[#allocation2 + $0xe2] sm:$0xff] }
  0x62   : > { %v1272_v36 = vmax.f32 %v1200_v21, %v3096_v59  ;;  %v819_v39 = vmax.f32 %v651_v24, %v735_v31  ;;  %v903_v46 = vld [vmem:[#allocation2 + $0xb4] sm:$0xff]  ;;  %v1204_v48 = vmax.f32 %v3093_v60, %v3114_v29  ;;  %v486_v50 = vmax.f32 %v318_v42, %v402_v43  ;;  %v737_v60 = vld [vmem:[#allocation2 + $0xcb] sm:$0xff]  ;;  %v739_v21 = vld [vmem:[#allocation2 + $0xe3] sm:$0xff] }
  0x63   : > { %v820_v52 = vmax.f32 %v652_v40, %v736_v47  ;;  %v653_v53 = vmax.f32 %v485_v41, %v569_v49  ;;  %v570_v54 = vld [vmem:[#allocation2 + $0xd2] sm:$0xff]  ;;  %v3130_v58 = vmax.f32 %v1063_v1, %v3114_v29  ;;  %1345 = vst.msk [vmem:[#allocation3 + $0x18] sm:$0xff] %vm149_vm0, %v1273_v44  ;;  %v1274_v61 = vmax.f32 %v1202_v13, %v3122_v45  ;;  %v404_v10 = vld [vmem:[#allocation2 + $0xe9] sm:$0xff]  ;;  %v406_v34 = vld [vmem:[#allocation2 + $0x101] sm:$0xff] }
  0x64   : > { %1344 = vst.msk [vmem:[#allocation3 + $0x10] sm:$0xff] %vm149_vm0, %v1272_v36  ;;  %v3127_v51 = vmax.f32 %v819_v39, %v903_v46  ;;  %v1205_v63 = vmax.f32 %v3106_v16, %v3122_v45  ;;  %v654_v0 = vmax.f32 %v486_v50, %v570_v54  ;;  %v487_v2 = vmax.f32 %v319_v55, %v403_v57  ;;  %v738_v3 = vld [vmem:[#allocation2 + $0xd3] sm:$0xff]  ;;  %v572_v23 = vld [vmem:[#allocation2 + $0xea] sm:$0xff]  ;;  %v574_v46 = vld [vmem:[#allocation2 + $0x102] sm:$0xff] }
  0x65   : > { %v3137_v6 = vmax.f32 %v820_v52, %v904_v62  ;;  %v821_v7 = vmax.f32 %v653_v53, %v737_v60  ;;  %1346 = vst.msk [vmem:[#allocation3 + $0x20] sm:$0xff] %vm149_vm0, %v1274_v61  ;;  %v905_v11 = vld [vmem:[#allocation2 + $0xcc] sm:$0xff]  ;;  %v488_v16 = vmax.f32 %v320_v4, %v404_v10  ;;  %v1136_v17 = vmax.f32 %v1064_v20, %v3122_v45  ;;  %v906_v14 = vld [vmem:[#allocation2 + $0xd4] sm:$0xff]  ;;  %v742_v62 = vld [vmem:[#allocation2 + $0x103] sm:$0xff] }
  0x66   : > { %v1275_v5 = vmax.f32 %v1203_v33, %v3127_v51  ;;  %v1206_v1 = vmax.f32 %v3118_v12, %v3127_v51  ;;  %v822_v13 = vmax.f32 %v654_v0, %v738_v3  ;;  %v655_v15 = vmax.f32 %v487_v2, %v571_v8  ;;  %v321_v18 = vld [vmem:[#allocation2 + $0xf0] sm:$0xff]  ;;  %v322_v33 = vld [vmem:[#allocation2 + $0x100] sm:$0xff]  ;;  %v323_v41 = vld [vmem:[#allocation2 + $0x108] sm:$0xff] }
  0x67   : > { %v405_v25 = vld [vmem:[#allocation2 + $0xf1] sm:$0xff]  ;;  %v1276_v9 = vmax.f32 %v1204_v48, %v3137_v6  ;;  %v3145_v19 = vmax.f32 %v821_v7, %v905_v11  ;;  %v1207_v22 = vmax.f32 %v3130_v58, %v3137_v6  ;;  %v656_v30 = vmax.f32 %v488_v16, %v572_v23  ;;  %v907_v12 = vld [vmem:[#allocation2 + $0xe4] sm:$0xff] }
  0x68   : > { %1347 = vst.msk [vmem:[#allocation3 + $0x28] sm:$0xff] %vm149_vm0, %v1275_v5  ;;  %v489_v24 = vmax.f32 %v321_v18, %v405_v25  ;;  %v3149_v26 = vmax.f32 %v822_v13, %v906_v14  ;;  %v823_v27 = vmax.f32 %v655_v15, %v739_v21  ;;  %v573_v20 = vld [vmem:[#allocation2 + $0xf2] sm:$0xff]  ;;  %v1137_v31 = vmax.f32 %v1065_v28, %v3127_v51  ;;  %v407_v47 = vld [vmem:[#allocation2 + $0x109] sm:$0xff]  ;;  %v325_v3 = vld [vmem:[#allocation2 + $0x120] sm:$0xff] }
  0x69   : > { %1348 = vst.msk [vmem:[#allocation3 + $0x30] sm:$0xff] %vm149_vm0, %v1276_v9  ;;  %v1277_v35 = vmax.f32 %v1205_v63, %v3145_v19  ;;  %v740_v36 = vld [vmem:[#allocation2 + $0xeb] sm:$0xff]  ;;  %v1208_v37 = vmax.f32 %v1136_v17, %v3145_v19  ;;  %v490_v40 = vmax.f32 %v322_v33, %v406_v34  ;;  %v741_v56 = vld [vmem:[#allocation2 + $0xf3] sm:$0xff]  ;;  %v1066_v52 = vmax.f32 %v3063_v38, %v3114_v29 }
  0x6a   : > { %v657_v39 = vmax.f32 %v489_v24, %v573_v20  ;;  %v1278_v42 = vmax.f32 %v1206_v1, %v3149_v26  ;;  %v3159_v43 = vmax.f32 %v823_v27, %v907_v12  ;;  %v824_v44 = vmax.f32 %v656_v30, %v740_v36  ;;  %v908_v48 = vld [vmem:[#allocation2 + $0xec] sm:$0xff]  ;;  %v909_v61 = vld [vmem:[#allocation2 + $0xf4] sm:$0xff]  ;;  %v409_v1 = vld [vmem:[#allocation2 + $0x121] sm:$0xff] }
  0x6b   : > { %v1209_v28 = vmax.f32 %v1137_v31, %v3149_v26  ;;  %1349 = vst.msk [vmem:[#allocation3 + $0x38] sm:$0xff] %vm149_vm0, %v1277_v35  ;;  %v658_v50 = vmax.f32 %v490_v40, %v574_v46  ;;  %v491_v53 = vmax.f32 %v323_v41, %v407_v47  ;;  %v324_v54 = vld [vmem:[#allocation2 + $0x110] sm:$0xff]  ;;  %v1067_v63 = vmax.f32 %v3081_v32, %v3122_v45  ;;  %v910_v10 = vld [vmem:[#allocation2 + $0x104] sm:$0xff] }
  0x6c   : > { %v825_v49 = vmax.f32 %v657_v39, %v741_v56  ;;  %v408_v55 = vld [vmem:[#allocation2 + $0x111] sm:$0xff]  ;;  %1350 = vst.msk [vmem:[#allocation3 + $0x40] sm:$0xff] %vm149_vm0, %v1278_v42  ;;  %v1279_v57 = vmax.f32 %v1207_v22, %v3159_v43  ;;  %v3167_v58 = vmax.f32 %v824_v44, %v908_v48  ;;  %v1138_v38 = vmax.f32 %v1066_v52, %v3137_v6  ;;  %v326_v16 = vld [vmem:[#allocation2 + $0x128] sm:$0xff]  ;;  %v328_v44 = vld [vmem:[#allocation2 + $0x140] sm:$0xff] }
  0x6d   : > { %v575_v60 = vld [vmem:[#allocation2 + $0x10a] sm:$0xff]  ;;  %v492_v0 = vmax.f32 %v324_v54, %v408_v55  ;;  %v826_v4 = vmax.f32 %v658_v50, %v742_v62  ;;  %v576_v7 = vld [vmem:[#allocation2 + $0x112] sm:$0xff]  ;;  %v1139_v13 = vmax.f32 %v1067_v63, %v3145_v19  ;;  %v1068_v32 = vmax.f32 %v3096_v59, %v3127_v51  ;;  %v577_v35 = vld [vmem:[#allocation2 + $0x122] sm:$0xff] }
  0x6e   : > { %v3171_v2 = vmax.f32 %v825_v49, %v909_v61  ;;  %v659_v5 = vmax.f32 %v491_v53, %v575_v60  ;;  %1351 = vst.msk [vmem:[#allocation3 + $0x48] sm:$0xff] %vm149_vm0, %v1279_v57  ;;  %v1280_v8 = vmax.f32 %v1208_v37, %v3167_v58  ;;  %v743_v11 = vld [vmem:[#allocation2 + $0x10b] sm:$0xff]  ;;  %v1210_v25 = vmax.f32 %v1138_v38, %v3159_v43  ;;  %v744_v14 = vld [vmem:[#allocation2 + $0x113] sm:$0xff]  ;;  %v412_v56 = vld [vmem:[#allocation2 + $0x141] sm:$0xff] }
  0x6f   : > { %v660_v15 = vmax.f32 %v492_v0, %v576_v7  ;;  %v3180_v18 = vmax.f32 %v826_v4, %v910_v10  ;;  %v410_v21 = vld [vmem:[#allocation2 + $0x129] sm:$0xff]  ;;  %v1211_v23 = vmax.f32 %v1139_v13, %v3167_v58  ;;  %v1140_v27 = vmax.f32 %v1068_v32, %v3149_v26  ;;  %v411_v20 = vld [vmem:[#allocation2 + $0x131] sm:$0xff] }
  0x70   : > { %v1281_v17 = vmax.f32 %v1209_v28, %v3171_v2  ;;  %v827_v9 = vmax.f32 %v659_v5, %v743_v11  ;;  %1352 = vst.msk [vmem:[#allocation3 + $0x50] sm:$0xff] %vm149_vm0, %v1280_v8  ;;  %v911_v22 = vld [vmem:[#allocation2 + $0x10c] sm:$0xff]  ;;  %v493_v30 = vmax.f32 %v325_v3, %v409_v1  ;;  %v912_v34 = vld [vmem:[#allocation2 + $0x114] sm:$0xff]  ;;  %v1069_v12 = vmax.f32 %v3114_v29, %v3137_v6  ;;  %v745_v46 = vld [vmem:[#allocation2 + $0x123] sm:$0xff] }
  0x71   : > { %v828_v24 = vmax.f32 %v660_v15, %v744_v14  ;;  %v327_v59 = vld [vmem:[#allocation2 + $0x130] sm:$0xff]  ;;  %v1282_v31 = vmax.f32 %v1210_v25, %v3180_v18  ;;  %v494_v36 = vmax.f32 %v326_v16, %v410_v21  ;;  %v1212_v39 = vmax.f32 %v1140_v27, %v3171_v2  ;;  %v329_v55 = vld [vmem:[#allocation2 + $0x148] sm:$0xff] }
  0x72   : > { %1353 = vst.msk [vmem:[#allocation3 + $0x58] sm:$0xff] %vm149_vm0, %v1281_v17  ;;  %v3188_v33 = vmax.f32 %v827_v9, %v911_v22  ;;  %v661_v40 = vmax.f32 %v493_v30, %v577_v35  ;;  %v578_v41 = vld [vmem:[#allocation2 + $0x12a] sm:$0xff]  ;;  %v1070_v42 = vmax.f32 %v3122_v45, %v3145_v19  ;;  %v1141_v47 = vmax.f32 %v1069_v12, %v3159_v43  ;;  %v579_v54 = vld [vmem:[#allocation2 + $0x132] sm:$0xff]  ;;  %v580_v1 = vld [vmem:[#allocation2 + $0x142] sm:$0xff] }
  0x73   : > { %v3192_v37 = vmax.f32 %v828_v24, %v912_v34  ;;  %1354 = vst.msk [vmem:[#allocation3 + $0x60] sm:$0xff] %vm149_vm0, %v1282_v31  ;;  %v662_v29 = vmax.f32 %v494_v36, %v578_v41  ;;  %v746_v48 = vld [vmem:[#allocation2 + $0x12b] sm:$0xff]  ;;  %v495_v49 = vmax.f32 %v327_v59, %v411_v20  ;;  %v1071_v45 = vmax.f32 %v3127_v51, %v3149_v26  ;;  %v747_v7 = vld [vmem:[#allocation2 + $0x133] sm:$0xff]  ;;  %v748_v15 = vld [vmem:[#allocation2 + $0x143] sm:$0xff] }
  0x74   : > { %v1283_v28 = vmax.f32 %v1211_v23, %v3188_v33  ;;  %v829_v52 = vmax.f32 %v661_v40, %v745_v46  ;;  %v1142_v53 = vmax.f32 %v1070_v42, %v3167_v58  ;;  %v413_v57 = vld [vmem:[#allocation2 + $0x149] sm:$0xff]  ;;  %v1213_v62 = vmax.f32 %v1141_v47, %v3180_v18  ;;  %v915_v3 = vld [vmem:[#allocation2 + $0x134] sm:$0xff]  ;;  %v331_v23 = vld [vmem:[#allocation2 + $0x160] sm:$0xff] }
  0x75   : > { %v1284_v50 = vmax.f32 %v1212_v39, %v3192_v37  ;;  %v913_v61 = vld [vmem:[#allocation2 + $0x124] sm:$0xff]  ;;  %v830_v60 = vmax.f32 %v662_v29, %v746_v48  ;;  %v914_v63 = vld [vmem:[#allocation2 + $0x12c] sm:$0xff]  ;;  %v663_v0 = vmax.f32 %v495_v49, %v579_v54  ;;  %v496_v4 = vmax.f32 %v328_v44, %v412_v56 }
  0x76   : > { %1355 = vst.msk [vmem:[#allocation3 + $0x68] sm:$0xff] %vm149_vm0, %v1283_v28  ;;  %v3207_v38 = vmax.f32 %v829_v52, %v913_v61  ;;  %v1214_v5 = vmax.f32 %v1142_v53, %v3188_v33  ;;  %v1143_v51 = vmax.f32 %v1071_v45, %v3171_v2  ;;  %v1072_v8 = vmax.f32 %v3137_v6, %v3159_v43  ;;  %v330_v16 = vld [vmem:[#allocation2 + $0x150] sm:$0xff]  ;;  %v415_v6 = vld [vmem:[#allocation2 + $0x161] sm:$0xff] }
  0x77   : > { %1356 = vst.msk [vmem:[#allocation3 + $0x70] sm:$0xff] %vm149_vm0, %v1284_v50  ;;  %v3213_v10 = vmax.f32 %v830_v60, %v914_v63  ;;  %v831_v11 = vmax.f32 %v663_v0, %v747_v7  ;;  %v664_v13 = vmax.f32 %v496_v4, %v580_v1  ;;  %v497_v32 = vmax.f32 %v329_v55, %v413_v57  ;;  %v414_v17 = vld [vmem:[#allocation2 + $0x151] sm:$0xff]  ;;  %v916_v59 = vld [vmem:[#allocation2 + $0x144] sm:$0xff] }
  0x78   : > { %v1285_v25 = vmax.f32 %v1213_v62, %v3207_v38  ;;  %v1215_v9 = vmax.f32 %v1143_v51, %v3192_v37  ;;  %v1144_v14 = vmax.f32 %v1072_v8, %v3180_v18  ;;  %v581_v21 = vld [vmem:[#allocation2 + $0x14a] sm:$0xff]  ;;  %v1073_v22 = vmax.f32 %v3145_v19, %v3167_v58  ;;  %v582_v56 = vld [vmem:[#allocation2 + $0x152] sm:$0xff]  ;;  %v583_v48 = vld [vmem:[#allocation2 + $0x162] sm:$0xff] }
  0x79   : > { %v1286_v24 = vmax.f32 %v1214_v5, %v3213_v10  ;;  %v3221_v27 = vmax.f32 %v831_v11, %v915_v3  ;;  %v832_v30 = vmax.f32 %v664_v13, %v748_v15  ;;  %v665_v20 = vmax.f32 %v497_v32, %v581_v21  ;;  %v749_v34 = vld [vmem:[#allocation2 + $0x14b] sm:$0xff]  ;;  %v750_v54 = vld [vmem:[#allocation2 + $0x153] sm:$0xff]  ;;  %v751_v55 = vld [vmem:[#allocation2 + $0x163] sm:$0xff] }
  0x7a   : > { %1357 = vst.msk [vmem:[#allocation3 + $0x78] sm:$0xff] %vm149_vm0, %v1285_v25  ;;  %v1216_v31 = vmax.f32 %v1144_v14, %v3207_v38  ;;  %v1145_v35 = vmax.f32 %v1073_v22, %v3188_v33  ;;  %v498_v12 = vmax.f32 %v330_v16, %v414_v17  ;;  %v1074_v19 = vmax.f32 %v3149_v26, %v3171_v2  ;;  %v332_v36 = vld [vmem:[#allocation2 + $0x168] sm:$0xff]  ;;  %v333_v49 = vld [vmem:[#allocation2 + $0x170] sm:$0xff]  ;;  %v334_v0 = vld [vmem:[#allocation2 + $0x180] sm:$0xff] }
  0x7b   : > { %v416_v39 = vld [vmem:[#allocation2 + $0x169] sm:$0xff]  ;;  %1358 = vst.msk [vmem:[#allocation3 + $0x80] sm:$0xff] %vm149_vm0, %v1286_v24  ;;  %v1287_v40 = vmax.f32 %v1215_v9, %v3221_v27  ;;  %v3230_v41 = vmax.f32 %v832_v30, %v916_v59  ;;  %v833_v42 = vmax.f32 %v665_v20, %v749_v34  ;;  %v499_v28 = vmax.f32 %v331_v23, %v415_v6  ;;  %v417_v50 = vld [vmem:[#allocation2 + $0x171] sm:$0xff]  ;;  %v418_v4 = vld [vmem:[#allocation2 + $0x181] sm:$0xff] }
  0x7c   : > { %v917_v44 = vld [vmem:[#allocation2 + $0x14c] sm:$0xff]  ;;  %v1217_v46 = vmax.f32 %v1145_v35, %v3213_v10  ;;  %v666_v47 = vmax.f32 %v498_v12, %v582_v56  ;;  %v1146_v29 = vmax.f32 %v1074_v19, %v3192_v37  ;;  %v1075_v26 = vmax.f32 %v3159_v43, %v3180_v18  ;;  %v918_v7 = vld [vmem:[#allocation2 + $0x154] sm:$0xff]  ;;  %v919_v51 = vld [vmem:[#allocation2 + $0x164] sm:$0xff] }
  0x7d   : > { %1359 = vst.msk [vmem:[#allocation3 + $0x88] sm:$0xff] %vm149_vm0, %v1287_v40  ;;  %v1288_v52 = vmax.f32 %v1216_v31, %v3230_v41  ;;  %v3238_v53 = vmax.f32 %v833_v42, %v917_v44  ;;  %v667_v45 = vmax.f32 %v499_v28, %v583_v48  ;;  %v500_v57 = vmax.f32 %v332_v36, %v416_v39  ;;  %v584_v63 = vld [vmem:[#allocation2 + $0x16a] sm:$0xff]  ;;  %v753_v21 = vld [vmem:[#allocation2 + $0x173] sm:$0xff]  ;;  %v586_v20 = vld [vmem:[#allocation2 + $0x182] sm:$0xff] }
  0x7e   : > { %v834_v61 = vmax.f32 %v666_v47, %v750_v54  ;;  %v1218_v62 = vmax.f32 %v1146_v29, %v3221_v27  ;;  %v1147_v60 = vmax.f32 %v1075_v26, %v3207_v38  ;;  %v1076_v43 = vmax.f32 %v3167_v58, %v3188_v33  ;;  %v752_v15 = vld [vmem:[#allocation2 + $0x16b] sm:$0xff]  ;;  %v921_v36 = vld [vmem:[#allocation2 + $0x174] sm:$0xff]  ;;  %v754_v42 = vld [vmem:[#allocation2 + $0x183] sm:$0xff] }
  0x7f   : > { %1360 = vst.msk [vmem:[#allocation3 + $0x90] sm:$0xff] %vm149_vm0, %v1288_v52  ;;  %v1289_v5 = vmax.f32 %v1217_v46, %v3238_v53  ;;  %v835_v3 = vmax.f32 %v667_v45, %v751_v55  ;;  %v668_v1 = vmax.f32 %v500_v57, %v584_v63  ;;  %v501_v8 = vmax.f32 %v333_v49, %v417_v50  ;;  %v920_v32 = vld [vmem:[#allocation2 + $0x16c] sm:$0xff]  ;;  %v337_v28 = vld [vmem:[#allocation2 + $0x1a0] sm:$0xff] }
  0x80   : > { %v3246_v11 = vmax.f32 %v834_v61, %v918_v7  ;;  %v1219_v13 = vmax.f32 %v1147_v60, %v3230_v41  ;;  %v1148_v16 = vmax.f32 %v1076_v43, %v3213_v10  ;;  %v585_v58 = vld [vmem:[#allocation2 + $0x172] sm:$0xff]  ;;  %v1077_v17 = vmax.f32 %v3171_v2, %v3192_v37  ;;  %v335_v23 = vld [vmem:[#allocation2 + $0x188] sm:$0xff] }
  0x81   : > { %1361 = vst.msk [vmem:[#allocation3 + $0x98] sm:$0xff] %vm149_vm0, %v1289_v5  ;;  %v3253_v25 = vmax.f32 %v835_v3, %v919_v51  ;;  %v836_v9 = vmax.f32 %v668_v1, %v752_v15  ;;  %v669_v14 = vmax.f32 %v501_v8, %v585_v58  ;;  %v502_v22 = vmax.f32 %v334_v0, %v418_v4  ;;  %v419_v6 = vld [vmem:[#allocation2 + $0x189] sm:$0xff]  ;;  %v420_v34 = vld [vmem:[#allocation2 + $0x191] sm:$0xff]  ;;  %v421_v46 = vld [vmem:[#allocation2 + $0x1a1] sm:$0xff] }
  0x82   : > { %v1290_v24 = vmax.f32 %v1218_v62, %v3246_v11  ;;  %v1220_v30 = vmax.f32 %v1148_v16, %v3238_v53  ;;  %v1149_v59 = vmax.f32 %v1077_v17, %v3221_v27  ;;  %v1078_v2 = vmax.f32 %v3180_v18, %v3207_v38  ;;  %v336_v31 = vld [vmem:[#allocation2 + $0x190] sm:$0xff]  ;;  %v922_v26 = vld [vmem:[#allocation2 + $0x184] sm:$0xff] }
  0x83   : > { %v1291_v35 = vmax.f32 %v1219_v13, %v3253_v25  ;;  %v3261_v12 = vmax.f32 %v836_v9, %v920_v32  ;;  %v837_v19 = vmax.f32 %v669_v14, %v753_v21  ;;  %v670_v39 = vmax.f32 %v502_v22, %v586_v20  ;;  %v587_v49 = vld [vmem:[#allocation2 + $0x18a] sm:$0xff]  ;;  %v588_v55 = vld [vmem:[#allocation2 + $0x192] sm:$0xff]  ;;  %v589_v51 = vld [vmem:[#allocation2 + $0x1a2] sm:$0xff] }
  0x84   : > { %1362 = vst.msk [vmem:[#allocation3 + $0xa0] sm:$0xff] %vm149_vm0, %v1290_v24  ;;  %v1221_v40 = vmax.f32 %v1149_v59, %v3246_v11  ;;  %v1150_v44 = vmax.f32 %v1078_v2, %v3230_v41  ;;  %v503_v56 = vmax.f32 %v335_v23, %v419_v6  ;;  %v1079_v18 = vmax.f32 %v3188_v33, %v3213_v10  ;;  %v338_v57 = vld [vmem:[#allocation2 + $0x1a8] sm:$0xff]  ;;  %v756_v0 = vld [vmem:[#allocation2 + $0x193] sm:$0xff] }
  0x85   : > { %1363 = vst.msk [vmem:[#allocation3 + $0xa8] sm:$0xff] %vm149_vm0, %v1291_v35  ;;  %v1292_v47 = vmax.f32 %v1220_v30, %v3261_v12  ;;  %v3270_v29 = vmax.f32 %v837_v19, %v921_v36  ;;  %v838_v48 = vmax.f32 %v670_v39, %v754_v42  ;;  %v504_v50 = vmax.f32 %v336_v31, %v420_v34  ;;  %v422_v61 = vld [vmem:[#allocation2 + $0x1a9] sm:$0xff]  ;;  %v423_v8 = vld [vmem:[#allocation2 + $0x1b1] sm:$0xff]  ;;  %v340_v31 = vld [vmem:[#allocation2 + $0x1c0] sm:$0xff] }
  0x86   : > { %v1222_v52 = vmax.f32 %v1150_v44, %v3253_v25  ;;  %v671_v54 = vmax.f32 %v503_v56, %v587_v49  ;;  %v1151_v45 = vmax.f32 %v1079_v18, %v3238_v53  ;;  %v1080_v33 = vmax.f32 %v3192_v37, %v3221_v27  ;;  %v755_v63 = vld [vmem:[#allocation2 + $0x18b] sm:$0xff]  ;;  %v924_v16 = vld [vmem:[#allocation2 + $0x194] sm:$0xff]  ;;  %v757_v21 = vld [vmem:[#allocation2 + $0x1a3] sm:$0xff] }
  0x87   : > { %1364 = vst.msk [vmem:[#allocation3 + $0xb0] sm:$0xff] %vm149_vm0, %v1292_v47  ;;  %v1293_v62 = vmax.f32 %v1221_v40, %v3270_v29  ;;  %v3278_v60 = vmax.f32 %v838_v48, %v922_v26  ;;  %v672_v43 = vmax.f32 %v504_v50, %v588_v55  ;;  %v505_v4 = vmax.f32 %v337_v28, %v421_v46  ;;  %v339_v1 = vld [vmem:[#allocation2 + $0x1b0] sm:$0xff]  ;;  %v925_v22 = vld [vmem:[#allocation2 + $0x1a4] sm:$0xff] }
  0x88   : > { %v839_v5 = vmax.f32 %v671_v54, %v755_v63  ;;  %v1223_v7 = vmax.f32 %v1151_v45, %v3261_v12  ;;  %v1152_v3 = vmax.f32 %v1080_v33, %v3246_v11  ;;  %v1081_v37 = vmax.f32 %v3207_v38, %v3230_v41  ;;  %v923_v15 = vld [vmem:[#allocation2 + $0x18c] sm:$0xff]  ;;  %v424_v34 = vld [vmem:[#allocation2 + $0x1c1] sm:$0xff]  ;;  %v927_v33 = vld [vmem:[#allocation2 + $0x1b4] sm:$0xff] }
  0x89   : > { %1365 = vst.msk [vmem:[#allocation3 + $0xb8] sm:$0xff] %vm149_vm0, %v1293_v62  ;;  %v1294_v13 = vmax.f32 %v1222_v52, %v3278_v60  ;;  %v840_v32 = vmax.f32 %v672_v43, %v756_v0  ;;  %v673_v58 = vmax.f32 %v505_v4, %v589_v51  ;;  %v506_v17 = vmax.f32 %v338_v57, %v422_v61  ;;  %v590_v38 = vld [vmem:[#allocation2 + $0x1aa] sm:$0xff]  ;;  %v591_v39 = vld [vmem:[#allocation2 + $0x1b2] sm:$0xff]  ;;  %v592_v57 = vld [vmem:[#allocation2 + $0x1c2] sm:$0xff] }
  0x8a   : > { %v3286_v9 = vmax.f32 %v839_v5, %v923_v15  ;;  %v1224_v14 = vmax.f32 %v1152_v3, %v3270_v29  ;;  %v1153_v23 = vmax.f32 %v1081_v37, %v3253_v25  ;;  %v1082_v6 = vmax.f32 %v3213_v10, %v3238_v53  ;;  %v758_v20 = vld [vmem:[#allocation2 + $0x1ab] sm:$0xff]  ;;  %v759_v48 = vld [vmem:[#allocation2 + $0x1b3] sm:$0xff]  ;;  %v343_v4 = vld [vmem:[#allocation2 + $0x1e0] sm:$0xff] }
  0x8b   : > { %1366 = vst.msk [vmem:[#allocation3 + $0xc0] sm:$0xff] %vm149_vm0, %v1294_v13  ;;  %v3293_v24 = vmax.f32 %v840_v32, %v924_v16  ;;  %v841_v30 = vmax.f32 %v673_v58, %v757_v21  ;;  %v674_v59 = vmax.f32 %v506_v17, %v590_v38  ;;  %v507_v2 = vmax.f32 %v339_v1, %v423_v8  ;;  %v341_v40 = vld [vmem:[#allocation2 + $0x1c8] sm:$0xff]  ;;  %v342_v50 = vld [vmem:[#allocation2 + $0x1d0] sm:$0xff] }
  0x8c   : > { %v1295_v35 = vmax.f32 %v1223_v7, %v3286_v9  ;;  %v1225_v19 = vmax.f32 %v1153_v23, %v3278_v60  ;;  %v1154_v36 = vmax.f32 %v1082_v6, %v3261_v12  ;;  %v1083_v10 = vmax.f32 %v3221_v27, %v3246_v11  ;;  %v425_v42 = vld [vmem:[#allocation2 + $0x1c9] sm:$0xff]  ;;  %v426_v52 = vld [vmem:[#allocation2 + $0x1d1] sm:$0xff]  ;;  %v427_v5 = vld [vmem:[#allocation2 + $0x1e1] sm:$0xff] }
  0x8d   : > { %v1296_v44 = vmax.f32 %v1224_v14, %v3293_v24  ;;  %v3301_v56 = vmax.f32 %v841_v30, %v925_v22  ;;  %v842_v18 = vmax.f32 %v674_v59, %v758_v20  ;;  %v926_v28 = vld [vmem:[#allocation2 + $0x1ac] sm:$0xff]  ;;  %v675_v46 = vmax.f32 %v507_v2, %v591_v39  ;;  %v760_v51 = vld [vmem:[#allocation2 + $0x1c3] sm:$0xff]  ;;  %v930_v2 = vld [vmem:[#allocation2 + $0x1d4] sm:$0xff] }
  0x8e   : > { %1367 = vst.msk [vmem:[#allocation3 + $0xc8] sm:$0xff] %vm149_vm0, %v1295_v35  ;;  %v1226_v47 = vmax.f32 %v1154_v36, %v3286_v9  ;;  %v1155_v26 = vmax.f32 %v1083_v10, %v3270_v29  ;;  %v508_v49 = vmax.f32 %v340_v31, %v424_v34  ;;  %v1084_v27 = vmax.f32 %v3230_v41, %v3253_v25  ;;  %v593_v0 = vld [vmem:[#allocation2 + $0x1ca] sm:$0xff]  ;;  %v594_v16 = vld [vmem:[#allocation2 + $0x1d2] sm:$0xff] }
  0x8f   : > { %1368 = vst.msk [vmem:[#allocation3 + $0xd0] sm:$0xff] %vm149_vm0, %v1296_v44  ;;  %v1297_v54 = vmax.f32 %v1225_v19, %v3301_v56  ;;  %v3310_v45 = vmax.f32 %v842_v18, %v926_v28  ;;  %v843_v55 = vmax.f32 %v675_v46, %v759_v48  ;;  %v509_v61 = vmax.f32 %v341_v40, %v425_v42  ;;  %v761_v1 = vld [vmem:[#allocation2 + $0x1cb] sm:$0xff]  ;;  %v762_v20 = vld [vmem:[#allocation2 + $0x1d3] sm:$0xff]  ;;  %v763_v39 = vld [vmem:[#allocation2 + $0x1e3] sm:$0xff] }
  0x90   : > { %v1227_v62 = vmax.f32 %v1155_v26, %v3293_v24  ;;  %v676_v63 = vmax.f32 %v508_v49, %v592_v57  ;;  %v1156_v43 = vmax.f32 %v1084_v27, %v3278_v60  ;;  %v1085_v41 = vmax.f32 %v3238_v53, %v3261_v12  ;;  %v344_v58 = vld [vmem:[#allocation2 + $0x1e8] sm:$0xff]  ;;  %v345_v40 = vld [vmem:[#allocation2 + $0x1f0] sm:$0xff] }
  0x91   : > { %1369 = vst.msk [vmem:[#allocation3 + $0xd8] sm:$0xff] %vm149_vm0, %v1297_v54  ;;  %v1298_v7 = vmax.f32 %v1226_v47, %v3310_v45  ;;  %v3318_v3 = vmax.f32 %v843_v55, %v927_v33  ;;  %v677_v37 = vmax.f32 %v509_v61, %v593_v0  ;;  %v510_v8 = vmax.f32 %v342_v50, %v426_v52  ;;  %v428_v17 = vld [vmem:[#allocation2 + $0x1e9] sm:$0xff]  ;;  %v429_v42 = vld [vmem:[#allocation2 + $0x1f1] sm:$0xff]  ;;  %v346_v47 = vld [vmem:[#allocation2 + $0x200] sm:$0xff] }
  0x92   : > { %v844_v13 = vmax.f32 %v676_v63, %v760_v51  ;;  %v1228_v15 = vmax.f32 %v1156_v43, %v3301_v56  ;;  %v1157_v32 = vmax.f32 %v1085_v41, %v3286_v9  ;;  %v1086_v53 = vmax.f32 %v3246_v11, %v3270_v29  ;;  %v928_v21 = vld [vmem:[#allocation2 + $0x1c4] sm:$0xff]  ;;  %v929_v23 = vld [vmem:[#allocation2 + $0x1cc] sm:$0xff] }
  0x93   : > { %1370 = vst.msk [vmem:[#allocation3 + $0xe0] sm:$0xff] %vm149_vm0, %v1298_v7  ;;  %v1299_v14 = vmax.f32 %v1227_v62, %v3318_v3  ;;  %v845_v22 = vmax.f32 %v677_v37, %v761_v1  ;;  %v678_v38 = vmax.f32 %v510_v8, %v594_v16  ;;  %v511_v6 = vmax.f32 %v343_v4, %v427_v5  ;;  %v595_v11 = vld [vmem:[#allocation2 + $0x1e2] sm:$0xff]  ;;  %v596_v46 = vld [vmem:[#allocation2 + $0x1ea] sm:$0xff]  ;;  %v597_v4 = vld [vmem:[#allocation2 + $0x1f2] sm:$0xff] }
  0x94   : > { %v3326_v30 = vmax.f32 %v844_v13, %v928_v21  ;;  %v1229_v59 = vmax.f32 %v1157_v32, %v3310_v45  ;;  %v1158_v31 = vmax.f32 %v1086_v53, %v3293_v24  ;;  %v1087_v34 = vmax.f32 %v3253_v25, %v3278_v60  ;;  %v430_v48 = vld [vmem:[#allocation2 + $0x201] sm:$0xff]  ;;  %v764_v55 = vld [vmem:[#allocation2 + $0x1eb] sm:$0xff]  ;;  %v765_v16 = vld [vmem:[#allocation2 + $0x1f3] sm:$0xff] }
  0x95   : > { %1371 = vst.msk [vmem:[#allocation3 + $0xe8] sm:$0xff] %vm149_vm0, %v1299_v14  ;;  %v3333_v35 = vmax.f32 %v845_v22, %v929_v23  ;;  %v846_v19 = vmax.f32 %v678_v38, %v762_v20  ;;  %v679_v36 = vmax.f32 %v511_v6, %v595_v11  ;;  %v512_v10 = vmax.f32 %v344_v58, %v428_v17  ;;  %v931_v50 = vld [vmem:[#allocation2 + $0x1e4] sm:$0xff]  ;;  %v932_v41 = vld [vmem:[#allocation2 + $0x1ec] sm:$0xff]  ;;  %v933_v20 = vld [vmem:[#allocation2 + $0x1f4] sm:$0xff] }
  0x96   : > { %v1300_v44 = vmax.f32 %v1228_v15, %v3326_v30  ;;  %v1230_v18 = vmax.f32 %v1158_v31, %v3318_v3  ;;  %v1159_v28 = vmax.f32 %v1087_v34, %v3301_v56  ;;  %v1088_v25 = vmax.f32 %v3261_v12, %v3286_v9  ;;  %v347_v61 = vld [vmem:[#allocation2 + $0x208] sm:$0xff]  ;;  %v348_v8 = vld [vmem:[#allocation2 + $0x210] sm:$0xff]  ;;  %v349_v38 = vld [vmem:[#allocation2 + $0x220] sm:$0xff] }
  0x97   : > { %v1301_v26 = vmax.f32 %v1229_v59, %v3333_v35  ;;  %v3341_v49 = vmax.f32 %v846_v19, %v930_v2  ;;  %v847_v27 = vmax.f32 %v679_v36, %v763_v39  ;;  %v680_v52 = vmax.f32 %v512_v10, %v596_v46  ;;  %v431_v62 = vld [vmem:[#allocation2 + $0x209] sm:$0xff]  ;;  %v432_v13 = vld [vmem:[#allocation2 + $0x211] sm:$0xff]  ;;  %v433_v6 = vld [vmem:[#allocation2 + $0x221] sm:$0xff] }
  0x98   : > { %1372 = vst.msk [vmem:[#allocation3 + $0xf0] sm:$0xff] %vm149_vm0, %v1300_v44  ;;  %v1231_v54 = vmax.f32 %v1159_v28, %v3326_v30  ;;  %v1160_v33 = vmax.f32 %v1088_v25, %v3310_v45  ;;  %v513_v57 = vmax.f32 %v345_v40, %v429_v42  ;;  %v1089_v12 = vmax.f32 %v3270_v29, %v3293_v24  ;;  %v598_v1 = vld [vmem:[#allocation2 + $0x202] sm:$0xff]  ;;  %v599_v23 = vld [vmem:[#allocation2 + $0x20a] sm:$0xff]  ;;  %v768_v46 = vld [vmem:[#allocation2 + $0x213] sm:$0xff] }
  0x99   : > { %1373 = vst.msk [vmem:[#allocation3 + $0xf8] sm:$0xff] %vm149_vm0, %v1301_v26  ;;  %v1302_v63 = vmax.f32 %v1230_v18, %v3341_v49  ;;  %v3350_v43 = vmax.f32 %v847_v27, %v931_v50  ;;  %v848_v0 = vmax.f32 %v680_v52, %v764_v55  ;;  %v514_v5 = vmax.f32 %v346_v47, %v430_v48  ;;  %v766_v58 = vld [vmem:[#allocation2 + $0x203] sm:$0xff]  ;;  %v767_v39 = vld [vmem:[#allocation2 + $0x20b] sm:$0xff] }
  0x9a   : > { %v1232_v7 = vmax.f32 %v1160_v33, %v3333_v35  ;;  %v681_v51 = vmax.f32 %v513_v57, %v597_v4  ;;  %v1161_v37 = vmax.f32 %v1089_v12, %v3318_v3  ;;  %v1090_v29 = vmax.f32 %v3278_v60, %v3301_v56  ;;  %v934_v31 = vld [vmem:[#allocation2 + $0x204] sm:$0xff]  ;;  %v935_v10 = vld [vmem:[#allocation2 + $0x20c] sm:$0xff] }
  0x9b   : > { %1374 = vst.msk [vmem:[#allocation3 + $0x100] sm:$0xff] %vm149_vm0, %v1302_v63  ;;  %v1303_v15 = vmax.f32 %v1231_v54, %v3350_v43  ;;  %v3358_v32 = vmax.f32 %v848_v0, %v932_v41  ;;  %v682_v53 = vmax.f32 %v514_v5, %v598_v1  ;;  %v515_v17 = vmax.f32 %v347_v61, %v431_v62  ;;  %v350_v47 = vld [vmem:[#allocation2 + $0x228] sm:$0xff]  ;;  %v351_v54 = vld [vmem:[#allocation2 + $0x230] sm:$0xff]  ;;  %v352_v5 = vld [vmem:[#allocation2 + $0x240] sm:$0xff] }
  0x9c   : > { %v849_v14 = vmax.f32 %v681_v51, %v765_v16  ;;  %v1233_v21 = vmax.f32 %v1161_v37, %v3341_v49  ;;  %v1162_v22 = vmax.f32 %v1090_v29, %v3326_v30  ;;  %v1091_v60 = vmax.f32 %v3286_v9, %v3310_v45  ;;  %v600_v9 = vld [vmem:[#allocation2 + $0x212] sm:$0xff]  ;;  %v434_v48 = vld [vmem:[#allocation2 + $0x229] sm:$0xff] }
  0x9d   : > { %1375 = vst.msk [vmem:[#allocation3 + $0x108] sm:$0xff] %vm149_vm0, %v1303_v15  ;;  %v1304_v59 = vmax.f32 %v1232_v7, %v3358_v32  ;;  %v850_v2 = vmax.f32 %v682_v53, %v766_v58  ;;  %v683_v11 = vmax.f32 %v515_v17, %v599_v23  ;;  %v516_v34 = vmax.f32 %v348_v8, %v432_v13  ;;  %v601_v52 = vld [vmem:[#allocation2 + $0x222] sm:$0xff]  ;;  %v435_v55 = vld [vmem:[#allocation2 + $0x231] sm:$0xff] }
  0x9e   : > { %v3366_v19 = vmax.f32 %v849_v14, %v933_v20  ;;  %v1234_v36 = vmax.f32 %v1162_v22, %v3350_v43  ;;  %v1163_v40 = vmax.f32 %v1091_v60, %v3333_v35  ;;  %v1092_v42 = vmax.f32 %v3293_v24, %v3318_v3  ;;  %v936_v61 = vld [vmem:[#allocation2 + $0x214] sm:$0xff]  ;;  %v769_v0 = vld [vmem:[#allocation2 + $0x223] sm:$0xff]  ;;  %v770_v23 = vld [vmem:[#allocation2 + $0x22b] sm:$0xff] }
  0x9f   : > { %1376 = vst.msk [vmem:[#allocation3 + $0x110] sm:$0xff] %vm149_vm0, %v1304_v59  ;;  %v3373_v44 = vmax.f32 %v850_v2, %v934_v31  ;;  %v851_v18 = vmax.f32 %v683_v11, %v767_v39  ;;  %v684_v28 = vmax.f32 %v516_v34, %v600_v9  ;;  %v517_v25 = vmax.f32 %v349_v38, %v433_v6  ;;  %v436_v7 = vld [vmem:[#allocation2 + $0x241] sm:$0xff]  ;;  %v602_v8 = vld [vmem:[#allocation2 + $0x22a] sm:$0xff]  ;;  %v603_v58 = vld [vmem:[#allocation2 + $0x232] sm:$0xff] }
  0xa0   : > { %v1305_v26 = vmax.f32 %v1233_v21, %v3366_v19  ;;  %v1235_v27 = vmax.f32 %v1163_v40, %v3358_v32  ;;  %v1164_v50 = vmax.f32 %v1092_v42, %v3341_v49  ;;  %v1093_v24 = vmax.f32 %v3301_v56, %v3326_v30  ;;  %v937_v29 = vld [vmem:[#allocation2 + $0x224] sm:$0xff]  ;;  %v771_v38 = vld [vmem:[#allocation2 + $0x233] sm:$0xff] }
  0xa1   : > { %v1306_v33 = vmax.f32 %v1234_v36, %v3373_v44  ;;  %v3381_v57 = vmax.f32 %v851_v18, %v935_v10  ;;  %v852_v12 = vmax.f32 %v684_v28, %v768_v46  ;;  %v685_v62 = vmax.f32 %v517_v25, %v601_v52  ;;  %v353_v17 = vld [vmem:[#allocation2 + $0x248] sm:$0xff]  ;;  %v354_v11 = vld [vmem:[#allocation2 + $0x250] sm:$0xff] }
  0xa2   : > { %1377 = vst.msk [vmem:[#allocation3 + $0x118] sm:$0xff] %vm149_vm0, %v1305_v26  ;;  %v1236_v63 = vmax.f32 %v1164_v50, %v3366_v19  ;;  %v1165_v41 = vmax.f32 %v1093_v24, %v3350_v43  ;;  %v518_v4 = vmax.f32 %v350_v47, %v434_v48  ;;  %v1094_v56 = vmax.f32 %v3310_v45, %v3333_v35  ;;  %v437_v14 = vld [vmem:[#allocation2 + $0x249] sm:$0xff]  ;;  %v438_v34 = vld [vmem:[#allocation2 + $0x251] sm:$0xff] }
  0xa3   : > { %1378 = vst.msk [vmem:[#allocation3 + $0x120] sm:$0xff] %vm149_vm0, %v1306_v33  ;;  %v1307_v51 = vmax.f32 %v1235_v27, %v3381_v57  ;;  %v3390_v37 = vmax.f32 %v852_v12, %v936_v61  ;;  %v853_v1 = vmax.f32 %v685_v62, %v769_v0  ;;  %v519_v13 = vmax.f32 %v351_v54, %v435_v55  ;;  %v604_v31 = vld [vmem:[#allocation2 + $0x242] sm:$0xff]  ;;  %v938_v39 = vld [vmem:[#allocation2 + $0x22c] sm:$0xff]  ;;  %v939_v40 = vld [vmem:[#allocation2 + $0x234] sm:$0xff] }
  0xa4   : > { %v1237_v15 = vmax.f32 %v1165_v41, %v3373_v44  ;;  %v686_v16 = vmax.f32 %v518_v4, %v602_v8  ;;  %v1166_v53 = vmax.f32 %v1094_v56, %v3358_v32  ;;  %v1095_v45 = vmax.f32 %v3318_v3, %v3341_v49  ;;  %v772_v46 = vld [vmem:[#allocation2 + $0x243] sm:$0xff]  ;;  %v773_v52 = vld [vmem:[#allocation2 + $0x24b] sm:$0xff] }
  0xa5   : > { %1379 = vst.msk [vmem:[#allocation3 + $0x128] sm:$0xff] %vm149_vm0, %v1307_v51  ;;  %v1308_v21 = vmax.f32 %v1236_v63, %v3390_v37  ;;  %v3398_v22 = vmax.f32 %v853_v1, %v937_v29  ;;  %v687_v60 = vmax.f32 %v519_v13, %v603_v58  ;;  %v520_v6 = vmax.f32 %v352_v5, %v436_v7  ;;  %v940_v25 = vld [vmem:[#allocation2 + $0x244] sm:$0xff]  ;;  %v606_v62 = vld [vmem:[#allocation2 + $0x252] sm:$0xff] }
  0xa6   : > { %v854_v59 = vmax.f32 %v686_v16, %v770_v23  ;;  %v1238_v20 = vmax.f32 %v1166_v53, %v3381_v57  ;;  %v1167_v2 = vmax.f32 %v1095_v45, %v3366_v19  ;;  %v1096_v3 = vmax.f32 %v3326_v30, %v3350_v43  ;;  %v605_v30 = vld [vmem:[#allocation2 + $0x24a] sm:$0xff]  ;;  %v355_v54 = vld [vmem:[#allocation2 + $0x260] sm:$0xff]  ;;  %v774_v1 = vld [vmem:[#allocation2 + $0x253] sm:$0xff] }
  0xa7   : > { %1380 = vst.msk [vmem:[#allocation3 + $0x130] sm:$0xff] %vm149_vm0, %v1308_v21  ;;  %v1309_v36 = vmax.f32 %v1237_v15, %v3398_v22  ;;  %v855_v10 = vmax.f32 %v687_v60, %v771_v38  ;;  %v688_v9 = vmax.f32 %v520_v6, %v604_v31  ;;  %v521_v42 = vmax.f32 %v353_v17, %v437_v14  ;;  %v439_v55 = vld [vmem:[#allocation2 + $0x261] sm:$0xff]  ;;  %v440_v0 = vld [vmem:[#allocation2 + $0x269] sm:$0xff]  ;;  %v441_v15 = vld [vmem:[#allocation2 + $0x271] sm:$0xff] }
  0xa8   : > { %v3406_v18 = vmax.f32 %v854_v59, %v938_v39  ;;  %v1239_v28 = vmax.f32 %v1167_v2, %v3390_v37  ;;  %v1168_v47 = vmax.f32 %v1096_v3, %v3373_v44  ;;  %v1097_v48 = vmax.f32 %v3333_v35, %v3358_v32  ;;  %v356_v63 = vld [vmem:[#allocation2 + $0x268] sm:$0xff]  ;;  %v357_v13 = vld [vmem:[#allocation2 + $0x270] sm:$0xff]  ;;  %v358_v6 = vld [vmem:[#allocation2 + $0x280] sm:$0xff] }
  0xa9   : > { %1381 = vst.msk [vmem:[#allocation3 + $0x138] sm:$0xff] %vm149_vm0, %v1309_v36  ;;  %v3413_v26 = vmax.f32 %v855_v10, %v939_v40  ;;  %v856_v27 = vmax.f32 %v688_v9, %v772_v46  ;;  %v689_v50 = vmax.f32 %v521_v42, %v605_v30  ;;  %v522_v24 = vmax.f32 %v354_v11, %v438_v34  ;;  %v941_v5 = vld [vmem:[#allocation2 + $0x24c] sm:$0xff]  ;;  %v942_v45 = vld [vmem:[#allocation2 + $0x254] sm:$0xff]  ;;  %v607_v17 = vld [vmem:[#allocation2 + $0x262] sm:$0xff] }
  0xaa   : > { %v1310_v33 = vmax.f32 %v1238_v20, %v3406_v18  ;;  %v1240_v12 = vmax.f32 %v1168_v47, %v3398_v22  ;;  %v1169_v61 = vmax.f32 %v1097_v48, %v3381_v57  ;;  %v1098_v35 = vmax.f32 %v3341_v49, %v3366_v19  ;;  %v608_v38 = vld [vmem:[#allocation2 + $0x26a] sm:$0xff]  ;;  %v442_v59 = vld [vmem:[#allocation2 + $0x281] sm:$0xff]  ;;  %v609_v40 = vld [vmem:[#allocation2 + $0x272] sm:$0xff] }
  0xab   : > { %v1311_v41 = vmax.f32 %v1239_v28, %v3413_v26  ;;  %v3421_v4 = vmax.f32 %v856_v27, %v940_v25  ;;  %v857_v56 = vmax.f32 %v689_v50, %v773_v52  ;;  %v690_v7 = vmax.f32 %v522_v24, %v606_v62  ;;  %v775_v31 = vld [vmem:[#allocation2 + $0x263] sm:$0xff]  ;;  %v776_v11 = vld [vmem:[#allocation2 + $0x26b] sm:$0xff]  ;;  %v777_v52 = vld [vmem:[#allocation2 + $0x273] sm:$0xff] }
  0xac   : > { %1382 = vst.msk [vmem:[#allocation3 + $0x140] sm:$0xff] %vm149_vm0, %v1310_v33  ;;  %v1241_v51 = vmax.f32 %v1169_v61, %v3406_v18  ;;  %v1170_v29 = vmax.f32 %v1098_v35, %v3390_v37  ;;  %v523_v8 = vmax.f32 %v355_v54, %v439_v55  ;;  %v1099_v49 = vmax.f32 %v3350_v43, %v3373_v44  ;;  %v359_v9 = vld [vmem:[#allocation2 + $0x288] sm:$0xff]  ;;  %v945_v24 = vld [vmem:[#allocation2 + $0x274] sm:$0xff] }
  0xad   : > { %1383 = vst.msk [vmem:[#allocation3 + $0x148] sm:$0xff] %vm149_vm0, %v1311_v41  ;;  %v1312_v16 = vmax.f32 %v1240_v12, %v3421_v4  ;;  %v3430_v53 = vmax.f32 %v857_v56, %v941_v5  ;;  %v858_v58 = vmax.f32 %v690_v7, %v774_v1  ;;  %v524_v14 = vmax.f32 %v356_v63, %v440_v0  ;;  %v443_v42 = vld [vmem:[#allocation2 + $0x289] sm:$0xff]  ;;  %v444_v0 = vld [vmem:[#allocation2 + $0x291] sm:$0xff]  ;;  %v445_v1 = vld [vmem:[#allocation2 + $0x2a1] sm:$0xff] }
  0xae   : > { %v1242_v21 = vmax.f32 %v1170_v29, %v3413_v26  ;;  %v691_v23 = vmax.f32 %v523_v8, %v607_v17  ;;  %v1171_v60 = vmax.f32 %v1099_v49, %v3398_v22  ;;  %v1100_v43 = vmax.f32 %v3358_v32, %v3381_v57  ;;  %v943_v46 = vld [vmem:[#allocation2 + $0x264] sm:$0xff]  ;;  %v944_v47 = vld [vmem:[#allocation2 + $0x26c] sm:$0xff] }
  0xaf   : > { %1384 = vst.msk [vmem:[#allocation3 + $0x150] sm:$0xff] %vm149_vm0, %v1312_v16  ;;  %v1313_v20 = vmax.f32 %v1241_v51, %v3430_v53  ;;  %v3438_v2 = vmax.f32 %v858_v58, %v942_v45  ;;  %v692_v3 = vmax.f32 %v524_v14, %v608_v38  ;;  %v525_v34 = vmax.f32 %v357_v13, %v441_v15  ;;  %v778_v62 = vld [vmem:[#allocation2 + $0x283] sm:$0xff]  ;;  %v360_v63 = vld [vmem:[#allocation2 + $0x290] sm:$0xff] }
  0xb0   : > { %v859_v36 = vmax.f32 %v691_v23, %v775_v31  ;;  %v1243_v39 = vmax.f32 %v1171_v60, %v3421_v4  ;;  %v1172_v10 = vmax.f32 %v1100_v43, %v3406_v18  ;;  %v1101_v32 = vmax.f32 %v3366_v19, %v3390_v37  ;;  %v610_v19 = vld [vmem:[#allocation2 + $0x282] sm:$0xff]  ;;  %v611_v7 = vld [vmem:[#allocation2 + $0x28a] sm:$0xff] }
  0xb1   : > { %1385 = vst.msk [vmem:[#allocation3 + $0x158] sm:$0xff] %vm149_vm0, %v1313_v20  ;;  %v1314_v28 = vmax.f32 %v1242_v21, %v3438_v2  ;;  %v860_v25 = vmax.f32 %v692_v3, %v776_v11  ;;  %v693_v30 = vmax.f32 %v525_v34, %v609_v40  ;;  %v526_v48 = vmax.f32 %v358_v6, %v442_v59  ;;  %v361_v51 = vld [vmem:[#allocation2 + $0x2a0] sm:$0xff]  ;;  %v779_v16 = vld [vmem:[#allocation2 + $0x28b] sm:$0xff] }
  0xb2   : > { %v3446_v27 = vmax.f32 %v859_v36, %v943_v46  ;;  %v1244_v50 = vmax.f32 %v1172_v10, %v3430_v53  ;;  %v1173_v54 = vmax.f32 %v1101_v32, %v3413_v26  ;;  %v1102_v55 = vmax.f32 %v3373_v44, %v3398_v22  ;;  %v946_v13 = vld [vmem:[#allocation2 + $0x284] sm:$0xff]  ;;  %v947_v6 = vld [vmem:[#allocation2 + $0x28c] sm:$0xff] }
  0xb3   : > { %1386 = vst.msk [vmem:[#allocation3 + $0x160] sm:$0xff] %vm149_vm0, %v1314_v28  ;;  %v3453_v33 = vmax.f32 %v860_v25, %v944_v47  ;;  %v861_v12 = vmax.f32 %v693_v30, %v777_v52  ;;  %v694_v61 = vmax.f32 %v526_v48, %v610_v19  ;;  %v527_v35 = vmax.f32 %v359_v9, %v443_v42  ;;  %v613_v14 = vld [vmem:[#allocation2 + $0x2a2] sm:$0xff]  ;;  %v612_v59 = vld [vmem:[#allocation2 + $0x292] sm:$0xff]  ;;  %v614_v34 = vld [vmem:[#allocation2 + $0x2aa] sm:$0xff] }
  0xb4   : > { %v1315_v41 = vmax.f32 %v1243_v39, %v3446_v27  ;;  %v1245_v56 = vmax.f32 %v1173_v54, %v3438_v2  ;;  %v1174_v5 = vmax.f32 %v1102_v55, %v3421_v4  ;;  %v1103_v44 = vmax.f32 %v3381_v57, %v3406_v18  ;;  %v362_v21 = vld [vmem:[#allocation2 + $0x2a8] sm:$0xff]  ;;  %v363_v36 = vld [vmem:[#allocation2 + $0x2b0] sm:$0xff]  ;;  %v364_v48 = vld [vmem:[#allocation2 + $0x2c0] sm:$0xff] }
  0xb5   : > { %v1316_v29 = vmax.f32 %v1244_v50, %v3453_v33  ;;  %v3461_v8 = vmax.f32 %v861_v12, %v945_v24  ;;  %v862_v49 = vmax.f32 %v694_v61, %v778_v62  ;;  %v695_v15 = vmax.f32 %v527_v35, %v611_v7  ;;  %v446_v23 = vld [vmem:[#allocation2 + $0x2a9] sm:$0xff]  ;;  %v447_v39 = vld [vmem:[#allocation2 + $0x2b1] sm:$0xff]  ;;  %v448_v50 = vld [vmem:[#allocation2 + $0x2c1] sm:$0xff] }
  0xb6   : > { %1387 = vst.msk [vmem:[#allocation3 + $0x168] sm:$0xff] %vm149_vm0, %v1315_v41  ;;  %v1246_v58 = vmax.f32 %v1174_v5, %v3446_v27  ;;  %v1175_v45 = vmax.f32 %v1103_v44, %v3430_v53  ;;  %v528_v17 = vmax.f32 %v360_v63, %v444_v0  ;;  %v1104_v57 = vmax.f32 %v3390_v37, %v3413_v26  ;;  %v780_v32 = vld [vmem:[#allocation2 + $0x293] sm:$0xff]  ;;  %v781_v42 = vld [vmem:[#allocation2 + $0x2a3] sm:$0xff]  ;;  %v782_v35 = vld [vmem:[#allocation2 + $0x2ab] sm:$0xff] }
  0xb7   : > { %1388 = vst.msk [vmem:[#allocation3 + $0x170] sm:$0xff] %vm149_vm0, %v1316_v29  ;;  %v1317_v60 = vmax.f32 %v1245_v56, %v3461_v8  ;;  %v3470_v38 = vmax.f32 %v862_v49, %v946_v13  ;;  %v863_v43 = vmax.f32 %v695_v15, %v779_v16  ;;  %v529_v20 = vmax.f32 %v361_v51, %v445_v1  ;;  %v615_v30 = vld [vmem:[#allocation2 + $0x2b2] sm:$0xff]  ;;  %v949_v61 = vld [vmem:[#allocation2 + $0x2a4] sm:$0xff] }
  0xb8   : > { %v1247_v31 = vmax.f32 %v1175_v45, %v3453_v33  ;;  %v696_v3 = vmax.f32 %v528_v17, %v612_v59  ;;  %v1176_v11 = vmax.f32 %v1104_v57, %v3438_v2  ;;  %v1105_v37 = vmax.f32 %v3398_v22, %v3421_v4  ;;  %v948_v24 = vld [vmem:[#allocation2 + $0x294] sm:$0xff]  ;;  %v616_v0 = vld [vmem:[#allocation2 + $0x2c2] sm:$0xff]  ;;  %v950_v5 = vld [vmem:[#allocation2 + $0x2ac] sm:$0xff] }
  0xb9   : > { %1389 = vst.msk [vmem:[#allocation3 + $0x178] sm:$0xff] %vm149_vm0, %v1317_v60  ;;  %v1318_v10 = vmax.f32 %v1246_v58, %v3470_v38  ;;  %v3478_v40 = vmax.f32 %v863_v43, %v947_v6  ;;  %v697_v9 = vmax.f32 %v529_v20, %v613_v14  ;;  %v530_v28 = vmax.f32 %v362_v21, %v446_v23  ;;  %v365_v51 = vld [vmem:[#allocation2 + $0x2c8] sm:$0xff]  ;;  %v783_v13 = vld [vmem:[#allocation2 + $0x2b3] sm:$0xff] }
  0xba   : > { %v864_v46 = vmax.f32 %v696_v3, %v780_v32  ;;  %v1248_v25 = vmax.f32 %v1176_v11, %v3461_v8  ;;  %v1177_v47 = vmax.f32 %v1105_v37, %v3446_v27  ;;  %v1106_v22 = vmax.f32 %v3406_v18, %v3430_v53  ;;  %v449_v1 = vld [vmem:[#allocation2 + $0x2c9] sm:$0xff]  ;;  %v450_v58 = vld [vmem:[#allocation2 + $0x2d1] sm:$0xff]  ;;  %v451_v3 = vld [vmem:[#allocation2 + $0x2e1] sm:$0xff] }
  0xbb   : > { %1390 = vst.msk [vmem:[#allocation3 + $0x180] sm:$0xff] %vm149_vm0, %v1318_v10  ;;  %v1319_v52 = vmax.f32 %v1247_v31, %v3478_v40  ;;  %v865_v54 = vmax.f32 %v697_v9, %v781_v42  ;;  %v698_v19 = vmax.f32 %v530_v28, %v614_v34  ;;  %v531_v55 = vmax.f32 %v363_v36, %v447_v39  ;;  %v366_v16 = vld [vmem:[#allocation2 + $0x2d0] sm:$0xff]  ;;  %v784_v23 = vld [vmem:[#allocation2 + $0x2c3] sm:$0xff] }
  0xbc   : > { %v3486_v12 = vmax.f32 %v864_v46, %v948_v24  ;;  %v1249_v62 = vmax.f32 %v1177_v47, %v3470_v38  ;;  %v1178_v63 = vmax.f32 %v1106_v22, %v3453_v33  ;;  %v1107_v18 = vmax.f32 %v3413_v26, %v3438_v2  ;;  %v951_v14 = vld [vmem:[#allocation2 + $0x2b4] sm:$0xff]  ;;  %v617_v60 = vld [vmem:[#allocation2 + $0x2ca] sm:$0xff]  ;;  %v367_v31 = vld [vmem:[#allocation2 + $0x2e0] sm:$0xff] }
  0xbd   : > { %1391 = vst.msk [vmem:[#allocation3 + $0x188] sm:$0xff] %vm149_vm0, %v1319_v52  ;;  %v3493_v41 = vmax.f32 %v865_v54, %v949_v61  ;;  %v866_v56 = vmax.f32 %v698_v19, %v782_v35  ;;  %v699_v7 = vmax.f32 %v531_v55, %v615_v30  ;;  %v532_v44 = vmax.f32 %v364_v48, %v448_v50  ;;  %v618_v20 = vld [vmem:[#allocation2 + $0x2d2] sm:$0xff]  ;;  %v952_v36 = vld [vmem:[#allocation2 + $0x2c4] sm:$0xff] }
  0xbe   : > { %v1320_v29 = vmax.f32 %v1248_v25, %v3486_v12  ;;  %v1250_v49 = vmax.f32 %v1178_v63, %v3478_v40  ;;  %v1179_v15 = vmax.f32 %v1107_v18, %v3461_v8  ;;  %v1108_v26 = vmax.f32 %v3421_v4, %v3446_v27  ;;  %v619_v42 = vld [vmem:[#allocation2 + $0x2e2] sm:$0xff]  ;;  %v785_v22 = vld [vmem:[#allocation2 + $0x2cb] sm:$0xff]  ;;  %v786_v48 = vld [vmem:[#allocation2 + $0x2d3] sm:$0xff] }
  0xbf   : > { %v1321_v45 = vmax.f32 %v1249_v62, %v3493_v41  ;;  %v3501_v17 = vmax.f32 %v866_v56, %v950_v5  ;;  %v867_v57 = vmax.f32 %v699_v7, %v783_v13  ;;  %v700_v21 = vmax.f32 %v532_v44, %v616_v0  ;;  %v368_v28 = vld [vmem:[#allocation2 + $0x2e8] sm:$0xff]  ;;  %v369_v55 = vld [vmem:[#allocation2 + $0x2f0] sm:$0xff] }
  0xc0   : > { %1392 = vst.msk [vmem:[#allocation3 + $0x190] sm:$0xff] %vm149_vm0, %v1320_v29  ;;  %v1251_v43 = vmax.f32 %v1179_v15, %v3486_v12  ;;  %v1180_v6 = vmax.f32 %v1108_v26, %v3470_v38  ;;  %v533_v59 = vmax.f32 %v365_v51, %v449_v1  ;;  %v1109_v4 = vmax.f32 %v3430_v53, %v3453_v33  ;;  %v452_v46 = vld [vmem:[#allocation2 + $0x2e9] sm:$0xff]  ;;  %v453_v61 = vld [vmem:[#allocation2 + $0x2f1] sm:$0xff] }
  0xc1   : > { %1393 = vst.msk [vmem:[#allocation3 + $0x198] sm:$0xff] %vm149_vm0, %v1321_v45  ;;  %v1322_v11 = vmax.f32 %v1250_v49, %v3501_v17  ;;  %v3510_v37 = vmax.f32 %v867_v57, %v951_v14  ;;  %v868_v34 = vmax.f32 %v700_v21, %v784_v23  ;;  %v534_v39 = vmax.f32 %v366_v16, %v450_v58  ;;  %v620_v19 = vld [vmem:[#allocation2 + $0x2ea] sm:$0xff]  ;;  %v954_v5 = vld [vmem:[#allocation2 + $0x2d4] sm:$0xff]  ;;  %v370_v16 = vld [vmem:[#allocation2 + $0x300] sm:$0xff] }
  0xc2   : > { %v1252_v10 = vmax.f32 %v1180_v6, %v3493_v41  ;;  %v701_v32 = vmax.f32 %v533_v59, %v617_v60  ;;  %v1181_v9 = vmax.f32 %v1109_v4, %v3478_v40  ;;  %v1110_v53 = vmax.f32 %v3438_v2, %v3461_v8  ;;  %v953_v35 = vld [vmem:[#allocation2 + $0x2cc] sm:$0xff]  ;;  %v787_v44 = vld [vmem:[#allocation2 + $0x2e3] sm:$0xff] }
  0xc3   : > { %1394 = vst.msk [vmem:[#allocation3 + $0x1a0] sm:$0xff] %vm149_vm0, %v1322_v11  ;;  %v1323_v25 = vmax.f32 %v1251_v43, %v3510_v37  ;;  %v3518_v47 = vmax.f32 %v868_v34, %v952_v36  ;;  %v702_v30 = vmax.f32 %v534_v39, %v618_v20  ;;  %v535_v50 = vmax.f32 %v367_v31, %v451_v3  ;;  %v621_v1 = vld [vmem:[#allocation2 + $0x2f2] sm:$0xff]  ;;  %v955_v13 = vld [vmem:[#allocation2 + $0x2e4] sm:$0xff] }
  0xc4   : > { %v869_v52 = vmax.f32 %v701_v32, %v785_v22  ;;  %v1253_v24 = vmax.f32 %v1181_v9, %v3501_v17  ;;  %v1182_v54 = vmax.f32 %v1110_v53, %v3486_v12  ;;  %v1111_v2 = vmax.f32 %v3446_v27, %v3470_v38  ;;  %v454_v58 = vld [vmem:[#allocation2 + $0x301] sm:$0xff]  ;;  %v788_v14 = vld [vmem:[#allocation2 + $0x2eb] sm:$0xff]  ;;  %v789_v31 = vld [vmem:[#allocation2 + $0x2f3] sm:$0xff] }
  0xc5   : > { %1395 = vst.msk [vmem:[#allocation3 + $0x1a8] sm:$0xff] %vm149_vm0, %v1323_v25  ;;  %v1324_v62 = vmax.f32 %v1252_v10, %v3518_v47  ;;  %v870_v63 = vmax.f32 %v702_v30, %v786_v48  ;;  %v703_v18 = vmax.f32 %v535_v50, %v619_v42  ;;  %v536_v0 = vmax.f32 %v368_v28, %v452_v46  ;;  %v371_v23 = vld [vmem:[#allocation2 + $0x308] sm:$0xff]  ;;  %v372_v10 = vld [vmem:[#allocation2 + $0x310] sm:$0xff]  ;;  %v373_v50 = vld [vmem:[#allocation2 + $0x320] sm:$0xff] }
  0xc6   : > { %v3526_v56 = vmax.f32 %v869_v52, %v953_v35  ;;  %v1254_v7 = vmax.f32 %v1182_v54, %v3510_v37  ;;  %v1183_v51 = vmax.f32 %v1111_v2, %v3493_v41  ;;  %v1112_v27 = vmax.f32 %v3453_v33, %v3478_v40  ;;  %v455_v60 = vld [vmem:[#allocation2 + $0x309] sm:$0xff]  ;;  %v456_v32 = vld [vmem:[#allocation2 + $0x311] sm:$0xff]  ;;  %v457_v52 = vld [vmem:[#allocation2 + $0x321] sm:$0xff] }
  0xc7   : > { %1396 = vst.msk [vmem:[#allocation3 + $0x1b0] sm:$0xff] %vm149_vm0, %v1324_v62  ;;  %v3533_v29 = vmax.f32 %v870_v63, %v954_v5  ;;  %v871_v49 = vmax.f32 %v703_v18, %v787_v44  ;;  %v704_v15 = vmax.f32 %v536_v0, %v620_v19  ;;  %v537_v26 = vmax.f32 %v369_v55, %v453_v61  ;;  %v956_v4 = vld [vmem:[#allocation2 + $0x2ec] sm:$0xff]  ;;  %v622_v3 = vld [vmem:[#allocation2 + $0x302] sm:$0xff]  ;;  %v957_v28 = vld [vmem:[#allocation2 + $0x2f4] sm:$0xff] }
  0xc8   : > { %v1325_v45 = vmax.f32 %v1253_v24, %v3526_v56  ;;  %v1255_v57 = vmax.f32 %v1183_v51, %v3518_v47  ;;  %v1184_v21 = vmax.f32 %v1112_v27, %v3501_v17  ;;  %v1113_v33 = vmax.f32 %v3461_v8, %v3486_v12  ;;  %v623_v39 = vld [vmem:[#allocation2 + $0x30a] sm:$0xff]  ;;  %v624_v48 = vld [vmem:[#allocation2 + $0x312] sm:$0xff]  ;;  %v625_v18 = vld [vmem:[#allocation2 + $0x322] sm:$0xff] }
  0xc9   : > { %v1326_v43 = vmax.f32 %v1254_v7, %v3533_v29  ;;  %v3541_v6 = vmax.f32 %v871_v49, %v955_v13  ;;  %v872_v59 = vmax.f32 %v704_v15, %v788_v14  ;;  %v705_v20 = vmax.f32 %v537_v26, %v621_v1  ;;  %v790_v2 = vld [vmem:[#allocation2 + $0x303] sm:$0xff]  ;;  %v791_v55 = vld [vmem:[#allocation2 + $0x30b] sm:$0xff]  ;;  %v792_v26 = vld [vmem:[#allocation2 + $0x313] sm:$0xff] }
  0xca   : > { %1397 = vst.msk [vmem:[#allocation3 + $0x1b8] sm:$0xff] %vm149_vm0, %v1325_v45  ;;  %v1256_v11 = vmax.f32 %v1184_v21, %v3526_v56  ;;  %v1185_v34 = vmax.f32 %v1113_v33, %v3510_v37  ;;  %v538_v36 = vmax.f32 %v370_v16, %v454_v58  ;;  %v1114_v8 = vmax.f32 %v3470_v38, %v3493_v41  ;;  %v374_v0 = vld [vmem:[#allocation2 + $0x328] sm:$0xff]  ;;  %v960_v21 = vld [vmem:[#allocation2 + $0x314] sm:$0xff] }
  0xcb   : > { %1398 = vst.msk [vmem:[#allocation3 + $0x1c0] sm:$0xff] %vm149_vm0, %v1326_v43  ;;  %v1327_v9 = vmax.f32 %v1255_v57, %v3541_v6  ;;  %v3550_v53 = vmax.f32 %v872_v59, %v956_v4  ;;  %v873_v42 = vmax.f32 %v705_v20, %v789_v31  ;;  %v539_v46 = vmax.f32 %v371_v23, %v455_v60  ;;  %v458_v5 = vld [vmem:[#allocation2 + $0x329] sm:$0xff]  ;;  %v459_v43 = vld [vmem:[#allocation2 + $0x331] sm:$0xff] }
  0xcc   : > { %v1257_v25 = vmax.f32 %v1185_v34, %v3533_v29  ;;  %v706_v22 = vmax.f32 %v538_v36, %v622_v3  ;;  %v1186_v30 = vmax.f32 %v1114_v8, %v3518_v47  ;;  %v1115_v38 = vmax.f32 %v3478_v40, %v3501_v17  ;;  %v958_v44 = vld [vmem:[#allocation2 + $0x304] sm:$0xff]  ;;  %v959_v27 = vld [vmem:[#allocation2 + $0x30c] sm:$0xff] }
  0xcd   : > { %1399 = vst.msk [vmem:[#allocation3 + $0x1c8] sm:$0xff] %vm149_vm0, %v1327_v9  ;;  %v1328_v24 = vmax.f32 %v1256_v11, %v3550_v53  ;;  %v3558_v54 = vmax.f32 %v873_v42, %v957_v28  ;;  %v707_v19 = vmax.f32 %v539_v46, %v623_v39  ;;  %v540_v61 = vmax.f32 %v372_v10, %v456_v32  ;;  %v626_v45 = vld [vmem:[#allocation2 + $0x32a] sm:$0xff]  ;;  %v376_v3 = vld [vmem:[#allocation2 + $0x340] sm:$0xff]  ;;  %v627_v32 = vld [vmem:[#allocation2 + $0x332] sm:$0xff] }
  0xce   : > { %v874_v62 = vmax.f32 %v706_v22, %v790_v2  ;;  %v1258_v35 = vmax.f32 %v1186_v30, %v3541_v6  ;;  %v1187_v63 = vmax.f32 %v1115_v38, %v3526_v56  ;;  %v1116_v40 = vmax.f32 %v3486_v12, %v3510_v37  ;;  %v793_v12 = vld [vmem:[#allocation2 + $0x323] sm:$0xff]  ;;  %v375_v60 = vld [vmem:[#allocation2 + $0x330] sm:$0xff] }
  0xcf   : > { %1400 = vst.msk [vmem:[#allocation3 + $0x1d0] sm:$0xff] %vm149_vm0, %v1328_v24  ;;  %v1329_v7 = vmax.f32 %v1257_v25, %v3558_v54  ;;  %v875_v51 = vmax.f32 %v707_v19, %v791_v55  ;;  %v708_v1 = vmax.f32 %v540_v61, %v624_v48  ;;  %v541_v49 = vmax.f32 %v373_v50, %v457_v52  ;;  %v794_v31 = vld [vmem:[#allocation2 + $0x32b] sm:$0xff]  ;;  %v460_v11 = vld [vmem:[#allocation2 + $0x341] sm:$0xff]  ;;  %v795_v52 = vld [vmem:[#allocation2 + $0x333] sm:$0xff] }
  0xd0   : > { %v3566_v13 = vmax.f32 %v874_v62, %v958_v44  ;;  %v1259_v15 = vmax.f32 %v1187_v63, %v3550_v53  ;;  %v1188_v16 = vmax.f32 %v1116_v40, %v3533_v29  ;;  %v1117_v58 = vmax.f32 %v3493_v41, %v3518_v47  ;;  %v961_v39 = vld [vmem:[#allocation2 + $0x324] sm:$0xff]  ;;  %v962_v50 = vld [vmem:[#allocation2 + $0x32c] sm:$0xff] }
  0xd1   : > { %1401 = vst.msk [vmem:[#allocation3 + $0x1d8] sm:$0xff] %vm149_vm0, %v1329_v7  ;;  %v3573_v57 = vmax.f32 %v875_v51, %v959_v27  ;;  %v876_v14 = vmax.f32 %v708_v1, %v792_v26  ;;  %v709_v33 = vmax.f32 %v541_v49, %v625_v18  ;;  %v542_v23 = vmax.f32 %v374_v0, %v458_v5  ;;  %v628_v46 = vld [vmem:[#allocation2 + $0x342] sm:$0xff]  ;;  %v629_v62 = vld [vmem:[#allocation2 + $0x34a] sm:$0xff]  ;;  %v630_v49 = vld [vmem:[#allocation2 + $0x352] sm:$0xff] }
  0xd2   : > { %v1330_v59 = vmax.f32 %v1258_v35, %v3566_v13  ;;  %v1260_v4 = vmax.f32 %v1188_v16, %v3558_v54  ;;  %v1189_v20 = vmax.f32 %v1117_v58, %v3541_v6  ;;  %v1118_v41 = vmax.f32 %v3501_v17, %v3526_v56  ;;  %v377_v25 = vld [vmem:[#allocation2 + $0x348] sm:$0xff]  ;;  %v378_v35 = vld [vmem:[#allocation2 + $0x350] sm:$0xff] }
  0xd3   : > { %v1331_v34 = vmax.f32 %v1259_v15, %v3573_v57  ;;  %v3581_v36 = vmax.f32 %v876_v14, %v960_v21  ;;  %v877_v8 = vmax.f32 %v709_v33, %v793_v12  ;;  %v710_v10 = vmax.f32 %v542_v23, %v626_v45  ;;  %v461_v22 = vld [vmem:[#allocation2 + $0x349] sm:$0xff]  ;;  %v462_v63 = vld [vmem:[#allocation2 + $0x351] sm:$0xff]  ;;  %v379_v15 = vld [vmem:[#allocation2 + $0x360] sm:$0xff] }
  0xd4   : > { %1402 = vst.msk [vmem:[#allocation3 + $0x1e0] sm:$0xff] %vm149_vm0, %v1330_v59  ;;  %v1261_v9 = vmax.f32 %v1189_v20, %v3566_v13  ;;  %v1190_v42 = vmax.f32 %v1118_v41, %v3550_v53  ;;  %v543_v28 = vmax.f32 %v375_v60, %v459_v43  ;;  %v1119_v17 = vmax.f32 %v3510_v37, %v3533_v29  ;;  %v796_v2 = vld [vmem:[#allocation2 + $0x343] sm:$0xff]  ;;  %v797_v44 = vld [vmem:[#allocation2 + $0x34b] sm:$0xff]  ;;  %v963_v12 = vld [vmem:[#allocation2 + $0x334] sm:$0xff] }
  0xd5   : > { %1403 = vst.msk [vmem:[#allocation3 + $0x1e8] sm:$0xff] %vm149_vm0, %v1331_v34  ;;  %v1332_v30 = vmax.f32 %v1260_v4, %v3581_v36  ;;  %v3590_v38 = vmax.f32 %v877_v8, %v961_v39  ;;  %v878_v48 = vmax.f32 %v710_v10, %v794_v31  ;;  %v544_v24 = vmax.f32 %v376_v3, %v460_v11  ;;  %v964_v5 = vld [vmem:[#allocation2 + $0x344] sm:$0xff]  ;;  %v965_v23 = vld [vmem:[#allocation2 + $0x34c] sm:$0xff]  ;;  %v966_v41 = vld [vmem:[#allocation2 + $0x354] sm:$0xff] }
  0xd6   : > { %v1262_v19 = vmax.f32 %v1190_v42, %v3573_v57  ;;  %v711_v55 = vmax.f32 %v543_v28, %v627_v32  ;;  %v1191_v61 = vmax.f32 %v1119_v17, %v3558_v54  ;;  %v1120_v37 = vmax.f32 %v3518_v47, %v3541_v6  ;;  %v463_v26 = vld [vmem:[#allocation2 + $0x361] sm:$0xff]  ;;  %v798_v43 = vld [vmem:[#allocation2 + $0x353] sm:$0xff]  ;;  %v464_v34 = vld [vmem:[#allocation2 + $0x369] sm:$0xff] }
  0xd7   : > { %1404 = vst.msk [vmem:[#allocation3 + $0x1f0] sm:$0xff] %vm149_vm0, %v1332_v30  ;;  %v1333_v40 = vmax.f32 %v1261_v9, %v3590_v38  ;;  %v3598_v18 = vmax.f32 %v878_v48, %v962_v50  ;;  %v712_v0 = vmax.f32 %v544_v24, %v628_v46  ;;  %v545_v7 = vmax.f32 %v377_v25, %v461_v22  ;;  %v631_v59 = vld [vmem:[#allocation2 + $0x362] sm:$0xff]  ;;  %v381_v9 = vld [vmem:[#allocation2 + $0x370] sm:$0xff] }
  0xd8   : > { %v879_v51 = vmax.f32 %v711_v55, %v795_v52  ;;  %v1263_v27 = vmax.f32 %v1191_v61, %v3581_v36  ;;  %v1192_v1 = vmax.f32 %v1120_v37, %v3566_v13  ;;  %v1121_v47 = vmax.f32 %v3526_v56, %v3550_v53  ;;  %v380_v11 = vld [vmem:[#allocation2 + $0x368] sm:$0xff]  ;;  %v465_v42 = vld [vmem:[#allocation2 + $0x371] sm:$0xff] }
  0xd9   : > { %1405 = vst.msk [vmem:[#allocation3 + $0x1f8] sm:$0xff] %vm149_vm0, %v1333_v40  ;;  %v1334_v16 = vmax.f32 %v1262_v19, %v3598_v18  ;;  %v880_v58 = vmax.f32 %v712_v0, %v796_v2  ;;  %v713_v45 = vmax.f32 %v545_v7, %v629_v62  ;;  %v546_v14 = vmax.f32 %v378_v35, %v462_v63  ;;  %v799_v32 = vld [vmem:[#allocation2 + $0x363] sm:$0xff]  ;;  %v800_v48 = vld [vmem:[#allocation2 + $0x36b] sm:$0xff]  ;;  %v801_v63 = vld [vmem:[#allocation2 + $0x373] sm:$0xff] }
  0xda   : > { %v3606_v21 = vmax.f32 %v879_v51, %v963_v12  ;;  %v1264_v33 = vmax.f32 %v1192_v1, %v3590_v38  ;;  %v1193_v60 = vmax.f32 %v1121_v47, %v3573_v57  ;;  %v1122_v56 = vmax.f32 %v3533_v29, %v3558_v54  ;;  %v967_v22 = vld [vmem:[#allocation2 + $0x364] sm:$0xff]  ;;  %v968_v62 = vld [vmem:[#allocation2 + $0x36c] sm:$0xff] }
  0xdb   : > { %1406 = vst.msk [vmem:[#allocation3 + $0x200] sm:$0xff] %vm149_vm0, %v1334_v16  ;;  %v3613_v4 = vmax.f32 %v880_v58, %v964_v5  ;;  %v881_v20 = vmax.f32 %v713_v45, %v797_v44  ;;  %v714_v31 = vmax.f32 %v546_v14, %v630_v49  ;;  %v547_v3 = vmax.f32 %v379_v15, %v463_v26  ;;  %v632_v30 = vld [vmem:[#allocation2 + $0x36a] sm:$0xff]  ;;  %v1414_v2 = vld [vmem:[#allocation3] sm:$0xff] }
  0xdc   : > { %v1335_v8 = vmax.f32 %v1263_v27, %v3606_v21  ;;  %v1265_v39 = vmax.f32 %v1193_v60, %v3598_v18  ;;  %v1194_v10 = vmax.f32 %v1122_v56, %v3581_v36  ;;  %v1123_v29 = vmax.f32 %v3541_v6, %v3566_v13  ;;  %v633_v13 = vld [vmem:[#allocation2 + $0x372] sm:$0xff]  ;;  %v1462_v19 = vld [vmem:[#allocation3 + $0x4] sm:$0xff] }
  0xdd   : > { %v1336_v28 = vmax.f32 %v1264_v33, %v3613_v4  ;;  %v3621_v17 = vmax.f32 %v881_v20, %v965_v23  ;;  %v882_v46 = vmax.f32 %v714_v31, %v798_v43  ;;  %v715_v25 = vmax.f32 %v547_v3, %v631_v59  ;;  %v1422_v40 = vld [vmem:[#allocation3 + $0x60] sm:$0xff]  ;;  %v1415_v44 = vld [vmem:[#allocation3 + $0x8] sm:$0xff]  ;;  %v1416_v33 = vld [vmem:[#allocation3 + $0x18] sm:$0xff] }
  0xde   : > { %1407 = vst.msk [vmem:[#allocation3 + $0x208] sm:$0xff] %vm149_vm0, %v1335_v8  ;;  %v1266_v50 = vmax.f32 %v1194_v10, %v3606_v21  ;;  %v1195_v52 = vmax.f32 %v1123_v29, %v3590_v38  ;;  %v548_v24 = vmax.f32 %v380_v11, %v464_v34  ;;  %v1124_v6 = vmax.f32 %v3550_v53, %v3573_v57  ;;  %v1470_v0 = vld [vmem:[#allocation3 + $0x64] sm:$0xff]  ;;  %v969_v57 = vld [vmem:[#allocation2 + $0x374] sm:$0xff]  ;;  %v1463_v12 = vld [vmem:[#allocation3 + $0xc] sm:$0xff] }
  0xdf   : > { %1408 = vst.msk [vmem:[#allocation3 + $0x210] sm:$0xff] %vm149_vm0, %v1336_v28  ;;  %v1337_v55 = vmax.f32 %v1265_v39, %v3621_v17  ;;  %v3630_v61 = vmax.f32 %v882_v46, %v966_v41  ;;  %v883_v37 = vmax.f32 %v715_v25, %v799_v32  ;;  %v549_v35 = vmax.f32 %v381_v9, %v465_v42  ;;  %v1430_v51 = vld [vmem:[#allocation3 + $0xc0] sm:$0xff]  ;;  %v1423_v15 = vld [vmem:[#allocation3 + $0x68] sm:$0xff]  ;;  %v1558_v59 = vld [vmem:[#allocation3 + $0x10] sm:$0xff] }
  0xe0   : > { %v1267_v38 = vmax.f32 %v1195_v52, %v3613_v4  ;;  %v716_v5 = vmax.f32 %v548_v24, %v632_v30  ;;  %v1196_v53 = vmax.f32 %v1124_v6, %v3598_v18  ;;  %v1125_v7 = vmax.f32 %v3558_v54, %v3581_v36  ;;  %v1478_v27 = vld [vmem:[#allocation3 + $0xc4] sm:$0xff]  ;;  %v1471_v54 = vld [vmem:[#allocation3 + $0x6c] sm:$0xff]  ;;  %v1424_v20 = vld [vmem:[#allocation3 + $0x78] sm:$0xff] }
  0xe1   : > { %1409 = vst.msk [vmem:[#allocation3 + $0x218] sm:$0xff] %vm149_vm0, %v1337_v55  ;;  %v1338_v1 = vmax.f32 %v1266_v50, %v3630_v61  ;;  %v1051_v47 = vmax.f32 %v883_v37, %v967_v22  ;;  %v717_v49 = vmax.f32 %v549_v35, %v633_v13  ;;  %v1431_v26 = vld [vmem:[#allocation3 + $0xc8] sm:$0xff]  ;;  %v1510_v16 = vmax.f32 %v1414_v2, %v1462_v19  ;;  %v1417_v4 = vld [vmem:[#allocation3 + $0x20] sm:$0xff]  ;;  %v1562_v34 = vld [vmem:[#allocation3 + $0x70] sm:$0xff] }
  0xe2   : > { %v884_v58 = vmax.f32 %v716_v5, %v800_v48  ;;  %v1268_v18 = vmax.f32 %v1196_v53, %v3621_v17  ;;  %v1197_v45 = vmax.f32 %v1125_v7, %v3606_v21  ;;  %v1518_v14 = vmax.f32 %v1422_v40, %v1470_v0  ;;  %v1479_v36 = vld [vmem:[#allocation3 + $0xcc] sm:$0xff]  ;;  %v1464_v31 = vld [vmem:[#allocation3 + $0x1c] sm:$0xff]  ;;  %v1465_v25 = vld [vmem:[#allocation3 + $0x24] sm:$0xff] }
  0xe3   : > { %1410 = vst.msk [vmem:[#allocation3 + $0x220] sm:$0xff] %vm149_vm0, %v1338_v1  ;;  %v1339_v23 = vmax.f32 %v1267_v38, %v1051_v47  ;;  %v885_v60 = vmax.f32 %v717_v49, %v801_v63  ;;  %v1526_v43 = vmax.f32 %v1430_v51, %v1478_v27  ;;  %v1582_v56 = vmax.f32 %v1510_v16, %v1415_v44  ;;  %v1566_v8 = vld [vmem:[#allocation3 + $0xd0] sm:$0xff]  ;;  %v1425_v39 = vld [vmem:[#allocation3 + $0x80] sm:$0xff]  ;;  %v1432_v10 = vld [vmem:[#allocation3 + $0xd8] sm:$0xff] }
  0xe4   : > { %v1052_v41 = vmax.f32 %v884_v58, %v968_v62  ;;  %v1269_v3 = vmax.f32 %v1197_v45, %v3630_v61  ;;  %v3642_v11 = vmax.f32 %v1518_v14, %v1423_v15  ;;  %v1511_v21 = vmax.f32 %v1415_v44, %v1463_v12  ;;  %v1472_v32 = vld [vmem:[#allocation3 + $0x7c] sm:$0xff]  ;;  %v1473_v52 = vld [vmem:[#allocation3 + $0x84] sm:$0xff]  ;;  %v1418_v6 = vld [vmem:[#allocation3 + $0x30] sm:$0xff] }
  0xe5   : > { %1411 = vst.msk [vmem:[#allocation3 + $0x228] sm:$0xff] %vm149_vm0, %v1339_v23  ;;  %v1053_v29 = vmax.f32 %v885_v60, %v969_v57  ;;  %v3645_v9 = vmax.f32 %v1526_v43, %v1431_v26  ;;  %v1519_v42 = vmax.f32 %v1423_v15, %v1471_v54  ;;  %v1527_v28 = vmax.f32 %v1431_v26, %v1479_v36  ;;  %v1433_v17 = vld [vmem:[#allocation3 + $0xe0] sm:$0xff]  ;;  %v1559_v61 = vld [vmem:[#allocation3 + $0x28] sm:$0xff]  ;;  %v1426_v37 = vld [vmem:[#allocation3 + $0x90] sm:$0xff] }
  0xe6   : > { %v1480_v46 = vld [vmem:[#allocation3 + $0xdc] sm:$0xff]  ;;  %v1340_v22 = vmax.f32 %v1268_v18, %v1052_v41  ;;  %v1630_v30 = vmax.f32 %v1582_v56, %v3642_v11  ;;  %v1583_v48 = vmax.f32 %v1511_v21, %v1558_v59  ;;  %v1512_v50 = vmax.f32 %v1416_v33, %v1464_v31  ;;  %v1481_v24 = vld [vmem:[#allocation3 + $0xe4] sm:$0xff]  ;;  %v1466_v62 = vld [vmem:[#allocation3 + $0x34] sm:$0xff] }
  0xe7   : > { %v1341_v13 = vmax.f32 %v1269_v3, %v1053_v29  ;;  %v3648_v2 = vmax.f32 %v1519_v42, %v1562_v34  ;;  %v3650_v19 = vmax.f32 %v1527_v28, %v1566_v8  ;;  %v1520_v55 = vmax.f32 %v1424_v20, %v1472_v32  ;;  %v1474_v35 = vld [vmem:[#allocation3 + $0x94] sm:$0xff]  ;;  %v1563_v5 = vld [vmem:[#allocation3 + $0x88] sm:$0xff]  ;;  %v1467_v15 = vld [vmem:[#allocation3 + $0x3c] sm:$0xff] }
  0xe8   : > { %1412 = vst.msk [vmem:[#allocation3 + $0x230] sm:$0xff] %vm149_vm0, %v1340_v22  ;;  %v1662_v63 = vmax.f32 %v1630_v30, %v3645_v9  ;;  %v1528_v40 = vmax.f32 %v1432_v10, %v1480_v46  ;;  %v1584_v0 = vmax.f32 %v1512_v50, %v1417_v4  ;;  %v1513_v38 = vmax.f32 %v1417_v4, %v1465_v25  ;;  %v1567_v53 = vld [vmem:[#allocation3 + $0xe8] sm:$0xff]  ;;  %v1419_v57 = vld [vmem:[#allocation3 + $0x38] sm:$0xff]  ;;  %v1434_v47 = vld [vmem:[#allocation3 + $0xf0] sm:$0xff] }
  0xe9   : > { %v1427_v7 = vld [vmem:[#allocation3 + $0x98] sm:$0xff]  ;;  %1413 = vst.msk [vmem:[#allocation3 + $0x238] sm:$0xff] %vm149_vm0, %v1341_v13  ;;  %v1631_v44 = vmax.f32 %v1583_v48, %v3648_v2  ;;  %v3656_v51 = vmax.f32 %v1520_v55, %v1425_v39  ;;  %v1521_v27 = vmax.f32 %v1425_v39, %v1473_v52  ;;  %v1529_v1 = vmax.f32 %v1433_v17, %v1481_v24  ;;  %v1560_v60 = vld [vmem:[#allocation3 + $0x40] sm:$0xff]  ;;  %v1420_v43 = vld [vmem:[#allocation3 + $0x48] sm:$0xff] }
  0xea   : > { %v1482_v49 = vld [vmem:[#allocation3 + $0xf4] sm:$0xff]  ;;  %1694 = vst.msk [vmem:[%s2822_s30] sm:$0xff] %vm149_vm0, %v1662_v63  ;;  %v3660_v26 = vmax.f32 %v1528_v40, %v1433_v17  ;;  %v1585_v16 = vmax.f32 %v1513_v38, %v1559_v61  ;;  %v1514_v58 = vmax.f32 %v1418_v6, %v1466_v62  ;;  %v1522_v18 = vmax.f32 %v1426_v37, %v1474_v35  ;;  %v1475_v45 = vld [vmem:[#allocation3 + $0x9c] sm:$0xff]  ;;  %v1468_v59 = vld [vmem:[#allocation3 + $0x4c] sm:$0xff] }
  0xeb   : > { %v1435_v12 = vld [vmem:[#allocation3 + $0xf8] sm:$0xff]  ;;  %v1663_v54 = vmax.f32 %v1631_v44, %v3650_v19  ;;  %v1632_v36 = vmax.f32 %v1584_v0, %v3656_v51  ;;  %v3664_v33 = vmax.f32 %v1521_v27, %v1563_v5  ;;  %v3666_v23 = vmax.f32 %v1529_v1, %v1567_v53  ;;  %v1421_v56 = vld [vmem:[#allocation3 + $0x50] sm:$0xff]  ;;  %v1564_v3 = vld [vmem:[#allocation3 + $0xa0] sm:$0xff] }
  0xec   : > { %v1483_v14 = vld [vmem:[#allocation3 + $0xfc] sm:$0xff]  ;;  %v1530_v4 = vmax.f32 %v1434_v47, %v1482_v49  ;;  %v1586_v20 = vmax.f32 %v1514_v58, %v1419_v57  ;;  %v3668_v31 = vmax.f32 %v1522_v18, %v1427_v7  ;;  %v1515_v41 = vmax.f32 %v1419_v57, %v1467_v15  ;;  %v1428_v34 = vld [vmem:[#allocation3 + $0xa8] sm:$0xff]  ;;  %v1429_v8 = vld [vmem:[#allocation3 + $0xb0] sm:$0xff] }
  0xed   : > { %v1568_v21 = vld [vmem:[#allocation3 + $0x100] sm:$0xff]  ;;  %v1476_v39 = vld [vmem:[#allocation3 + $0xac] sm:$0xff]  ;;  %1695 = vst.msk [vmem:[%s2822_s30 + $0x8] sm:$0xff] %vm149_vm0, %v1663_v54  ;;  %v1664_v10 = vmax.f32 %v1632_v36, %v3660_v26  ;;  %v1633_v32 = vmax.f32 %v1585_v16, %v3664_v33  ;;  %v1523_v29 = vmax.f32 %v1427_v7, %v1475_v45  ;;  %v1531_v42 = vmax.f32 %v1435_v12, %v1483_v14  ;;  %v1469_v46 = vld [vmem:[#allocation3 + $0x54] sm:$0xff] }
  0xee   : > { %v1436_v28 = vld [vmem:[#allocation3 + $0x108] sm:$0xff]  ;;  %v3674_v25 = vmax.f32 %v1530_v4, %v1435_v12  ;;  %v1634_v22 = vmax.f32 %v1586_v20, %v3668_v31  ;;  %v1587_v30 = vmax.f32 %v1515_v41, %v1560_v60  ;;  %v1437_v48 = vld [vmem:[#allocation3 + $0x110] sm:$0xff]  ;;  %v1516_v50 = vmax.f32 %v1420_v43, %v1468_v59  ;;  %v1438_v37 = vld [vmem:[#allocation3 + $0x120] sm:$0xff] }
  0xef   : > { %v1484_v17 = vld [vmem:[#allocation3 + $0x10c] sm:$0xff]  ;;  %v1477_v52 = vld [vmem:[#allocation3 + $0xb4] sm:$0xff]  ;;  %1696 = vst.msk [vmem:[%s2822_s30 + $0x10] sm:$0xff] %vm149_vm0, %v1664_v10  ;;  %v1665_v6 = vmax.f32 %v1633_v32, %v3666_v23  ;;  %v3680_v13 = vmax.f32 %v1523_v29, %v1564_v3  ;;  %v3682_v55 = vmax.f32 %v1531_v42, %v1568_v21  ;;  %v1524_v61 = vmax.f32 %v1428_v34, %v1476_v39  ;;  %v1486_v62 = vld [vmem:[#allocation3 + $0x124] sm:$0xff] }
  0xf0   : > { %v1485_v24 = vld [vmem:[#allocation3 + $0x114] sm:$0xff]  ;;  %v1666_v35 = vmax.f32 %v1634_v22, %v3674_v25  ;;  %v1532_v63 = vmax.f32 %v1436_v28, %v1484_v17  ;;  %v1588_v40 = vmax.f32 %v1516_v50, %v1421_v56  ;;  %v1517_v0 = vmax.f32 %v1421_v56, %v1469_v46  ;;  %v1439_v53 = vld [vmem:[#allocation3 + $0x128] sm:$0xff]  ;;  %v1488_v49 = vld [vmem:[#allocation3 + $0x13c] sm:$0xff] }
  0xf1   : > { %v1561_v38 = vld [vmem:[#allocation3 + $0x58] sm:$0xff]  ;;  %1697 = vst.msk [vmem:[%s2822_s30 + $0x18] sm:$0xff] %vm149_vm0, %v1665_v6  ;;  %v1635_v57 = vmax.f32 %v1587_v30, %v3680_v13  ;;  %v3688_v7 = vmax.f32 %v1524_v61, %v1429_v8  ;;  %v1525_v44 = vmax.f32 %v1429_v8, %v1477_v52  ;;  %v1533_v27 = vmax.f32 %v1437_v48, %v1485_v24  ;;  %v1487_v1 = vld [vmem:[#allocation3 + $0x12c] sm:$0xff]  ;;  %v1441_v45 = vld [vmem:[#allocation3 + $0x140] sm:$0xff] }
  0xf2   : > { %v1565_v5 = vld [vmem:[#allocation3 + $0xb8] sm:$0xff]  ;;  %1698 = vst.msk [vmem:[%s2822_s30 + $0x20] sm:$0xff] %vm149_vm0, %v1666_v35  ;;  %v3692_v15 = vmax.f32 %v1532_v63, %v1437_v48  ;;  %v1589_v12 = vmax.f32 %v1517_v0, %v1561_v38  ;;  %v1534_v58 = vmax.f32 %v1438_v37, %v1486_v62  ;;  %v1638_v18 = vmax.f32 %v3642_v11, %v3645_v9  ;;  %v1489_v14 = vld [vmem:[#allocation3 + $0x144] sm:$0xff]  ;;  %v1570_v4 = vld [vmem:[#allocation3 + $0x130] sm:$0xff] }
  0xf3   : > { %v1440_v47 = vld [vmem:[#allocation3 + $0x138] sm:$0xff]  ;;  %v1667_v54 = vmax.f32 %v1635_v57, %v3682_v55  ;;  %v1636_v36 = vmax.f32 %v1588_v40, %v3688_v7  ;;  %v3698_v60 = vmax.f32 %v1525_v44, %v1565_v5  ;;  %v1535_v59 = vmax.f32 %v1439_v53, %v1487_v1  ;;  %v1442_v3 = vld [vmem:[#allocation3 + $0x150] sm:$0xff]  ;;  %v1571_v10 = vld [vmem:[#allocation3 + $0x148] sm:$0xff] }
  0xf4   : > { %v1569_v16 = vld [vmem:[#allocation3 + $0x118] sm:$0xff]  ;;  %v3702_v56 = vmax.f32 %v1534_v58, %v1439_v53  ;;  %v1639_v20 = vmax.f32 %v3648_v2, %v3650_v19  ;;  %v1536_v41 = vmax.f32 %v1440_v47, %v1488_v49  ;;  %v1640_v8 = vmax.f32 %v3656_v51, %v3660_v26  ;;  %v1444_v46 = vld [vmem:[#allocation3 + $0x168] sm:$0xff]  ;;  %v1445_v22 = vld [vmem:[#allocation3 + $0x170] sm:$0xff] }
  0xf5   : > { %v3700_v43 = vmax.f32 %v1533_v27, %v1569_v16  ;;  %v1490_v11 = vld [vmem:[#allocation3 + $0x154] sm:$0xff]  ;;  %1699 = vst.msk [vmem:[%s2822_s30 + $0x28] sm:$0xff] %vm149_vm0, %v1667_v54  ;;  %v1668_v21 = vmax.f32 %v1636_v36, %v3692_v15  ;;  %v1637_v34 = vmax.f32 %v1589_v12, %v3698_v60  ;;  %v1537_v39 = vmax.f32 %v1441_v45, %v1489_v14  ;;  %v1491_v29 = vld [vmem:[#allocation3 + $0x15c] sm:$0xff]  ;;  %v1492_v30 = vld [vmem:[#allocation3 + $0x16c] sm:$0xff] }
  0xf6   : > { %v1443_v32 = vld [vmem:[#allocation3 + $0x158] sm:$0xff]  ;;  %v1670_v2 = vmax.f32 %v1638_v18, %v3702_v56  ;;  %v3713_v42 = vmax.f32 %v1535_v59, %v1570_v4  ;;  %v3715_v28 = vmax.f32 %v1536_v41, %v1441_v45  ;;  %v1641_v17 = vmax.f32 %v3664_v33, %v3666_v23  ;;  %v1446_v6 = vld [vmem:[#allocation3 + $0x180] sm:$0xff]  ;;  %v1447_v63 = vld [vmem:[#allocation3 + $0x188] sm:$0xff] }
  0xf7   : > { %1700 = vst.msk [vmem:[%s2822_s30 + $0x30] sm:$0xff] %vm149_vm0, %v1668_v21  ;;  %v1669_v51 = vmax.f32 %v1637_v34, %v3700_v43  ;;  %v3722_v48 = vmax.f32 %v1537_v39, %v1571_v10  ;;  %v1538_v50 = vmax.f32 %v1442_v3, %v1490_v11  ;;  %v1642_v52 = vmax.f32 %v3668_v31, %v3674_v25  ;;  %v1493_v24 = vld [vmem:[#allocation3 + $0x174] sm:$0xff]  ;;  %v1494_v61 = vld [vmem:[#allocation3 + $0x184] sm:$0xff]  ;;  %v1495_v40 = vld [vmem:[#allocation3 + $0x18c] sm:$0xff] }
  0xf8   : > { %1702 = vst.msk [vmem:[%s2822_s30 + $0x40] sm:$0xff] %vm149_vm0, %v1670_v2  ;;  %v1671_v33 = vmax.f32 %v1639_v20, %v3713_v42  ;;  %v1672_v37 = vmax.f32 %v1640_v8, %v3715_v28  ;;  %v1539_v62 = vmax.f32 %v1443_v32, %v1491_v29  ;;  %v1643_v35 = vmax.f32 %v3680_v13, %v3682_v55  ;;  %v1572_v38 = vld [vmem:[#allocation3 + $0x160] sm:$0xff]  ;;  %v1573_v44 = vld [vmem:[#allocation3 + $0x178] sm:$0xff]  ;;  %v1574_v18 = vld [vmem:[#allocation3 + $0x190] sm:$0xff] }
  0xf9   : > { %1701 = vst.msk [vmem:[%s2822_s30 + $0x38] sm:$0xff] %vm149_vm0, %v1669_v51  ;;  %v1673_v31 = vmax.f32 %v1641_v17, %v3722_v48  ;;  %v3735_v0 = vmax.f32 %v1538_v50, %v1443_v32  ;;  %v1540_v5 = vmax.f32 %v1444_v46, %v1492_v30  ;;  %v1644_v53 = vmax.f32 %v3688_v7, %v3692_v15  ;;  %v1448_v47 = vld [vmem:[#allocation3 + $0x198] sm:$0xff]  ;;  %v1449_v45 = vld [vmem:[#allocation3 + $0x1a0] sm:$0xff]  ;;  %v1450_v4 = vld [vmem:[#allocation3 + $0x1b0] sm:$0xff] }
  0xfa   : > { %1703 = vst.msk [vmem:[%s2822_s30 + $0x48] sm:$0xff] %vm149_vm0, %v1671_v33  ;;  %1704 = vst.msk [vmem:[%s2822_s30 + $0x50] sm:$0xff] %vm149_vm0, %v1672_v37  ;;  %v3743_v57 = vmax.f32 %v1539_v62, %v1572_v38  ;;  %v1541_v13 = vmax.f32 %v1445_v22, %v1493_v24  ;;  %v1645_v27 = vmax.f32 %v3698_v60, %v3700_v43  ;;  %v1496_v49 = vld [vmem:[#allocation3 + $0x19c] sm:$0xff]  ;;  %v1497_v14 = vld [vmem:[#allocation3 + $0x1a4] sm:$0xff] }
  0xfb   : > { %v1542_v1 = vmax.f32 %v1446_v6, %v1494_v61  ;;  %1705 = vst.msk [vmem:[%s2822_s30 + $0x58] sm:$0xff] %vm149_vm0, %v1673_v31  ;;  %v1674_v16 = vmax.f32 %v1642_v52, %v3735_v0  ;;  %v3750_v7 = vmax.f32 %v1540_v5, %v1445_v22  ;;  %v1646_v12 = vmax.f32 %v3645_v9, %v3702_v56  ;;  %v1451_v20 = vld [vmem:[#allocation3 + $0x1b8] sm:$0xff]  ;;  %v1452_v8 = vld [vmem:[#allocation3 + $0x1c8] sm:$0xff]  ;;  %v1453_v2 = vld [vmem:[#allocation3 + $0x1d0] sm:$0xff] }
  0xfc   : > { %v1543_v58 = vmax.f32 %v1447_v63, %v1495_v40  ;;  %v1675_v54 = vmax.f32 %v1643_v35, %v3743_v57  ;;  %v3755_v36 = vmax.f32 %v1541_v13, %v1573_v44  ;;  %v1647_v59 = vmax.f32 %v3650_v19, %v3713_v42  ;;  %v1498_v41 = vld [vmem:[#allocation3 + $0x1b4] sm:$0xff]  ;;  %v1499_v34 = vld [vmem:[#allocation3 + $0x1bc] sm:$0xff]  ;;  %v1500_v39 = vld [vmem:[#allocation3 + $0x1cc] sm:$0xff] }
  0xfd   : > { %v3757_v60 = vmax.f32 %v1542_v1, %v1447_v63  ;;  %1706 = vst.msk [vmem:[%s2822_s30 + $0x60] sm:$0xff] %vm149_vm0, %v1674_v16  ;;  %v1676_v9 = vmax.f32 %v1644_v53, %v3750_v7  ;;  %v1544_v11 = vmax.f32 %v1448_v47, %v1496_v49  ;;  %v1648_v21 = vmax.f32 %v3660_v26, %v3715_v28  ;;  %v1501_v17 = vld [vmem:[#allocation3 + $0x1d4] sm:$0xff]  ;;  %v1575_v22 = vld [vmem:[#allocation3 + $0x1a8] sm:$0xff]  ;;  %v1576_v52 = vld [vmem:[#allocation3 + $0x1c0] sm:$0xff] }
  0xfe   : > { %v3764_v3 = vmax.f32 %v1543_v58, %v1574_v18  ;;  %1707 = vst.msk [vmem:[%s2822_s30 + $0x68] sm:$0xff] %vm149_vm0, %v1675_v54  ;;  %v1677_v19 = vmax.f32 %v1645_v27, %v3755_v36  ;;  %v1545_v32 = vmax.f32 %v1449_v45, %v1497_v14  ;;  %v1649_v29 = vmax.f32 %v3666_v23, %v3722_v48  ;;  %v1454_v61 = vld [vmem:[#allocation3 + $0x1e0] sm:$0xff]  ;;  %v1577_v63 = vld [vmem:[#allocation3 + $0x1d8] sm:$0xff]  ;;  %v1455_v40 = vld [vmem:[#allocation3 + $0x1e8] sm:$0xff] }
  0xff   : > { %v1678_v10 = vmax.f32 %v1646_v12, %v3757_v60  ;;  %1708 = vst.msk [vmem:[%s2822_s30 + $0x70] sm:$0xff] %vm149_vm0, %v1676_v9  ;;  %v3777_v46 = vmax.f32 %v1544_v11, %v1449_v45  ;;  %v1546_v30 = vmax.f32 %v1450_v4, %v1498_v41  ;;  %v1650_v51 = vmax.f32 %v3674_v25, %v3735_v0  ;;  %v1502_v33 = vld [vmem:[#allocation3 + $0x1e4] sm:$0xff]  ;;  %v1503_v31 = vld [vmem:[#allocation3 + $0x1ec] sm:$0xff]  ;;  %v1456_v13 = vld [vmem:[#allocation3 + $0x1f8] sm:$0xff] }
 0x100   : > { %v1679_v26 = vmax.f32 %v1647_v59, %v3764_v3  ;;  %1709 = vst.msk [vmem:[%s2822_s30 + $0x78] sm:$0xff] %vm149_vm0, %v1677_v19  ;;  %v3785_v50 = vmax.f32 %v1545_v32, %v1575_v22  ;;  %v1547_v23 = vmax.f32 %v1451_v20, %v1499_v34  ;;  %v1651_v24 = vmax.f32 %v3682_v55, %v3743_v57  ;;  %v1457_v44 = vld [vmem:[#allocation3 + $0x200] sm:$0xff]  ;;  %v1458_v12 = vld [vmem:[#allocation3 + $0x210] sm:$0xff]  ;;  %v1459_v54 = vld [vmem:[#allocation3 + $0x218] sm:$0xff] }
 0x101   : > { %1710 = vst.msk [vmem:[%s2822_s30 + $0x80] sm:$0xff] %vm149_vm0, %v1678_v10  ;;  %v1548_v6 = vmax.f32 %v1452_v8, %v1500_v39  ;;  %v1680_v37 = vmax.f32 %v1648_v21, %v3777_v46  ;;  %v3792_v25 = vmax.f32 %v1546_v30, %v1451_v20  ;;  %v1652_v62 = vmax.f32 %v3692_v15, %v3750_v7  ;;  %v1504_v27 = vld [vmem:[#allocation3 + $0x1fc] sm:$0xff]  ;;  %v1505_v16 = vld [vmem:[#allocation3 + $0x204] sm:$0xff]  ;;  %v1506_v58 = vld [vmem:[#allocation3 + $0x214] sm:$0xff] }
 0x102   : > { %1711 = vst.msk [vmem:[%s2822_s30 + $0x88] sm:$0xff] %vm149_vm0, %v1679_v26  ;;  %v1549_v35 = vmax.f32 %v1453_v2, %v1501_v17  ;;  %v1681_v55 = vmax.f32 %v1649_v29, %v3785_v50  ;;  %v1619_v38 = vmax.f32 %v1547_v23, %v1576_v52  ;;  %v1653_v53 = vmax.f32 %v3700_v43, %v3755_v36  ;;  %v1507_v59 = vld [vmem:[#allocation3 + $0x21c] sm:$0xff]  ;;  %v1578_v4 = vld [vmem:[#allocation3 + $0x1f0] sm:$0xff]  ;;  %v1460_v21 = vld [vmem:[#allocation3 + $0x228] sm:$0xff] }
 0x103   : > { %v3797_v5 = vmax.f32 %v1548_v6, %v1453_v2  ;;  %1712 = vst.msk [vmem:[%s2822_s30 + $0x90] sm:$0xff] %vm149_vm0, %v1680_v37  ;;  %v1682_v15 = vmax.f32 %v1650_v51, %v3792_v25  ;;  %v1550_v47 = vmax.f32 %v1454_v61, %v1502_v33  ;;  %v1654_v49 = vmax.f32 %v3702_v56, %v3757_v60  ;;  %v1508_v34 = vld [vmem:[#allocation3 + $0x22c] sm:$0xff]  ;;  %v1509_v29 = vld [vmem:[#allocation3 + $0x234] sm:$0xff]  ;;  %v1580_v26 = vld [vmem:[#allocation3 + $0x220] sm:$0xff] }
 0x104   : > { %v1621_v1 = vmax.f32 %v1549_v35, %v1577_v63  ;;  %1713 = vst.msk [vmem:[%s2822_s30 + $0x98] sm:$0xff] %vm149_vm0, %v1681_v55  ;;  %v1683_v43 = vmax.f32 %v1651_v24, %v1619_v38  ;;  %v1551_v45 = vmax.f32 %v1455_v40, %v1503_v31  ;;  %v1655_v14 = vmax.f32 %v3713_v42, %v3764_v3  ;;  %v1579_v19 = vld [vmem:[#allocation3 + $0x208] sm:$0xff]  ;;  %v1461_v32 = vld [vmem:[#allocation3 + $0x230] sm:$0xff]  ;;  %v1581_v61 = vld [vmem:[#allocation3 + $0x238] sm:$0xff] }
 0x105   : > { %v1684_v18 = vmax.f32 %v1652_v62, %v3797_v5  ;;  %1714 = vst.msk [vmem:[%s2822_s30 + $0xa0] sm:$0xff] %vm149_vm0, %v1682_v15  ;;  %v1622_v60 = vmax.f32 %v1550_v47, %v1455_v40  ;;  %v1552_v20 = vmax.f32 %v1456_v13, %v1504_v27  ;;  %v1656_v41 = vmax.f32 %v3715_v28, %v3777_v46 }
 0x106   : > { %v1685_v56 = vmax.f32 %v1653_v53, %v1621_v1  ;;  %1715 = vst.msk [vmem:[%s2822_s30 + $0xa8] sm:$0xff] %vm149_vm0, %v1683_v43  ;;  %v1623_v9 = vmax.f32 %v1551_v45, %v1578_v4  ;;  %v1553_v11 = vmax.f32 %v1457_v44, %v1505_v16  ;;  %v1657_v42 = vmax.f32 %v3722_v48, %v3785_v50 }
 0x107   : > { %1716 = vst.msk [vmem:[%s2822_s30 + $0xb0] sm:$0xff] %vm149_vm0, %v1684_v18  ;;  %v1554_v3 = vmax.f32 %v1458_v12, %v1506_v58  ;;  %v1686_v8 = vmax.f32 %v1654_v49, %v1622_v60  ;;  %v1624_v39 = vmax.f32 %v1552_v20, %v1457_v44  ;;  %v1658_v28 = vmax.f32 %v3735_v0, %v3792_v25 }
 0x108   : > { %1717 = vst.msk [vmem:[%s2822_s30 + $0xb8] sm:$0xff] %vm149_vm0, %v1685_v56  ;;  %v1555_v10 = vmax.f32 %v1459_v54, %v1507_v59  ;;  %v1687_v2 = vmax.f32 %v1655_v14, %v1623_v9  ;;  %v1625_v17 = vmax.f32 %v1553_v11, %v1579_v19  ;;  %v1659_v46 = vmax.f32 %v3743_v57, %v1619_v38 }
 0x109   : > { %v1626_v48 = vmax.f32 %v1554_v3, %v1459_v54  ;;  %1718 = vst.msk [vmem:[%s2822_s30 + $0xc0] sm:$0xff] %vm149_vm0, %v1686_v8  ;;  %v1688_v22 = vmax.f32 %v1656_v41, %v1624_v39  ;;  %v1556_v51 = vmax.f32 %v1460_v21, %v1508_v34  ;;  %v1660_v0 = vmax.f32 %v3750_v7, %v3797_v5 }
 0x10a   : > { %v1627_v30 = vmax.f32 %v1555_v10, %v1580_v26  ;;  %1719 = vst.msk [vmem:[%s2822_s30 + $0xc8] sm:$0xff] %vm149_vm0, %v1687_v2  ;;  %v1689_v50 = vmax.f32 %v1657_v42, %v1625_v17  ;;  %v1557_v52 = vmax.f32 %v1461_v32, %v1509_v29  ;;  %v1661_v24 = vmax.f32 %v3755_v36, %v1621_v1 }
 0x10b   : > { %v1690_v23 = vmax.f32 %v1658_v28, %v1626_v48  ;;  %1720 = vst.msk [vmem:[%s2822_s30 + $0xd0] sm:$0xff] %vm149_vm0, %v1688_v22  ;;  %v1628_v6 = vmax.f32 %v1556_v51, %v1461_v32 }
 0x10c   : > { %v1691_v57 = vmax.f32 %v1659_v46, %v1627_v30  ;;  %1721 = vst.msk [vmem:[%s2822_s30 + $0xd8] sm:$0xff] %vm149_vm0, %v1689_v50  ;;  %v1629_v33 = vmax.f32 %v1557_v52, %v1581_v61 }
 0x10d   : > { %1722 = vst.msk [vmem:[%s2822_s30 + $0xe0] sm:$0xff] %vm149_vm0, %v1690_v23  ;;  %v1692_v7 = vmax.f32 %v1660_v0, %v1628_v6 }
 0x10e   : > { %1723 = vst.msk [vmem:[%s2822_s30 + $0xe8] sm:$0xff] %vm149_vm0, %v1691_v57  ;;  %v1693_v37 = vmax.f32 %v1661_v24, %v1629_v33 }
 0x10f   : > { %1724 = vst.msk [vmem:[%s2822_s30 + $0xf0] sm:$0xff] %vm149_vm0, %v1692_v7 }
 0x110   : > { %1725 = vst.msk [vmem:[%s2822_s30 + $0xf8] sm:$0xff] %vm149_vm0, %v1693_v37 }
 0x111 PF: > { %p2543_p0 = scmp.ne.s32.totalorder %s2708_s9, 1 }
 0x112   : > { %v1732_v36 = vld [vmem:[#allocation3 + $0x4a] sm:$0xff] (!%p2543_p0)  ;;  %v1730_v40 = vld [vmem:[#allocation3 + $0x32] sm:$0xff] (!%p2543_p0)  ;;  %v1731_v12 = vld [vmem:[#allocation3 + $0x3a] sm:$0xff] (!%p2543_p0)  ;;  %s2727_s2 = smov (!%p2543_p0), 4   ;;  %vm2010_vm3 = vcmask (!%p2543_p0), 64544  }
 0x113   : > { %1729 = sbr.rel (%p2543_p0) target bundleno = 458 (0x1ca), region = 32  ;;  %v1740_v25 = vld [vmem:[#allocation3 + $0xaa] sm:$0xff] (!%p2543_p0)  ;;  %v1738_v31 = vld [vmem:[#allocation3 + $0x92] sm:$0xff] (!%p2543_p0)  ;;  %v1739_v58 = vld [vmem:[#allocation3 + $0x9a] sm:$0xff] (!%p2543_p0) }
 0x114   : > { %v1772_v62 = vld [vmem:[#allocation3 + $0x4e] sm:$0xff] (!%p2543_p0)  ;;  %v1770_v38 = vld [vmem:[#allocation3 + $0x36] sm:$0xff] (!%p2543_p0)  ;;  %v1771_v43 = vld [vmem:[#allocation3 + $0x3e] sm:$0xff] (!%p2543_p0) }
 0x115   : > { %v1780_v35 = vld [vmem:[#allocation3 + $0xae] sm:$0xff] (!%p2543_p0)  ;;  %v1812_v63 = vmax.f32 (!%p2543_p0), %v1732_v36, %v1772_v62  ;;  %v1778_v5 = vld [vmem:[#allocation3 + $0x96] sm:$0xff] (!%p2543_p0)  ;;  %v1810_v13 = vmax.f32 (!%p2543_p0), %v1730_v40, %v1770_v38  ;;  %v1779_v45 = vld [vmem:[#allocation3 + $0x9e] sm:$0xff] (!%p2543_p0)  ;;  %v1811_v14 = vmax.f32 (!%p2543_p0), %v1731_v12, %v1771_v43 }
 0x116   : > { %v3846_v55 = vmax.f32 (!%p2543_p0), %v1740_v25, %v1780_v35  ;;  %v1733_v53 = vld [vmem:[#allocation3 + $0x52] sm:$0xff] (!%p2543_p0)  ;;  %v3848_v44 = vmax.f32 (!%p2543_p0), %v1738_v31, %v1778_v5  ;;  %v1735_v54 = vld [vmem:[#allocation3 + $0x6a] sm:$0xff] (!%p2543_p0)  ;;  %v1819_v60 = vmax.f32 (!%p2543_p0), %v1739_v58, %v1779_v45  ;;  %v1734_v41 = vld [vmem:[#allocation3 + $0x62] sm:$0xff] (!%p2543_p0) }
 0x117   : > { %v1741_v27 = vld [vmem:[#allocation3 + $0xb2] sm:$0xff] (!%p2543_p0)  ;;  %v1743_v59 = vld [vmem:[#allocation3 + $0xca] sm:$0xff] (!%p2543_p0)  ;;  %v1742_v42 = vld [vmem:[#allocation3 + $0xc2] sm:$0xff] (!%p2543_p0) }
 0x118   : > { %v1773_v15 = vld [vmem:[#allocation3 + $0x56] sm:$0xff] (!%p2543_p0)  ;;  %v1852_v47 = vmax.f32 (!%p2543_p0), %v1812_v63, %v3846_v55  ;;  %v1850_v18 = vmax.f32 (!%p2543_p0), %v1810_v13, %v3848_v44  ;;  %v1775_v4 = vld [vmem:[#allocation3 + $0x6e] sm:$0xff] (!%p2543_p0)  ;;  %v1774_v3 = vld [vmem:[#allocation3 + $0x66] sm:$0xff] (!%p2543_p0)  ;;  %v1851_v34 = vmax.f32 (!%p2543_p0), %v1811_v14, %v1819_v60 }
 0x119   : > { %v1781_v1 = vld [vmem:[#allocation3 + $0xb6] sm:$0xff] (!%p2543_p0)  ;;  %v1813_v49 = vmax.f32 (!%p2543_p0), %v1733_v53, %v1773_v15  ;;  %v1783_v20 = vld [vmem:[#allocation3 + $0xce] sm:$0xff] (!%p2543_p0)  ;;  %v1815_v9 = vmax.f32 (!%p2543_p0), %v1735_v54, %v1775_v4  ;;  %v1782_v21 = vld [vmem:[#allocation3 + $0xc6] sm:$0xff] (!%p2543_p0)  ;;  %v1814_v8 = vmax.f32 (!%p2543_p0), %v1734_v41, %v1774_v3 }
 0x11a   : > { %v3851_v16 = vmax.f32 %v1741_v27, %v1781_v1  ;;  %1918 = vrot.lane.b32.xlu1 %v1852_v47, %s2727_s2  ;;  %1914 = vrot.lane.b32.xlu0 %v1850_v18, %s2727_s2  ;;  %v3857_v11 = vmax.f32 %v1743_v59, %v1783_v20  ;;  %v3859_v39 = vmax.f32 %v1742_v42, %v1782_v21  ;;  %v1737_v19 = vld [vmem:[#allocation3 + $0x82] sm:$0xff]  ;;  %v1736_v29 = vld [vmem:[#allocation3 + $0x7a] sm:$0xff]  ;;  %v1746_v52 = vld [vmem:[#allocation3 + $0xf2] sm:$0xff] }
 0x11b   : > { %v1745_v28 = vld [vmem:[#allocation3 + $0xe2] sm:$0xff]  ;;  %v1744_v2 = vld [vmem:[#allocation3 + $0xda] sm:$0xff]  ;;  %v1749_v7 = vld [vmem:[#allocation3 + $0x112] sm:$0xff] }
 0x11c   : > { %v1853_v56 = vmax.f32 %v1813_v49, %v3851_v16  ;;  %v1777_v10 = vld [vmem:[#allocation3 + $0x86] sm:$0xff]  ;;  %v1855_v17 = vmax.f32 %v1815_v9, %v3857_v11  ;;  %v1776_v46 = vld [vmem:[#allocation3 + $0x7e] sm:$0xff]  ;;  %v1854_v30 = vmax.f32 %v1814_v8, %v3859_v39  ;;  %v1786_v24 = vld [vmem:[#allocation3 + $0xf6] sm:$0xff] }
 0x11d   : > { %v1785_v32 = vld [vmem:[#allocation3 + $0xe6] sm:$0xff]  ;;  %v1817_v48 = vmax.f32 %v1737_v19, %v1777_v10  ;;  %v1784_v22 = vld [vmem:[#allocation3 + $0xde] sm:$0xff]  ;;  %v1816_v51 = vmax.f32 %v1736_v29, %v1776_v46  ;;  %v1826_v33 = vmax.f32 %v1746_v52, %v1786_v24  ;;  %v1789_v37 = vld [vmem:[#allocation3 + $0x116] sm:$0xff] }
 0x11e   : > { %1920 = vrot.lane.b32.xlu1 %v1853_v56, %s2727_s2  ;;  %v1825_v26 = vmax.f32 %v1745_v28, %v1785_v32  ;;  %1916 = vrot.lane.b32.xlu0 %v1851_v34, %s2727_s2  ;;  %v1824_v0 = vmax.f32 %v1744_v2, %v1784_v22  ;;  %v1747_v50 = vld [vmem:[#allocation3 + $0xfa] sm:$0xff]  ;;  %v1748_v36 = vld [vmem:[#allocation3 + $0x10a] sm:$0xff]  ;;  %v1829_v35 = vmax.f32 %v1749_v7, %v1789_v37  ;;  %v1750_v5 = vld [vmem:[#allocation3 + $0x122] sm:$0xff] }
 0x11f   : > { %v1787_v23 = vld [vmem:[#allocation3 + $0xfe] sm:$0xff]  ;;  %v1788_v25 = vld [vmem:[#allocation3 + $0x10e] sm:$0xff]  ;;  %v1858_v63 = vmax.f32 %v3848_v44, %v1826_v33  ;;  %v1790_v53 = vld [vmem:[#allocation3 + $0x126] sm:$0xff] }
 0x120   : > { %v1857_v57 = vmax.f32 %v1817_v48, %v1825_v26  ;;  %v1827_v6 = vmax.f32 %v1747_v50, %v1787_v23  ;;  %v1856_v61 = vmax.f32 %v1816_v51, %v1824_v0  ;;  %v1828_v40 = vmax.f32 %v1748_v36, %v1788_v25  ;;  %v1751_v31 = vld [vmem:[#allocation3 + $0x12a] sm:$0xff]  ;;  %v1753_v47 = vld [vmem:[#allocation3 + $0x142] sm:$0xff]  ;;  %v1752_v12 = vld [vmem:[#allocation3 + $0x13a] sm:$0xff] }
 0x121   : > { %v1791_v38 = vld [vmem:[#allocation3 + $0x12e] sm:$0xff]  ;;  %v1861_v13 = vmax.f32 %v3851_v16, %v1829_v35  ;;  %v1830_v1 = vmax.f32 %v1750_v5, %v1790_v53  ;;  %v1793_v49 = vld [vmem:[#allocation3 + $0x146] sm:$0xff]  ;;  %v1792_v58 = vld [vmem:[#allocation3 + $0x13e] sm:$0xff] }
 0x122   : > { %1924 = vrot.lane.b32.xlu1 %v1855_v17, %s2727_s2  ;;  %1922 = vrot.lane.b32.xlu0 %v1854_v30, %s2727_s2  ;;  %v1859_v62 = vmax.f32 %v1819_v60, %v1827_v6  ;;  %v1831_v27 = vmax.f32 %v1751_v31, %v1791_v38  ;;  %v1860_v15 = vmax.f32 %v3846_v55, %v1828_v40  ;;  %v1755_v45 = vld [vmem:[#allocation3 + $0x15a] sm:$0xff]  ;;  %v1754_v54 = vld [vmem:[#allocation3 + $0x152] sm:$0xff]  ;;  %v1756_v9 = vld [vmem:[#allocation3 + $0x16a] sm:$0xff] }
 0x123   : > { %v1833_v43 = vmax.f32 %v1753_v47, %v1793_v49  ;;  %v1862_v18 = vmax.f32 %v3859_v39, %v1830_v1  ;;  %v1832_v16 = vmax.f32 %v1752_v12, %v1792_v58  ;;  %v1795_v14 = vld [vmem:[#allocation3 + $0x15e] sm:$0xff]  ;;  %v1794_v59 = vld [vmem:[#allocation3 + $0x156] sm:$0xff]  ;;  %v1759_v8 = vld [vmem:[#allocation3 + $0x18a] sm:$0xff] }
 0x124   : > { %v1863_v44 = vmax.f32 %v3857_v11, %v1831_v27  ;;  %v1835_v56 = vmax.f32 %v1755_v45, %v1795_v14  ;;  %v1834_v4 = vmax.f32 %v1754_v54, %v1794_v59  ;;  %v1757_v20 = vld [vmem:[#allocation3 + $0x172] sm:$0xff]  ;;  %v1758_v19 = vld [vmem:[#allocation3 + $0x182] sm:$0xff]  ;;  %v1763_v50 = vld [vmem:[#allocation3 + $0x1ba] sm:$0xff] }
 0x125   : > { %v1865_v55 = vmax.f32 %v1825_v26, %v1833_v43  ;;  %v1864_v60 = vmax.f32 %v1824_v0, %v1832_v16  ;;  %v1797_v41 = vld [vmem:[#allocation3 + $0x176] sm:$0xff]  ;;  %v1796_v11 = vld [vmem:[#allocation3 + $0x16e] sm:$0xff]  ;;  %v1798_v28 = vld [vmem:[#allocation3 + $0x186] sm:$0xff] }
 0x126   : > { %1928 = vrot.lane.b32.xlu1 %v1857_v57, %s2727_s2  ;;  %1926 = vrot.lane.b32.xlu0 %v1856_v61, %s2727_s2  ;;  %v1867_v42 = vmax.f32 %v1827_v6, %v1835_v56  ;;  %v1837_v3 = vmax.f32 %v1757_v20, %v1797_v41  ;;  %v1866_v21 = vmax.f32 %v1826_v33, %v1834_v4  ;;  %v1799_v39 = vld [vmem:[#allocation3 + $0x18e] sm:$0xff]  ;;  %v1761_v17 = vld [vmem:[#allocation3 + $0x1a2] sm:$0xff]  ;;  %v1760_v26 = vld [vmem:[#allocation3 + $0x19a] sm:$0xff] }
 0x127   : > { %v1836_v34 = vmax.f32 %v1756_v9, %v1796_v11  ;;  %v1839_v32 = vmax.f32 %v1759_v8, %v1799_v39  ;;  %v1838_v2 = vmax.f32 %v1758_v19, %v1798_v28  ;;  %v1801_v48 = vld [vmem:[#allocation3 + $0x1a6] sm:$0xff]  ;;  %v1800_v46 = vld [vmem:[#allocation3 + $0x19e] sm:$0xff]  ;;  %v1762_v52 = vld [vmem:[#allocation3 + $0x1b2] sm:$0xff] }
 0x128   : > { %v1869_v10 = vmax.f32 %v1829_v35, %v1837_v3  ;;  %v1841_v30 = vmax.f32 %v1761_v17, %v1801_v48  ;;  %v1840_v0 = vmax.f32 %v1760_v26, %v1800_v46  ;;  %v1803_v23 = vld [vmem:[#allocation3 + $0x1be] sm:$0xff]  ;;  %v1802_v24 = vld [vmem:[#allocation3 + $0x1b6] sm:$0xff]  ;;  %v1764_v36 = vld [vmem:[#allocation3 + $0x1ca] sm:$0xff] }
 0x129   : > { %v1868_v29 = vmax.f32 %v1828_v40, %v1836_v34  ;;  %v1871_v22 = vmax.f32 %v1831_v27, %v1839_v32  ;;  %v1870_v51 = vmax.f32 %v1830_v1, %v1838_v2  ;;  %v1843_v6 = vmax.f32 %v1763_v50, %v1803_v23  ;;  %v1765_v7 = vld [vmem:[#allocation3 + $0x1d2] sm:$0xff]  ;;  %v1767_v31 = vld [vmem:[#allocation3 + $0x1ea] sm:$0xff]  ;;  %v1766_v5 = vld [vmem:[#allocation3 + $0x1e2] sm:$0xff] }
 0x12a   : > { %1932 = vrot.lane.b32.xlu1 %v1859_v62, %s2727_s2  ;;  %1930 = vrot.lane.b32.xlu0 %v1858_v63, %s2727_s2  ;;  %v1873_v57 = vmax.f32 %v1833_v43, %v1841_v30  ;;  %v1872_v61 = vmax.f32 %v1832_v16, %v1840_v0  ;;  %v1842_v33 = vmax.f32 %v1762_v52, %v1802_v24  ;;  %v1805_v37 = vld [vmem:[#allocation3 + $0x1d6] sm:$0xff]  ;;  %v1804_v25 = vld [vmem:[#allocation3 + $0x1ce] sm:$0xff]  ;;  %v1806_v53 = vld [vmem:[#allocation3 + $0x1e6] sm:$0xff] }
 0x12b   : > { %v1875_v62 = vmax.f32 %v1835_v56, %v1843_v6  ;;  %v1845_v35 = vmax.f32 %v1765_v7, %v1805_v37  ;;  %v1844_v40 = vmax.f32 %v1764_v36, %v1804_v25  ;;  %v1807_v38 = vld [vmem:[#allocation3 + $0x1ee] sm:$0xff]  ;;  %v1846_v1 = vmax.f32 %v1766_v5, %v1806_v53  ;;  %v1769_v47 = vld [vmem:[#allocation3 + $0x202] sm:$0xff]  ;;  %v1768_v12 = vld [vmem:[#allocation3 + $0x1fa] sm:$0xff] }
 0x12c   : > { %v1874_v63 = vmax.f32 %v1834_v4, %v1842_v33  ;;  %v1847_v27 = vmax.f32 %v1767_v31, %v1807_v38  ;;  %v1809_v49 = vld [vmem:[#allocation3 + $0x206] sm:$0xff]  ;;  %v1808_v58 = vld [vmem:[#allocation3 + $0x1fe] sm:$0xff] }
 0x12d   : > { %v1849_v43 = vmax.f32 %v1769_v47, %v1809_v49  ;;  %v1848_v16 = vmax.f32 %v1768_v12, %v1808_v58 }
 0x12e   : > { %1936 = vrot.lane.b32.xlu1 %v1861_v13, %s2727_s2  ;;  %1934 = vrot.lane.b32.xlu0 %v1860_v15, %s2727_s2  ;;  %v1877_v13 = vmax.f32 %v1837_v3, %v1845_v35  ;;  %v1876_v15 = vmax.f32 %v1836_v34, %v1844_v40 }
 0x12f   : > { %v1881_v45 = vmax.f32 %v1841_v30, %v1849_v43  ;;  %v1880_v14 = vmax.f32 %v1840_v0, %v1848_v16 }
 0x132   : > { %1940 = vrot.lane.b32.xlu1 %v1863_v44, %s2727_s2  ;;  %1938 = vrot.lane.b32.xlu0 %v1862_v18, %s2727_s2  ;;  %v1879_v44 = vmax.f32 %v1839_v32, %v1847_v27  ;;  %v1878_v18 = vmax.f32 %v1838_v2, %v1846_v1 }
 0x136   : > { %1944 = vrot.lane.b32.xlu1 %v1865_v55, %s2727_s2  ;;  %1942 = vrot.lane.b32.xlu0 %v1864_v60, %s2727_s2 }
 0x13a   : > { %1948 = vrot.lane.b32.xlu1 %v1867_v42, %s2727_s2  ;;  %1946 = vrot.lane.b32.xlu0 %v1866_v21, %s2727_s2 }
 0x13e   : > { %1952 = vrot.lane.b32.xlu1 %v1869_v10, %s2727_s2  ;;  %1950 = vrot.lane.b32.xlu0 %v1868_v29, %s2727_s2 }
 0x142   : > { %1956 = vrot.lane.b32.xlu1 %v1871_v22, %s2727_s2  ;;  %1954 = vrot.lane.b32.xlu0 %v1870_v51, %s2727_s2 }
 0x146   : > { %1960 = vrot.lane.b32.xlu1 %v1873_v57, %s2727_s2  ;;  %1958 = vrot.lane.b32.xlu0 %v1872_v61, %s2727_s2 }
 0x14a   : > { %1964 = vrot.lane.b32.xlu1 %v1875_v62, %s2727_s2  ;;  %1962 = vrot.lane.b32.xlu0 %v1874_v63, %s2727_s2 }
 0x14e   : > { %1968 = vrot.lane.b32.xlu1 %v1877_v13, %s2727_s2  ;;  %1966 = vrot.lane.b32.xlu0 %v1876_v15, %s2727_s2 }
 0x152   : > { %1972 = vrot.lane.b32.xlu1 %v1879_v44, %s2727_s2  ;;  %1970 = vrot.lane.b32.xlu0 %v1878_v18, %s2727_s2 }
 0x156   : > { %1976 = vrot.lane.b32.xlu1 %v1881_v45, %s2727_s2  ;;  %1974 = vrot.lane.b32.xlu0 %v1880_v14, %s2727_s2 }
 0x18c   : > { %v1919_v54 = vpop.permute.xlu1 %1918  ;;  %v1915_v59 = vpop.permute.xlu0 %1914 }
 0x18d   : > { %2013 = vst.msk [vmem:[%s2822_s30 + $0x10] sm:$0xff] %vm2010_vm3, %v1919_v54  ;;  %2011 = vst.msk [vmem:[%s2822_s30] sm:$0xff] %vm2010_vm3, %v1915_v59 }
 0x190   : > { %v1921_v55 = vpop.permute.xlu1 %1920  ;;  %v1917_v56 = vpop.permute.xlu0 %1916 }
 0x191   : > { %2014 = vst.msk [vmem:[%s2822_s30 + $0x18] sm:$0xff] %vm2010_vm3, %v1921_v55  ;;  %2012 = vst.msk [vmem:[%s2822_s30 + $0x8] sm:$0xff] %vm2010_vm3, %v1917_v56 }
 0x194   : > { %v1925_v60 = vpop.permute.xlu1 %1924  ;;  %v1923_v4 = vpop.permute.xlu0 %1922 }
 0x195   : > { %2016 = vst.msk [vmem:[%s2822_s30 + $0x28] sm:$0xff] %vm2010_vm3, %v1925_v60  ;;  %2015 = vst.msk [vmem:[%s2822_s30 + $0x20] sm:$0xff] %vm2010_vm3, %v1923_v4 }
 0x198   : > { %v1929_v20 = vpop.permute.xlu1 %1928  ;;  %v1927_v41 = vpop.permute.xlu0 %1926 }
 0x199   : > { %2018 = vst.msk [vmem:[%s2822_s30 + $0x38] sm:$0xff] %vm2010_vm3, %v1929_v20  ;;  %2017 = vst.msk [vmem:[%s2822_s30 + $0x30] sm:$0xff] %vm2010_vm3, %v1927_v41 }
 0x19c   : > { %v1933_v9 = vpop.permute.xlu1 %1932  ;;  %v1931_v11 = vpop.permute.xlu0 %1930 }
 0x19d   : > { %2020 = vst.msk [vmem:[%s2822_s30 + $0x48] sm:$0xff] %vm2010_vm3, %v1933_v9  ;;  %2019 = vst.msk [vmem:[%s2822_s30 + $0x40] sm:$0xff] %vm2010_vm3, %v1931_v11 }
 0x1a0   : > { %v1937_v42 = vpop.permute.xlu1 %1936  ;;  %v1935_v3 = vpop.permute.xlu0 %1934 }
 0x1a1   : > { %2022 = vst.msk [vmem:[%s2822_s30 + $0x58] sm:$0xff] %vm2010_vm3, %v1937_v42  ;;  %2021 = vst.msk [vmem:[%s2822_s30 + $0x50] sm:$0xff] %vm2010_vm3, %v1935_v3 }
 0x1a4   : > { %v1941_v21 = vpop.permute.xlu1 %1940  ;;  %v1939_v34 = vpop.permute.xlu0 %1938 }
 0x1a5   : > { %2024 = vst.msk [vmem:[%s2822_s30 + $0x68] sm:$0xff] %vm2010_vm3, %v1941_v21  ;;  %2023 = vst.msk [vmem:[%s2822_s30 + $0x60] sm:$0xff] %vm2010_vm3, %v1939_v34 }
 0x1a8   : > { %v1945_v8 = vpop.permute.xlu1 %1944  ;;  %v1943_v39 = vpop.permute.xlu0 %1942 }
 0x1a9   : > { %2026 = vst.msk [vmem:[%s2822_s30 + $0x78] sm:$0xff] %vm2010_vm3, %v1945_v8  ;;  %2025 = vst.msk [vmem:[%s2822_s30 + $0x70] sm:$0xff] %vm2010_vm3, %v1943_v39 }
 0x1ac   : > { %v1949_v19 = vpop.permute.xlu1 %1948  ;;  %v1947_v28 = vpop.permute.xlu0 %1946 }
 0x1ad   : > { %2028 = vst.msk [vmem:[%s2822_s30 + $0x88] sm:$0xff] %vm2010_vm3, %v1949_v19  ;;  %2027 = vst.msk [vmem:[%s2822_s30 + $0x80] sm:$0xff] %vm2010_vm3, %v1947_v28 }
 0x1b0   : > { %v1953_v10 = vpop.permute.xlu1 %1952  ;;  %v1951_v32 = vpop.permute.xlu0 %1950 }
 0x1b1   : > { %2030 = vst.msk [vmem:[%s2822_s30 + $0x98] sm:$0xff] %vm2010_vm3, %v1953_v10  ;;  %2029 = vst.msk [vmem:[%s2822_s30 + $0x90] sm:$0xff] %vm2010_vm3, %v1951_v32 }
 0x1b4   : > { %v1957_v29 = vpop.permute.xlu1 %1956  ;;  %v1955_v2 = vpop.permute.xlu0 %1954 }
 0x1b5   : > { %2032 = vst.msk [vmem:[%s2822_s30 + $0xa8] sm:$0xff] %vm2010_vm3, %v1957_v29  ;;  %2031 = vst.msk [vmem:[%s2822_s30 + $0xa0] sm:$0xff] %vm2010_vm3, %v1955_v2 }
 0x1b8   : > { %v1961_v17 = vpop.permute.xlu1 %1960  ;;  %v1959_v48 = vpop.permute.xlu0 %1958 }
 0x1b9   : > { %2034 = vst.msk [vmem:[%s2822_s30 + $0xb8] sm:$0xff] %vm2010_vm3, %v1961_v17  ;;  %2033 = vst.msk [vmem:[%s2822_s30 + $0xb0] sm:$0xff] %vm2010_vm3, %v1959_v48 }
 0x1bc   : > { %v1965_v26 = vpop.permute.xlu1 %1964  ;;  %v1963_v46 = vpop.permute.xlu0 %1962 }
 0x1bd   : > { %2036 = vst.msk [vmem:[%s2822_s30 + $0xc8] sm:$0xff] %vm2010_vm3, %v1965_v26  ;;  %2035 = vst.msk [vmem:[%s2822_s30 + $0xc0] sm:$0xff] %vm2010_vm3, %v1963_v46 }
 0x1c0   : > { %v1969_v22 = vpop.permute.xlu1 %1968  ;;  %v1967_v30 = vpop.permute.xlu0 %1966 }
 0x1c1   : > { %2038 = vst.msk [vmem:[%s2822_s30 + $0xd8] sm:$0xff] %vm2010_vm3, %v1969_v22  ;;  %2037 = vst.msk [vmem:[%s2822_s30 + $0xd0] sm:$0xff] %vm2010_vm3, %v1967_v30 }
 0x1c4   : > { %v1973_v51 = vpop.permute.xlu1 %1972  ;;  %v1971_v0 = vpop.permute.xlu0 %1970 }
 0x1c5   : > { %2040 = vst.msk [vmem:[%s2822_s30 + $0xe8] sm:$0xff] %vm2010_vm3, %v1973_v51  ;;  %2039 = vst.msk [vmem:[%s2822_s30 + $0xe0] sm:$0xff] %vm2010_vm3, %v1971_v0 }
 0x1c8   : > { %v1977_v50 = vpop.permute.xlu1 %1976  ;;  %v1975_v23 = vpop.permute.xlu0 %1974 }
 0x1c9   : > { %2042 = vst.msk [vmem:[%s2822_s30 + $0xf8] sm:$0xff] %vm2010_vm3, %v1977_v50  ;;  %2041 = vst.msk [vmem:[%s2822_s30 + $0xf0] sm:$0xff] %vm2010_vm3, %v1975_v23 }
 0x1ca PF: > { %p2544_p1 = scmp.ne.s32.totalorder %s2708_s9, 2 }
 0x1cb   : > { %v2050_v52 = vld [vmem:[#allocation3 + $0x7c] sm:$0xff] (!%p2544_p1)  ;;  %v2048_v24 = vld [vmem:[#allocation3 + $0x64] sm:$0xff] (!%p2544_p1)  ;;  %s2728_s3 = smov (!%p2544_p1), 8   ;;  %v2049_v6 = vld [vmem:[#allocation3 + $0x6c] sm:$0xff] (!%p2544_p1)  ;;  %vm2208_vm4 = vcmask (!%p2544_p1), 97344  }
 0x1cc   : > { %2046 = sbr.rel (%p2544_p1) target bundleno = 636 (0x27c), region = 36  ;;  %2116 = vrot.lane.b32.xlu1 (!%p2544_p1), %v2050_v52, %s2728_s3  ;;  %2112 = vrot.lane.b32.xlu0 (!%p2544_p1), %v2048_v24, %s2728_s3  ;;  %v2051_v57 = vld [vmem:[#allocation3 + $0x84] sm:$0xff] (!%p2544_p1)  ;;  %v2053_v61 = vld [vmem:[#allocation3 + $0x9c] sm:$0xff] (!%p2544_p1)  ;;  %v2052_v33 = vld [vmem:[#allocation3 + $0x94] sm:$0xff] (!%p2544_p1) }
 0x1cd   : > { %v2055_v7 = vld [vmem:[#allocation3 + $0xb4] sm:$0xff] (!%p2544_p1)  ;;  %v2054_v37 = vld [vmem:[#allocation3 + $0xac] sm:$0xff] (!%p2544_p1)  ;;  %v2056_v25 = vld [vmem:[#allocation3 + $0xc4] sm:$0xff] (!%p2544_p1) }
 0x1ce   : > { %v2057_v36 = vld [vmem:[#allocation3 + $0xcc] sm:$0xff] (!%p2544_p1)  ;;  %v2059_v62 = vld [vmem:[#allocation3 + $0xe4] sm:$0xff] (!%p2544_p1)  ;;  %v2058_v35 = vld [vmem:[#allocation3 + $0xdc] sm:$0xff] (!%p2544_p1) }
 0x1cf   : > { %v2061_v63 = vld [vmem:[#allocation3 + $0xfc] sm:$0xff] (!%p2544_p1)  ;;  %v2060_v40 = vld [vmem:[#allocation3 + $0xf4] sm:$0xff] (!%p2544_p1)  ;;  %v2062_v38 = vld [vmem:[#allocation3 + $0x10c] sm:$0xff] (!%p2544_p1) }
 0x1d0   : > { %2118 = vrot.lane.b32.xlu1 (!%p2544_p1), %v2051_v57, %s2728_s3  ;;  %2114 = vrot.lane.b32.xlu0 (!%p2544_p1), %v2049_v6, %s2728_s3  ;;  %v2063_v31 = vld [vmem:[#allocation3 + $0x114] sm:$0xff] (!%p2544_p1)  ;;  %v2065_v5 = vld [vmem:[#allocation3 + $0x12c] sm:$0xff] (!%p2544_p1)  ;;  %v2064_v53 = vld [vmem:[#allocation3 + $0x124] sm:$0xff] (!%p2544_p1) }
 0x1d1   : > { %v2067_v13 = vld [vmem:[#allocation3 + $0x144] sm:$0xff] (!%p2544_p1)  ;;  %v2066_v27 = vld [vmem:[#allocation3 + $0x13c] sm:$0xff] (!%p2544_p1)  ;;  %v2068_v1 = vld [vmem:[#allocation3 + $0x154] sm:$0xff] (!%p2544_p1) }
 0x1d2   : > { %v2069_v15 = vld [vmem:[#allocation3 + $0x15c] sm:$0xff] (!%p2544_p1)  ;;  %v2071_v47 = vld [vmem:[#allocation3 + $0x174] sm:$0xff] (!%p2544_p1)  ;;  %v2070_v49 = vld [vmem:[#allocation3 + $0x16c] sm:$0xff] (!%p2544_p1) }
 0x1d3   : > { %v2073_v12 = vld [vmem:[#allocation3 + $0x18c] sm:$0xff]  ;;  %v2072_v58 = vld [vmem:[#allocation3 + $0x184] sm:$0xff]  ;;  %v2074_v43 = vld [vmem:[#allocation3 + $0x19c] sm:$0xff] }
 0x1d4   : > { %2122 = vrot.lane.b32.xlu1 %v2053_v61, %s2728_s3  ;;  %2120 = vrot.lane.b32.xlu0 %v2052_v33, %s2728_s3  ;;  %v2075_v44 = vld [vmem:[#allocation3 + $0x1a4] sm:$0xff]  ;;  %v2077_v18 = vld [vmem:[#allocation3 + $0x1bc] sm:$0xff]  ;;  %v2076_v16 = vld [vmem:[#allocation3 + $0x1b4] sm:$0xff] }
 0x1d5   : > { %v2079_v45 = vld [vmem:[#allocation3 + $0x1d4] sm:$0xff]  ;;  %v2078_v14 = vld [vmem:[#allocation3 + $0x1cc] sm:$0xff] }
 0x1d8   : > { %2126 = vrot.lane.b32.xlu1 %v2055_v7, %s2728_s3  ;;  %2124 = vrot.lane.b32.xlu0 %v2054_v37, %s2728_s3 }
 0x1dc   : > { %2130 = vrot.lane.b32.xlu1 %v2057_v36, %s2728_s3  ;;  %2128 = vrot.lane.b32.xlu0 %v2056_v25, %s2728_s3 }
 0x1e0   : > { %2134 = vrot.lane.b32.xlu1 %v2059_v62, %s2728_s3  ;;  %2132 = vrot.lane.b32.xlu0 %v2058_v35, %s2728_s3 }
 0x1e4   : > { %2138 = vrot.lane.b32.xlu1 %v2061_v63, %s2728_s3  ;;  %2136 = vrot.lane.b32.xlu0 %v2060_v40, %s2728_s3 }
 0x1e8   : > { %2142 = vrot.lane.b32.xlu1 %v2063_v31, %s2728_s3  ;;  %2140 = vrot.lane.b32.xlu0 %v2062_v38, %s2728_s3 }
 0x1ec   : > { %2146 = vrot.lane.b32.xlu1 %v2065_v5, %s2728_s3  ;;  %2144 = vrot.lane.b32.xlu0 %v2064_v53, %s2728_s3 }
 0x1f0   : > { %2150 = vrot.lane.b32.xlu1 %v2067_v13, %s2728_s3  ;;  %2148 = vrot.lane.b32.xlu0 %v2066_v27, %s2728_s3 }
 0x1f4   : > { %2154 = vrot.lane.b32.xlu1 %v2069_v15, %s2728_s3  ;;  %2152 = vrot.lane.b32.xlu0 %v2068_v1, %s2728_s3 }
 0x1f8   : > { %2158 = vrot.lane.b32.xlu1 %v2071_v47, %s2728_s3  ;;  %2156 = vrot.lane.b32.xlu0 %v2070_v49, %s2728_s3 }
 0x1fc   : > { %2162 = vrot.lane.b32.xlu1 %v2073_v12, %s2728_s3  ;;  %2160 = vrot.lane.b32.xlu0 %v2072_v58, %s2728_s3 }
 0x200   : > { %2166 = vrot.lane.b32.xlu1 %v2075_v44, %s2728_s3  ;;  %2164 = vrot.lane.b32.xlu0 %v2074_v43, %s2728_s3 }
 0x204   : > { %2170 = vrot.lane.b32.xlu1 %v2077_v18, %s2728_s3  ;;  %2168 = vrot.lane.b32.xlu0 %v2076_v16, %s2728_s3 }
 0x208   : > { %2174 = vrot.lane.b32.xlu1 %v2079_v45, %s2728_s3  ;;  %2172 = vrot.lane.b32.xlu0 %v2078_v14, %s2728_s3 }
 0x23e   : > { %v2117_v54 = vpop.permute.xlu1 %2116  ;;  %v2113_v59 = vpop.permute.xlu0 %2112 }
 0x23f   : > { %2211 = vst.msk [vmem:[%s2822_s30 + $0x10] sm:$0xff] %vm2208_vm4, %v2117_v54  ;;  %2209 = vst.msk [vmem:[%s2822_s30] sm:$0xff] %vm2208_vm4, %v2113_v59 }
 0x242   : > { %v2119_v55 = vpop.permute.xlu1 %2118  ;;  %v2115_v56 = vpop.permute.xlu0 %2114 }
 0x243   : > { %2212 = vst.msk [vmem:[%s2822_s30 + $0x18] sm:$0xff] %vm2208_vm4, %v2119_v55  ;;  %2210 = vst.msk [vmem:[%s2822_s30 + $0x8] sm:$0xff] %vm2208_vm4, %v2115_v56 }
 0x246   : > { %v2123_v60 = vpop.permute.xlu1 %2122  ;;  %v2121_v4 = vpop.permute.xlu0 %2120 }
 0x247   : > { %2214 = vst.msk [vmem:[%s2822_s30 + $0x28] sm:$0xff] %vm2208_vm4, %v2123_v60  ;;  %2213 = vst.msk [vmem:[%s2822_s30 + $0x20] sm:$0xff] %vm2208_vm4, %v2121_v4 }
 0x24a   : > { %v2127_v20 = vpop.permute.xlu1 %2126  ;;  %v2125_v41 = vpop.permute.xlu0 %2124 }
 0x24b   : > { %2216 = vst.msk [vmem:[%s2822_s30 + $0x38] sm:$0xff] %vm2208_vm4, %v2127_v20  ;;  %2215 = vst.msk [vmem:[%s2822_s30 + $0x30] sm:$0xff] %vm2208_vm4, %v2125_v41 }
 0x24e   : > { %v2131_v9 = vpop.permute.xlu1 %2130  ;;  %v2129_v11 = vpop.permute.xlu0 %2128 }
 0x24f   : > { %2218 = vst.msk [vmem:[%s2822_s30 + $0x48] sm:$0xff] %vm2208_vm4, %v2131_v9  ;;  %2217 = vst.msk [vmem:[%s2822_s30 + $0x40] sm:$0xff] %vm2208_vm4, %v2129_v11 }
 0x252   : > { %v2135_v42 = vpop.permute.xlu1 %2134  ;;  %v2133_v3 = vpop.permute.xlu0 %2132 }
 0x253   : > { %2220 = vst.msk [vmem:[%s2822_s30 + $0x58] sm:$0xff] %vm2208_vm4, %v2135_v42  ;;  %2219 = vst.msk [vmem:[%s2822_s30 + $0x50] sm:$0xff] %vm2208_vm4, %v2133_v3 }
 0x256   : > { %v2139_v21 = vpop.permute.xlu1 %2138  ;;  %v2137_v34 = vpop.permute.xlu0 %2136 }
 0x257   : > { %2222 = vst.msk [vmem:[%s2822_s30 + $0x68] sm:$0xff] %vm2208_vm4, %v2139_v21  ;;  %2221 = vst.msk [vmem:[%s2822_s30 + $0x60] sm:$0xff] %vm2208_vm4, %v2137_v34 }
 0x25a   : > { %v2143_v8 = vpop.permute.xlu1 %2142  ;;  %v2141_v39 = vpop.permute.xlu0 %2140 }
 0x25b   : > { %2224 = vst.msk [vmem:[%s2822_s30 + $0x78] sm:$0xff] %vm2208_vm4, %v2143_v8  ;;  %2223 = vst.msk [vmem:[%s2822_s30 + $0x70] sm:$0xff] %vm2208_vm4, %v2141_v39 }
 0x25e   : > { %v2147_v19 = vpop.permute.xlu1 %2146  ;;  %v2145_v28 = vpop.permute.xlu0 %2144 }
 0x25f   : > { %2226 = vst.msk [vmem:[%s2822_s30 + $0x88] sm:$0xff] %vm2208_vm4, %v2147_v19  ;;  %2225 = vst.msk [vmem:[%s2822_s30 + $0x80] sm:$0xff] %vm2208_vm4, %v2145_v28 }
 0x262   : > { %v2151_v10 = vpop.permute.xlu1 %2150  ;;  %v2149_v32 = vpop.permute.xlu0 %2148 }
 0x263   : > { %2228 = vst.msk [vmem:[%s2822_s30 + $0x98] sm:$0xff] %vm2208_vm4, %v2151_v10  ;;  %2227 = vst.msk [vmem:[%s2822_s30 + $0x90] sm:$0xff] %vm2208_vm4, %v2149_v32 }
 0x266   : > { %v2155_v29 = vpop.permute.xlu1 %2154  ;;  %v2153_v2 = vpop.permute.xlu0 %2152 }
 0x267   : > { %2230 = vst.msk [vmem:[%s2822_s30 + $0xa8] sm:$0xff] %vm2208_vm4, %v2155_v29  ;;  %2229 = vst.msk [vmem:[%s2822_s30 + $0xa0] sm:$0xff] %vm2208_vm4, %v2153_v2 }
 0x26a   : > { %v2159_v17 = vpop.permute.xlu1 %2158  ;;  %v2157_v48 = vpop.permute.xlu0 %2156 }
 0x26b   : > { %2232 = vst.msk [vmem:[%s2822_s30 + $0xb8] sm:$0xff] %vm2208_vm4, %v2159_v17  ;;  %2231 = vst.msk [vmem:[%s2822_s30 + $0xb0] sm:$0xff] %vm2208_vm4, %v2157_v48 }
 0x26e   : > { %v2163_v26 = vpop.permute.xlu1 %2162  ;;  %v2161_v46 = vpop.permute.xlu0 %2160 }
 0x26f   : > { %2234 = vst.msk [vmem:[%s2822_s30 + $0xc8] sm:$0xff] %vm2208_vm4, %v2163_v26  ;;  %2233 = vst.msk [vmem:[%s2822_s30 + $0xc0] sm:$0xff] %vm2208_vm4, %v2161_v46 }
 0x272   : > { %v2167_v22 = vpop.permute.xlu1 %2166  ;;  %v2165_v30 = vpop.permute.xlu0 %2164 }
 0x273   : > { %2236 = vst.msk [vmem:[%s2822_s30 + $0xd8] sm:$0xff] %vm2208_vm4, %v2167_v22  ;;  %2235 = vst.msk [vmem:[%s2822_s30 + $0xd0] sm:$0xff] %vm2208_vm4, %v2165_v30 }
 0x276   : > { %v2171_v51 = vpop.permute.xlu1 %2170  ;;  %v2169_v0 = vpop.permute.xlu0 %2168 }
 0x277   : > { %2238 = vst.msk [vmem:[%s2822_s30 + $0xe8] sm:$0xff] %vm2208_vm4, %v2171_v51  ;;  %2237 = vst.msk [vmem:[%s2822_s30 + $0xe0] sm:$0xff] %vm2208_vm4, %v2169_v0 }
 0x27a   : > { %v2175_v50 = vpop.permute.xlu1 %2174  ;;  %v2173_v23 = vpop.permute.xlu0 %2172 }
 0x27b   : > { %2240 = vst.msk [vmem:[%s2822_s30 + $0xf8] sm:$0xff] %vm2208_vm4, %v2175_v50  ;;  %2239 = vst.msk [vmem:[%s2822_s30 + $0xf0] sm:$0xff] %vm2208_vm4, %v2173_v23 }
 0x27c PF: > { %p2545_p2 = scmp.ne.s32.totalorder %s2708_s9, 3 }
 0x27d   : > { %v2247_v52 = vld [vmem:[%s2820_s29 + $0x10] sm:$0xff] (!%p2545_p2)  ;;  %v2245_v24 = vld [vmem:[%s2820_s29] sm:$0xff] (!%p2545_p2)  ;;  %s2729_s4 = smov (!%p2545_p2), 12   ;;  %v2248_v57 = vld [vmem:[%s2820_s29 + $0x18] sm:$0xff] (!%p2545_p2)  ;;  %vm2405_vm5 = vcmask (!%p2545_p2), 130144  }
 0x27e   : > { %2244 = sbr.rel (%p2545_p2) target bundleno = 814 (0x32e), region = 40  ;;  %2313 = vrot.lane.b32.xlu1 (!%p2545_p2), %v2247_v52, %s2729_s4  ;;  %2309 = vrot.lane.b32.xlu0 (!%p2545_p2), %v2245_v24, %s2729_s4  ;;  %v2246_v6 = vld [vmem:[%s2820_s29 + $0x8] sm:$0xff] (!%p2545_p2)  ;;  %v2249_v33 = vld [vmem:[%s2820_s29 + $0x20] sm:$0xff] (!%p2545_p2) }
 0x27f   : > { %v2250_v61 = vld [vmem:[%s2820_s29 + $0x28] sm:$0xff] (!%p2545_p2)  ;;  %v2252_v7 = vld [vmem:[%s2820_s29 + $0x38] sm:$0xff] (!%p2545_p2)  ;;  %v2251_v37 = vld [vmem:[%s2820_s29 + $0x30] sm:$0xff] (!%p2545_p2) }
 0x280   : > { %v2254_v36 = vld [vmem:[%s2820_s29 + $0x48] sm:$0xff] (!%p2545_p2)  ;;  %v2253_v25 = vld [vmem:[%s2820_s29 + $0x40] sm:$0xff] (!%p2545_p2)  ;;  %v2256_v62 = vld [vmem:[%s2820_s29 + $0x58] sm:$0xff] (!%p2545_p2) }
 0x281   : > { %v2255_v35 = vld [vmem:[%s2820_s29 + $0x50] sm:$0xff] (!%p2545_p2)  ;;  %v2258_v63 = vld [vmem:[%s2820_s29 + $0x68] sm:$0xff] (!%p2545_p2)  ;;  %v2257_v40 = vld [vmem:[%s2820_s29 + $0x60] sm:$0xff] (!%p2545_p2) }
 0x282   : > { %2315 = vrot.lane.b32.xlu1 (!%p2545_p2), %v2248_v57, %s2729_s4  ;;  %2311 = vrot.lane.b32.xlu0 (!%p2545_p2), %v2246_v6, %s2729_s4  ;;  %v2260_v31 = vld [vmem:[%s2820_s29 + $0x78] sm:$0xff] (!%p2545_p2)  ;;  %v2259_v38 = vld [vmem:[%s2820_s29 + $0x70] sm:$0xff] (!%p2545_p2) }
 0x283   : > { %v2262_v5 = vld [vmem:[%s2820_s29 + $0x88] sm:$0xff] (!%p2545_p2)  ;;  %v2261_v53 = vld [vmem:[%s2820_s29 + $0x80] sm:$0xff] (!%p2545_p2)  ;;  %v2264_v13 = vld [vmem:[%s2820_s29 + $0x98] sm:$0xff] (!%p2545_p2) }
 0x284   : > { %v2263_v27 = vld [vmem:[%s2820_s29 + $0x90] sm:$0xff] (!%p2545_p2)  ;;  %v2266_v15 = vld [vmem:[%s2820_s29 + $0xa8] sm:$0xff] (!%p2545_p2)  ;;  %v2265_v1 = vld [vmem:[%s2820_s29 + $0xa0] sm:$0xff] (!%p2545_p2) }
 0x285   : > { %v2268_v47 = vld [vmem:[%s2820_s29 + $0xb8] sm:$0xff]  ;;  %v2267_v49 = vld [vmem:[%s2820_s29 + $0xb0] sm:$0xff]  ;;  %v2270_v12 = vld [vmem:[%s2820_s29 + $0xc8] sm:$0xff] }
 0x286   : > { %2319 = vrot.lane.b32.xlu1 %v2250_v61, %s2729_s4  ;;  %2317 = vrot.lane.b32.xlu0 %v2249_v33, %s2729_s4  ;;  %v2269_v58 = vld [vmem:[%s2820_s29 + $0xc0] sm:$0xff]  ;;  %v2272_v44 = vld [vmem:[%s2820_s29 + $0xd8] sm:$0xff] }
 0x287   : > { %v2271_v43 = vld [vmem:[%s2820_s29 + $0xd0] sm:$0xff]  ;;  %v2274_v18 = vld [vmem:[%s2820_s29 + $0xe8] sm:$0xff]  ;;  %v2273_v16 = vld [vmem:[%s2820_s29 + $0xe0] sm:$0xff] }
 0x288   : > { %v2276_v45 = vld [vmem:[%s2820_s29 + $0xf8] sm:$0xff]  ;;  %v2275_v14 = vld [vmem:[%s2820_s29 + $0xf0] sm:$0xff] }
 0x28a   : > { %2323 = vrot.lane.b32.xlu1 %v2252_v7, %s2729_s4  ;;  %2321 = vrot.lane.b32.xlu0 %v2251_v37, %s2729_s4 }
 0x28e   : > { %2327 = vrot.lane.b32.xlu1 %v2254_v36, %s2729_s4  ;;  %2325 = vrot.lane.b32.xlu0 %v2253_v25, %s2729_s4 }
 0x292   : > { %2331 = vrot.lane.b32.xlu1 %v2256_v62, %s2729_s4  ;;  %2329 = vrot.lane.b32.xlu0 %v2255_v35, %s2729_s4 }
 0x296   : > { %2335 = vrot.lane.b32.xlu1 %v2258_v63, %s2729_s4  ;;  %2333 = vrot.lane.b32.xlu0 %v2257_v40, %s2729_s4 }
 0x29a   : > { %2339 = vrot.lane.b32.xlu1 %v2260_v31, %s2729_s4  ;;  %2337 = vrot.lane.b32.xlu0 %v2259_v38, %s2729_s4 }
 0x29e   : > { %2343 = vrot.lane.b32.xlu1 %v2262_v5, %s2729_s4  ;;  %2341 = vrot.lane.b32.xlu0 %v2261_v53, %s2729_s4 }
 0x2a2   : > { %2347 = vrot.lane.b32.xlu1 %v2264_v13, %s2729_s4  ;;  %2345 = vrot.lane.b32.xlu0 %v2263_v27, %s2729_s4 }
 0x2a6   : > { %2351 = vrot.lane.b32.xlu1 %v2266_v15, %s2729_s4  ;;  %2349 = vrot.lane.b32.xlu0 %v2265_v1, %s2729_s4 }
 0x2aa   : > { %2355 = vrot.lane.b32.xlu1 %v2268_v47, %s2729_s4  ;;  %2353 = vrot.lane.b32.xlu0 %v2267_v49, %s2729_s4 }
 0x2ae   : > { %2359 = vrot.lane.b32.xlu1 %v2270_v12, %s2729_s4  ;;  %2357 = vrot.lane.b32.xlu0 %v2269_v58, %s2729_s4 }
 0x2b2   : > { %2363 = vrot.lane.b32.xlu1 %v2272_v44, %s2729_s4  ;;  %2361 = vrot.lane.b32.xlu0 %v2271_v43, %s2729_s4 }
 0x2b6   : > { %2367 = vrot.lane.b32.xlu1 %v2274_v18, %s2729_s4  ;;  %2365 = vrot.lane.b32.xlu0 %v2273_v16, %s2729_s4 }
 0x2ba   : > { %2371 = vrot.lane.b32.xlu1 %v2276_v45, %s2729_s4  ;;  %2369 = vrot.lane.b32.xlu0 %v2275_v14, %s2729_s4 }
 0x2f0   : > { %v2314_v54 = vpop.permute.xlu1 %2313  ;;  %v2310_v59 = vpop.permute.xlu0 %2309 }
 0x2f1   : > { %2408 = vst.msk [vmem:[%s2822_s30 + $0x10] sm:$0xff] %vm2405_vm5, %v2314_v54  ;;  %2406 = vst.msk [vmem:[%s2822_s30] sm:$0xff] %vm2405_vm5, %v2310_v59 }
 0x2f4   : > { %v2316_v55 = vpop.permute.xlu1 %2315  ;;  %v2312_v56 = vpop.permute.xlu0 %2311 }
 0x2f5   : > { %2409 = vst.msk [vmem:[%s2822_s30 + $0x18] sm:$0xff] %vm2405_vm5, %v2316_v55  ;;  %2407 = vst.msk [vmem:[%s2822_s30 + $0x8] sm:$0xff] %vm2405_vm5, %v2312_v56 }
 0x2f8   : > { %v2320_v60 = vpop.permute.xlu1 %2319  ;;  %v2318_v4 = vpop.permute.xlu0 %2317 }
 0x2f9   : > { %2411 = vst.msk [vmem:[%s2822_s30 + $0x28] sm:$0xff] %vm2405_vm5, %v2320_v60  ;;  %2410 = vst.msk [vmem:[%s2822_s30 + $0x20] sm:$0xff] %vm2405_vm5, %v2318_v4 }
 0x2fc   : > { %v2324_v20 = vpop.permute.xlu1 %2323  ;;  %v2322_v41 = vpop.permute.xlu0 %2321 }
 0x2fd   : > { %2413 = vst.msk [vmem:[%s2822_s30 + $0x38] sm:$0xff] %vm2405_vm5, %v2324_v20  ;;  %2412 = vst.msk [vmem:[%s2822_s30 + $0x30] sm:$0xff] %vm2405_vm5, %v2322_v41 }
 0x300   : > { %v2328_v9 = vpop.permute.xlu1 %2327  ;;  %v2326_v11 = vpop.permute.xlu0 %2325 }
 0x301   : > { %2415 = vst.msk [vmem:[%s2822_s30 + $0x48] sm:$0xff] %vm2405_vm5, %v2328_v9  ;;  %2414 = vst.msk [vmem:[%s2822_s30 + $0x40] sm:$0xff] %vm2405_vm5, %v2326_v11 }
 0x304   : > { %v2332_v42 = vpop.permute.xlu1 %2331  ;;  %v2330_v3 = vpop.permute.xlu0 %2329 }
 0x305   : > { %2417 = vst.msk [vmem:[%s2822_s30 + $0x58] sm:$0xff] %vm2405_vm5, %v2332_v42  ;;  %2416 = vst.msk [vmem:[%s2822_s30 + $0x50] sm:$0xff] %vm2405_vm5, %v2330_v3 }
 0x308   : > { %v2336_v21 = vpop.permute.xlu1 %2335  ;;  %v2334_v34 = vpop.permute.xlu0 %2333 }
 0x309   : > { %2419 = vst.msk [vmem:[%s2822_s30 + $0x68] sm:$0xff] %vm2405_vm5, %v2336_v21  ;;  %2418 = vst.msk [vmem:[%s2822_s30 + $0x60] sm:$0xff] %vm2405_vm5, %v2334_v34 }
 0x30c   : > { %v2340_v8 = vpop.permute.xlu1 %2339  ;;  %v2338_v39 = vpop.permute.xlu0 %2337 }
 0x30d   : > { %2421 = vst.msk [vmem:[%s2822_s30 + $0x78] sm:$0xff] %vm2405_vm5, %v2340_v8  ;;  %2420 = vst.msk [vmem:[%s2822_s30 + $0x70] sm:$0xff] %vm2405_vm5, %v2338_v39 }
 0x310   : > { %v2344_v19 = vpop.permute.xlu1 %2343  ;;  %v2342_v28 = vpop.permute.xlu0 %2341 }
 0x311   : > { %2423 = vst.msk [vmem:[%s2822_s30 + $0x88] sm:$0xff] %vm2405_vm5, %v2344_v19  ;;  %2422 = vst.msk [vmem:[%s2822_s30 + $0x80] sm:$0xff] %vm2405_vm5, %v2342_v28 }
 0x314   : > { %v2348_v10 = vpop.permute.xlu1 %2347  ;;  %v2346_v32 = vpop.permute.xlu0 %2345 }
 0x315   : > { %2425 = vst.msk [vmem:[%s2822_s30 + $0x98] sm:$0xff] %vm2405_vm5, %v2348_v10  ;;  %2424 = vst.msk [vmem:[%s2822_s30 + $0x90] sm:$0xff] %vm2405_vm5, %v2346_v32 }
 0x318   : > { %v2352_v29 = vpop.permute.xlu1 %2351  ;;  %v2350_v2 = vpop.permute.xlu0 %2349 }
 0x319   : > { %2427 = vst.msk [vmem:[%s2822_s30 + $0xa8] sm:$0xff] %vm2405_vm5, %v2352_v29  ;;  %2426 = vst.msk [vmem:[%s2822_s30 + $0xa0] sm:$0xff] %vm2405_vm5, %v2350_v2 }
 0x31c   : > { %v2356_v17 = vpop.permute.xlu1 %2355  ;;  %v2354_v48 = vpop.permute.xlu0 %2353 }
 0x31d   : > { %2429 = vst.msk [vmem:[%s2822_s30 + $0xb8] sm:$0xff] %vm2405_vm5, %v2356_v17  ;;  %2428 = vst.msk [vmem:[%s2822_s30 + $0xb0] sm:$0xff] %vm2405_vm5, %v2354_v48 }
 0x320   : > { %v2360_v26 = vpop.permute.xlu1 %2359  ;;  %v2358_v46 = vpop.permute.xlu0 %2357 }
 0x321   : > { %2431 = vst.msk [vmem:[%s2822_s30 + $0xc8] sm:$0xff] %vm2405_vm5, %v2360_v26  ;;  %2430 = vst.msk [vmem:[%s2822_s30 + $0xc0] sm:$0xff] %vm2405_vm5, %v2358_v46 }
 0x324   : > { %v2364_v22 = vpop.permute.xlu1 %2363  ;;  %v2362_v30 = vpop.permute.xlu0 %2361 }
 0x325   : > { %2433 = vst.msk [vmem:[%s2822_s30 + $0xd8] sm:$0xff] %vm2405_vm5, %v2364_v22  ;;  %2432 = vst.msk [vmem:[%s2822_s30 + $0xd0] sm:$0xff] %vm2405_vm5, %v2362_v30 }
 0x328   : > { %v2368_v51 = vpop.permute.xlu1 %2367  ;;  %v2366_v0 = vpop.permute.xlu0 %2365 }
 0x329   : > { %2435 = vst.msk [vmem:[%s2822_s30 + $0xe8] sm:$0xff] %vm2405_vm5, %v2368_v51  ;;  %2434 = vst.msk [vmem:[%s2822_s30 + $0xe0] sm:$0xff] %vm2405_vm5, %v2366_v0 }
 0x32c   : > { %v2372_v50 = vpop.permute.xlu1 %2371  ;;  %v2370_v23 = vpop.permute.xlu0 %2369 }
 0x32d   : > { %2437 = vst.msk [vmem:[%s2822_s30 + $0xf8] sm:$0xff] %vm2405_vm5, %v2372_v50  ;;  %2436 = vst.msk [vmem:[%s2822_s30 + $0xf0] sm:$0xff] %vm2405_vm5, %v2370_v23 }
 0x32e PF: > { %s2552_s5 = sshll.u32 %s2712_s10, 12  ;;  %s2452_s20 = sshll.u32 %s2822_s30, 4  ;;  %s4195_s20 = int_to_ptr.vmem [resolvable:$true] %s2452_s20 }
 0x32f   : > { %s4192_s15 = scalar_lea.hbm %s4252_s1, %s2552_s5  ;;  %s4199_s21 = scalar_lea.sflag [#allocation5], %s134_s23 }
 0x330   : > { %s2630_s24 = scalar_lea.vmem %s4195_s20, 4096  ;;  %s2730_s10 = smov [#allocation4]  }
 0x331   : > { %p2631_p4 = scmp.ne.s32.totalorder %s4195_s20, %s2630_s24  ;;  %s2634_s25 = sshll.u32 %s2730_s10, 4  ;;  %s2635_s25 = int_to_ptr.vmem [resolvable:$false] %s2634_s25 }
 0x332   : > { %s2636_s26 = scalar_lea.vmem %s2635_s25, 8192  ;;  %p2637_p7 = scmp.lt.s32.totalorder %s4195_s20, %s2635_s25 }
 0x333   : > { %p2632_p5 = pnand %p2631_p4, %p2792_p3  ;;  %p2638_p8 = scmp.lt.s32.totalorder %s2636_s26, %s2630_s24 }
 0x335   : > { %p2633_p6 = pneg %p2632_p5  ;;  %p2639_p10 = por %p2638_p8, %p2637_p7 }
 0x337   : > { %p2640_p11 = pnand %p2639_p10, %p2633_p6 }
 0x339   : > { %2643 = shalt.err (!%p2640_p11)
}
 0x33a   : > { %s2644_s23 = scalar_lea.hbm %s4192_s15, 4096  ;;  %s2648_s29 = scalar_lea.hbm %s4252_s1, 8192 }
 0x33b   : > { %p2645_p12 = scmp.ne.s32.totalorder %s4192_s15, %s2644_s23  ;;  %p2649_p1 = scmp.lt.u32.totalorder %s4192_s15, %s4252_s1 }
 0x33c   : > { %p2650_p2 = scmp.lt.u32.totalorder %s2648_s29, %s2644_s23  ;;  %p2652_p5 = scmp.lt.u32.totalorder %s2644_s23, %s4192_s15 }
 0x33d   : > { %p2646_p13 = pnand %p2645_p12, %p2792_p3 }
 0x33e   : > { %p2651_p4 = por %p2650_p2, %p2649_p1 }
 0x33f   : > { %p2647_p0 = pneg %p2646_p13 }
 0x340   : > { %p2653_p6 = por %p2652_p5, %p2651_p4 }
 0x342   : > { %p2654_p7 = pnand %p2653_p6, %p2647_p0 }
 0x344   : > { %2657 = shalt.err (!%p2654_p7)
}
 0x345   : > { %s2731_s3 = smov 128   ;;  %s2732_s4 = smov 8  }
 0x346   : > { %2553 = dma.vmem_to_hbm [thread:$0]  (%p2792_p3), %s4195_s20, 4096, %s4192_s15, %s4199_s21, %s2731_s3, %s2731_s3, %s2732_s4  }
 0x347 PF: > { %p2559_p8 = scmp.ge.s32.totalorder %s2724_s13, 2  ;;  %s2467_s5 = sand.u32 1, %s2696_s6  }
 0x348   : > { %s2468_s9 = scalar_lea.sflag [#allocation5], %s2467_s5 }
 0x349   : > { %p2556_p10 = pnand %p2559_p8, %p2802_p9 }
 0x34b   : > { %2691 = dma.done.wait (!%p2556_p10), %s2468_s9, 4096  }
 0x34c   : > { %2693 = vsyncadd (!%p2556_p10), %s2468_s9, 4294963200  ;;  %s14_s13 = sadd.s32 1, %s2724_s13   ;;  %s4255_s6 = smov %s2700_s7 }
 0x34d   : > { %p11_p11 = scmp.ge.s32.totalorder %s14_s13, 10   ;;  %s4256_s7 = smov %s2704_s8 }
 0x34e   : > { %s4257_s8 = smov %s2810_s22  ;;  %s4258_s9 = smov %s2716_s11 }
 0x34f   : > { %s4259_s10 = smov %s2720_s12  ;;  %s4260_s11 = smov %s4263_s16 }
 0x350   : > { %s4261_s12 = smov %s4267_s17  ;;  %13 = sbr.rel (!%p11_p11) target bundleno = 5 (0x5), region = 78 }
 0x357   :  { %2473 = vsyncpa [#allocation5], 1 }
 0x358   :  { %2475 = vsyncpa [#allocation5 + $0x1], 1 }

</bundles_post_ra>
